<compile_context>
chip_gen: v5e
topology: v5e:2x2
jax: 0.10.0
libtpu: 0.0.40
codegen_flags: <defaults>
</compile_context>

<pallas_src>
import functools

import jax
import jax.numpy as jnp
from jax.experimental import pallas as pl
from jax.experimental.pallas import tpu as pltpu

_VMEM_LIMIT = 32 * 1024 * 1024   # > v5e 16 MiB default scoped limit, < v7x 64 MiB physical
_K_ALIGN = 256                   # contraction-dim padding (128 is enough on v5e's 4x128 MXU)


def _compiler_params(dims):
    return pltpu.CompilerParams(dimension_semantics=dims,
                                vmem_limit_bytes=_VMEM_LIMIT)


# --------------------------------------------------------------------------
# CLIPVisionEmbeddings
# --------------------------------------------------------------------------
def _patch_embed_kernel(p_ref, w_ref, pos_ref, o_ref):
    # p_ref:   (1, tn, Kp) bf16  flattened patches (zero padded along K)
    # w_ref:   (Kp, D)     bf16  conv weight as a matmul matrix (zero padded rows)
    # pos_ref: (tn, D)     f32   position-embedding rows for these patches
    # o_ref:   (1, tn, D)  f32
    acc = jnp.dot(p_ref[0], w_ref[...], preferred_element_type=jnp.float32)
    o_ref[0] = (acc + pos_ref[...]).astype(o_ref.dtype)


def clip_vision_embeddings(x, conv_weight, class_embedding, pos_table, patch_size):
    """x: (B, 3, H, W) f32 NCHW.  conv_weight: (D, 3, P, P).  Returns (B, N+1, D) f32."""
    B, C, H, W = x.shape
    P = patch_size
    gh, gw = H // P, W // P
    N = gh * gw
    D = conv_weight.shape[0]
    K = C * P * P
    Kp = ((K + _K_ALIGN - 1) // _K_ALIGN) * _K_ALIGN

    # Layout plumbing (plain XLA): bf16 first so the rearrange moves half the bytes.
    xb = x.astype(jnp.bfloat16)
    patches = xb.reshape(B, C, gh, P, gw, P)
    patches = jnp.transpose(patches, (0, 2, 4, 1, 3, 5)).reshape(B, N, K)
    patches = jnp.pad(patches, ((0, 0), (0, 0), (0, Kp - K)))
    w = conv_weight.reshape(D, K).T.astype(jnp.bfloat16)           # (K, D), (c,i,j) order
    w = jnp.pad(w, ((0, Kp - K), (0, 0)))
    pos_patch = pos_table[1:].astype(jnp.float32)                  # (N, D)

    # Patch-row tile: multiple of 8 sublanes; also provides a second "parallel"
    # grid axis so v7x's two TensorCores can split one image. (Real CLIP configs
    # would use 128/256 here.)
    tn = 8 if N % 8 == 0 else N

    patch_out = pl.pallas_call(
        _patch_embed_kernel,
        out_shape=jax.ShapeDtypeStruct((B, N, D), jnp.float32),
        grid=(B, N // tn),
        in_specs=[
            pl.BlockSpec((1, tn, Kp), lambda b, n: (b, n, 0)),
            pl.BlockSpec((Kp, D), lambda b, n: (0, 0)),      # grid-invariant weight
            pl.BlockSpec((tn, D), lambda b, n: (n, 0)),
        ],
        out_specs=pl.BlockSpec((1, tn, D), lambda b, n: (b, n, 0)),
        compiler_params=_compiler_params(("parallel", "parallel")),
    )(patches, w, pos_patch)

    # Class-token row (sequence position 0) + concat outside the kernel, keeping
    # the kernel's stores tile-aligned at row 0.
    cls_row = (class_embedding.reshape(1, D) + pos_table[0:1]).astype(jnp.float32)
    cls_rows = jnp.broadcast_to(cls_row[None], (B, 1, D))
    return jnp.concatenate([cls_rows, patch_out], axis=1)


# --------------------------------------------------------------------------
# LayerNorm (pre_layrnorm / post_layernorm)
# --------------------------------------------------------------------------
def _layernorm_kernel(x_ref, g_ref, b_ref, o_ref):
    x = x_ref[0].astype(jnp.float32)                       # (S, D)
    mean = jnp.mean(x, axis=-1, keepdims=True)
    xc = x - mean
    var = jnp.mean(xc * xc, axis=-1, keepdims=True)
    y = xc * jax.lax.rsqrt(var + 1e-5) * g_ref[...] + b_ref[...]
    o_ref[0] = y.astype(o_ref.dtype)


def layer_norm(x, gamma, beta):
    B, S, D = x.shape
    return pl.pallas_call(
        _layernorm_kernel,
        out_shape=jax.ShapeDtypeStruct((B, S, D), jnp.float32),
        grid=(B,),
        in_specs=[
            pl.BlockSpec((1, S, D), lambda b: (b, 0, 0)),
            pl.BlockSpec((1, D), lambda b: (0, 0)),
            pl.BlockSpec((1, D), lambda b: (0, 0)),
        ],
        out_specs=pl.BlockSpec((1, S, D), lambda b: (b, 0, 0)),
        compiler_params=_compiler_params(("parallel",)),
    )(x, gamma.reshape(1, D).astype(jnp.float32), beta.reshape(1, D).astype(jnp.float32))


# --------------------------------------------------------------------------
# Fused CLIPEncoderLayer (LN1 -> multi-head attention -> residual -> LN2 -> MLP -> residual)
# --------------------------------------------------------------------------
def _make_encoder_layer_kernel(num_heads, head_size):
    scale = 1.0 / (head_size ** 0.5)

    def _ln(x, g, b):
        mean = jnp.mean(x, axis=-1, keepdims=True)
        xc = x - mean
        var = jnp.mean(xc * xc, axis=-1, keepdims=True)
        return xc * jax.lax.rsqrt(var + 1e-5) * g + b

    def kernel(x_ref, ln1g, ln1b, wq, bq, wk, bk, wv, bv, wo, bo,
               ln2g, ln2b, w1, b1, w2, b2, o_ref):
        x = x_ref[0]                                                    # (S, D) f32
        # --- self-attention sublayer ---
        hb = _ln(x, ln1g[...], ln1b[...]).astype(jnp.bfloat16)          # (S, D) bf16
        attn = jnp.zeros_like(x)
        for h in range(num_heads):                                      # static unroll
            qh = (jnp.dot(hb, wq[h], preferred_element_type=jnp.float32)
                  + bq[h]).astype(jnp.bfloat16)                         # (S, hd)
            kh = (jnp.dot(hb, wk[h], preferred_element_type=jnp.float32)
                  + bk[h]).astype(jnp.bfloat16)
            vh = (jnp.dot(hb, wv[h], preferred_element_type=jnp.float32)
                  + bv[h]).astype(jnp.bfloat16)
            s = jax.lax.dot_general(qh, kh, (((1,), (1,)), ((), ())),
                                    preferred_element_type=jnp.float32) * scale
            s = s - jnp.max(s, axis=-1, keepdims=True)
            e = jnp.exp(s)
            p = (e / jnp.sum(e, axis=-1, keepdims=True)).astype(jnp.bfloat16)
            oh = jnp.dot(p, vh, preferred_element_type=jnp.float32)     # (S, hd)
            attn = attn + jnp.dot(oh.astype(jnp.bfloat16), wo[h],
                                  preferred_element_type=jnp.float32)
        x = x + attn + bo[...]
        # nn.Dropout is the identity in eval/inference mode.
        # --- MLP sublayer ---
        h2 = _ln(x, ln2g[...], ln2b[...]).astype(jnp.bfloat16)
        m = jnp.dot(h2, w1[...], preferred_element_type=jnp.float32) + b1[...]
        m = m * (1.0 / (1.0 + jnp.exp(-1.702 * m)))                     # gelu sigmoid approx
        m = jnp.dot(m.astype(jnp.bfloat16), w2[...],
                    preferred_element_type=jnp.float32) + b2[...]
        o_ref[0] = (x + m).astype(o_ref.dtype)

    return kernel


def encoder_layer(x, lp, num_heads):
    B, S, D = x.shape
    hd = D // num_heads
    inter = lp["w1"].shape[1]

    bf = lambda a: a.astype(jnp.bfloat16)
    f32 = lambda a: a.astype(jnp.float32)
    # Per-head packed projection weights: cheap leading head axis instead of
    # in-kernel lane slicing / head concatenation.
    wq = bf(lp["wq"].reshape(D, num_heads, hd).transpose(1, 0, 2))      # (H, D, hd)
    wk = bf(lp["wk"].reshape(D, num_heads, hd).transpose(1, 0, 2))
    wv = bf(lp["wv"].reshape(D, num_heads, hd).transpose(1, 0, 2))
    wo = bf(lp["wo"].reshape(num_heads, hd, D))                         # (H, hd, D)
    bq = f32(lp["bq"].reshape(num_heads, 1, hd))
    bk = f32(lp["bk"].reshape(num_heads, 1, hd))
    bv = f32(lp["bv"].reshape(num_heads, 1, hd))
    bo = f32(lp["bo"].reshape(1, D))

    args = (x,
            f32(lp["ln1_g"].reshape(1, D)), f32(lp["ln1_b"].reshape(1, D)),
            wq, bq, wk, bk, wv, bv, wo, bo,
            f32(lp["ln2_g"].reshape(1, D)), f32(lp["ln2_b"].reshape(1, D)),
            bf(lp["w1"]), f32(lp["b1"].reshape(1, inter)),
            bf(lp["w2"]), f32(lp["b2"].reshape(1, D)))

    in_specs = [pl.BlockSpec((1, S, D), lambda b: (b, 0, 0))]
    for a in args[1:]:
        in_specs.append(pl.BlockSpec(a.shape, lambda b, nd=a.ndim: (0,) * nd))

    return pl.pallas_call(
        _make_encoder_layer_kernel(num_heads, hd),
        out_shape=jax.ShapeDtypeStruct((B, S, D), jnp.float32),
        grid=(B,),
        in_specs=in_specs,
        out_specs=pl.BlockSpec((1, S, D), lambda b: (b, 0, 0)),
        compiler_params=_compiler_params(("parallel",)),
    )(*args)


# --------------------------------------------------------------------------
# CLIPVisionTransformer forward
# --------------------------------------------------------------------------
@functools.partial(jax.jit, static_argnames=("patch_size", "num_heads"))
def clip_vision_transformer(x, params, patch_size, num_heads):
    h = clip_vision_embeddings(x, params["conv_w"], params["cls"], params["pos"],
                               patch_size)
    h = layer_norm(h, params["pre_g"], params["pre_b"])                 # pre_layrnorm
    for lp in params["layers"]:
        h = encoder_layer(h, lp, num_heads)
    cls_tok = h[:, 0:1, :]                                              # x[:, 0]
    out = layer_norm(cls_tok, params["post_g"], params["post_b"])       # post_layernorm
    return out[:, 0, :]


# --------------------------------------------------------------------------
# Pure-JAX reference (same bf16 operand rounding as the kernels)
# --------------------------------------------------------------------------
def _ref_ln(x, g, b, eps=1e-5):
    mean = jnp.mean(x, axis=-1, keepdims=True)
    xc = x - mean
    var = jnp.mean(xc * xc, axis=-1, keepdims=True)
    return xc * jax.lax.rsqrt(var + eps) * g + b


def _reference(x, params, patch_size, num_heads):
    hp = jax.lax.Precision.HIGHEST
    bf = lambda t: t.astype(jnp.bfloat16).astype(jnp.float32)

    B, C, H, W = x.shape
    P = patch_size
    conv_w = params["conv_w"]
    D = conv_w.shape[0]
    gh, gw = H // P, W // P
    N = gh * gw
    K = C * P * P

    patches = bf(x).reshape(B, C, gh, P, gw, P)
    patches = jnp.transpose(patches, (0, 2, 4, 1, 3, 5)).reshape(B, N, K)
    w = bf(conv_w.reshape(D, K).T)
    pe = jnp.einsum("bnk,kd->bnd", patches, w, precision=hp)
    cls = jnp.broadcast_to(params["cls"].reshape(1, 1, D), (B, 1, D))
    h = jnp.concatenate([cls, pe], axis=1) + params["pos"][None]

    h = _ref_ln(h, params["pre_g"], params["pre_b"])
    hd = D // num_heads
    for lp in params["layers"]:
        hn = bf(_ref_ln(h, lp["ln1_g"], lp["ln1_b"]))
        q = jnp.einsum("bsd,de->bse", hn, bf(lp["wq"]), precision=hp) + lp["bq"]
        k = jnp.einsum("bsd,de->bse", hn, bf(lp["wk"]), precision=hp) + lp["bk"]
        v = jnp.einsum("bsd,de->bse", hn, bf(lp["wv"]), precision=hp) + lp["bv"]
        split = lambda t: t.reshape(B, -1, num_heads, hd).transpose(0, 2, 1, 3)
        qh, kh, vh = split(q), split(k), split(v)
        s = jnp.einsum("bhqe,bhke->bhqk", bf(qh), bf(kh), precision=hp) * (1.0 / hd ** 0.5)
        s = s - jnp.max(s, axis=-1, keepdims=True)
        e = jnp.exp(s)
        a = e / jnp.sum(e, axis=-1, keepdims=True)
        o = jnp.einsum("bhqk,bhke->bhqe", bf(a), bf(vh), precision=hp)
        o = o.transpose(0, 2, 1, 3).reshape(B, -1, D)
        h = h + jnp.einsum("bsd,de->bse", bf(o), bf(lp["wo"]), precision=hp) + lp["bo"]
        m = jnp.einsum("bsd,di->bsi", bf(_ref_ln(h, lp["ln2_g"], lp["ln2_b"])),
                       bf(lp["w1"]), precision=hp) + lp["b1"]
        m = m * (1.0 / (1.0 + jnp.exp(-1.702 * m)))
        m = jnp.einsum("bsi,id->bsd", bf(m), bf(lp["w2"]), precision=hp) + lp["b2"]
        h = h + m
    return _ref_ln(h[:, 0], params["post_g"], params["post_b"])


if __name__ == "__main__":
    B, C = 2, 3                       # Conv2d(in_channels=3) is fixed by the module
    image_size, patch_size = 32, 8    # -> 4x4 grid, 16 patches, seq = 17
    hidden, num_heads, num_layers = 64, 4, 2
    intermediate = 4 * hidden
    seq = (image_size // patch_size) ** 2 + 1

    keys = iter(jax.random.split(jax.random.PRNGKey(0), 64))
    nrm = lambda shape, s=0.02: jax.random.normal(next(keys), shape, jnp.float32) * s

    x = jax.random.normal(next(keys), (B, C, image_size, image_size), jnp.float32)
    params = {
        "conv_w": nrm((hidden, C, patch_size, patch_size)),
        "cls": jax.random.normal(next(keys), (hidden,), jnp.float32),
        "pos": nrm((seq, hidden)),
        "pre_g": 1.0 + nrm((hidden,)), "pre_b": nrm((hidden,)),
        "post_g": 1.0 + nrm((hidden,)), "post_b": nrm((hidden,)),
        "layers": [],
    }
    for _ in range(num_layers):
        params["layers"].append({
            "ln1_g": 1.0 + nrm((hidden,)), "ln1_b": nrm((hidden,)),
            "wq": nrm((hidden, hidden)), "bq": nrm((hidden,)),
            "wk": nrm((hidden, hidden)), "bk": nrm((hidden,)),
            "wv": nrm((hidden, hidden)), "bv": nrm((hidden,)),
            "wo": nrm((hidden, hidden)), "bo": nrm((hidden,)),
            "ln2_g": 1.0 + nrm((hidden,)), "ln2_b": nrm((hidden,)),
            "w1": nrm((hidden, intermediate)), "b1": nrm((intermediate,)),
            "w2": nrm((intermediate, hidden)), "b2": nrm((hidden,)),
        })

    out = clip_vision_transformer(x, params, patch_size=patch_size, num_heads=num_heads)
    out = jax.block_until_ready(out)

    ref = _reference(x, params, patch_size, num_heads)
    assert out.shape == (B, hidden), out.shape
    max_err = float(jnp.max(jnp.abs(out - ref)))
    assert jnp.allclose(out, ref, atol=1e-2, rtol=1e-2), max_err
    print("KERNEL_OK")
</pallas_src>

<mosaic_0001>
module attributes {stable_mosaic.version = 11 : i64} {
  func.func @_patch_embed_kernel(%arg0: i32, %arg1: i32, %arg2: memref<1x8x256xbf16, #tpu.memory_space<vmem>>, %arg3: memref<256x64xbf16, #tpu.memory_space<vmem>>, %arg4: memref<8x64xf32, #tpu.memory_space<vmem>>, %arg5: memref<1x8x64xf32, #tpu.memory_space<vmem>>) attributes {dimension_semantics = [#tpu.dimension_semantics<parallel>, #tpu.dimension_semantics<parallel>], iteration_bounds = array<i64: 2, 2>, scalar_prefetch = 0 : i64, scratch_operands = 0 : i64, tpu.core_type = #tpu.core_type<tc>, window_params = [{transform_indices = @transform_0, window_bounds = array<i64: 1, 8, 256>}, {pipeline_mode = #tpu.pipeline_mode<synchronous>, transform_indices = @transform_1, window_bounds = array<i64: 256, 64>}, {transform_indices = @transform_2, window_bounds = array<i64: 8, 64>}, {transform_indices = @transform_3, window_bounds = array<i64: 1, 8, 64>}]} {
    %c0 = arith.constant 0 : index
    %c0_0 = arith.constant 0 : index
    %c0_1 = arith.constant 0 : index
    %0 = vector.load %arg2[%c0, %c0_0, %c0_1] : memref<1x8x256xbf16, #tpu.memory_space<vmem>>, vector<1x8x256xbf16>
    %1 = vector.shape_cast %0 : vector<1x8x256xbf16> to vector<8x256xbf16>
    %c0_2 = arith.constant 0 : index
    %c0_3 = arith.constant 0 : index
    %2 = vector.load %arg3[%c0_2, %c0_3] : memref<256x64xbf16, #tpu.memory_space<vmem>>, vector<256x64xbf16>
    %cst = arith.constant dense<0.000000e+00> : vector<8x64xf32>
    %3 = tpu.matmul %1, %2, %cst {dimension_numbers = #tpu.dot_dimension_numbers<[1], [0], [0], [1], [0, 0, 1, 1], [], []>} : vector<8x256xbf16>, vector<256x64xbf16>, vector<8x64xf32> -> vector<8x64xf32>
    %c0_4 = arith.constant 0 : index
    %c0_5 = arith.constant 0 : index
    %4 = vector.load %arg4[%c0_4, %c0_5] : memref<8x64xf32, #tpu.memory_space<vmem>>, vector<8x64xf32>
    %5 = arith.addf %3, %4 : vector<8x64xf32>
    %c0_6 = arith.constant 0 : index
    %c0_7 = arith.constant 0 : index
    %c0_8 = arith.constant 0 : index
    %6 = vector.load %arg5[%c0_6, %c0_7, %c0_8] : memref<1x8x64xf32, #tpu.memory_space<vmem>>, vector<1x8x64xf32>
    %7 = vector.shape_cast %6 : vector<1x8x64xf32> to vector<8x64xf32>
    %8 = vector.shape_cast %5 : vector<8x64xf32> to vector<1x8x64xf32>
    tpu.vector_store %arg5[%c0_6, %c0_7, %c0_8], %8 {strides = array<i32>} : memref<1x8x64xf32, #tpu.memory_space<vmem>>, vector<1x8x64xf32>,
    return
  }
  func.func @transform_0(%arg0: i32, %arg1: i32) -> (i32, i32, i32) {
    %c0_i32 = arith.constant 0 : i32
    %c0_i32_0 = arith.constant 0 : i32
    return %arg0, %arg1, %c0_i32 : i32, i32, i32
  }
  func.func @transform_1(%arg0: i32, %arg1: i32) -> (i32, i32) {
    %c0_i32 = arith.constant 0 : i32
    %c0_i32_0 = arith.constant 0 : i32
    %c0_i32_1 = arith.constant 0 : i32
    return %c0_i32, %c0_i32_0 : i32, i32
  }
  func.func @transform_2(%arg0: i32, %arg1: i32) -> (i32, i32) {
    %c0_i32 = arith.constant 0 : i32
    %c0_i32_0 = arith.constant 0 : i32
    return %arg1, %c0_i32 : i32, i32
  }
  func.func @transform_3(%arg0: i32, %arg1: i32) -> (i32, i32, i32) {
    %c0_i32 = arith.constant 0 : i32
    %c0_i32_0 = arith.constant 0 : i32
    return %arg0, %arg1, %c0_i32 : i32, i32, i32
  }
}

module attributes {stable_mosaic.version = 11 : i64} {
  func.func @_layernorm_kernel(%arg0: i32, %arg1: memref<1x17x64xf32, #tpu.memory_space<vmem>>, %arg2: memref<1x64xf32, #tpu.memory_space<vmem>>, %arg3: memref<1x64xf32, #tpu.memory_space<vmem>>, %arg4: memref<1x17x64xf32, #tpu.memory_space<vmem>>) attributes {dimension_semantics = [#tpu.dimension_semantics<parallel>], iteration_bounds = array<i64: 2>, scalar_prefetch = 0 : i64, scratch_operands = 0 : i64, tpu.core_type = #tpu.core_type<tc>, window_params = [{transform_indices = @transform_0, window_bounds = array<i64: 1, 17, 64>}, {pipeline_mode = #tpu.pipeline_mode<synchronous>, transform_indices = @transform_1, window_bounds = array<i64: 1, 64>}, {pipeline_mode = #tpu.pipeline_mode<synchronous>, transform_indices = @transform_2, window_bounds = array<i64: 1, 64>}, {transform_indices = @transform_3, window_bounds = array<i64: 1, 17, 64>}]} {
    %c0 = arith.constant 0 : index
    %c0_0 = arith.constant 0 : index
    %c0_1 = arith.constant 0 : index
    %0 = vector.load %arg1[%c0, %c0_0, %c0_1] : memref<1x17x64xf32, #tpu.memory_space<vmem>>, vector<1x17x64xf32>
    %1 = vector.shape_cast %0 : vector<1x17x64xf32> to vector<17x64xf32>
    %cst = arith.constant dense<0.000000e+00> : vector<17xf32>
    %2 = vector.multi_reduction <add>, %1, %cst [1] : vector<17x64xf32> to vector<17xf32>
    %3 = vector.shape_cast %2 : vector<17xf32> to vector<17x1xf32>
    %cst_2 = arith.constant 6.400000e+01 : f32
    %4 = vector.broadcast %cst_2 : f32 to vector<17x1xf32>
    %5 = arith.divf %3, %4 : vector<17x1xf32>
    %6 = vector.broadcast %5 : vector<17x1xf32> to vector<17x64xf32>
    %7 = arith.subf %1, %6 : vector<17x64xf32>
    %8 = arith.mulf %7, %7 : vector<17x64xf32>
    %cst_3 = arith.constant dense<0.000000e+00> : vector<17xf32>
    %9 = vector.multi_reduction <add>, %8, %cst_3 [1] : vector<17x64xf32> to vector<17xf32>
    %10 = vector.shape_cast %9 : vector<17xf32> to vector<17x1xf32>
    %cst_4 = arith.constant 6.400000e+01 : f32
    %11 = vector.broadcast %cst_4 : f32 to vector<17x1xf32>
    %12 = arith.divf %10, %11 : vector<17x1xf32>
    %cst_5 = arith.constant 9.99999974E-6 : f32
    %13 = vector.broadcast %cst_5 : f32 to vector<17x1xf32>
    %14 = arith.addf %12, %13 : vector<17x1xf32>
    %15 = math.rsqrt %14 : vector<17x1xf32>
    %16 = vector.broadcast %15 : vector<17x1xf32> to vector<17x64xf32>
    %17 = arith.mulf %7, %16 : vector<17x64xf32>
    %c0_6 = arith.constant 0 : index
    %c0_7 = arith.constant 0 : index
    %18 = vector.load %arg2[%c0_6, %c0_7] : memref<1x64xf32, #tpu.memory_space<vmem>>, vector<1x64xf32>
    %19 = vector.broadcast %18 : vector<1x64xf32> to vector<17x64xf32>
    %20 = arith.mulf %17, %19 : vector<17x64xf32>
    %c0_8 = arith.constant 0 : index
    %c0_9 = arith.constant 0 : index
    %21 = vector.load %arg3[%c0_8, %c0_9] : memref<1x64xf32, #tpu.memory_space<vmem>>, vector<1x64xf32>
    %22 = vector.broadcast %21 : vector<1x64xf32> to vector<17x64xf32>
    %23 = arith.addf %20, %22 : vector<17x64xf32>
    %c0_10 = arith.constant 0 : index
    %c0_11 = arith.constant 0 : index
    %c0_12 = arith.constant 0 : index
    %24 = vector.load %arg4[%c0_10, %c0_11, %c0_12] : memref<1x17x64xf32, #tpu.memory_space<vmem>>, vector<1x17x64xf32>
    %25 = vector.shape_cast %24 : vector<1x17x64xf32> to vector<17x64xf32>
    %26 = vector.shape_cast %23 : vector<17x64xf32> to vector<1x17x64xf32>
    tpu.vector_store %arg4[%c0_10, %c0_11, %c0_12], %26 {strides = array<i32>} : memref<1x17x64xf32, #tpu.memory_space<vmem>>, vector<1x17x64xf32>,
    return
  }
  func.func @transform_0(%arg0: i32) -> (i32, i32, i32) {
    %c0_i32 = arith.constant 0 : i32
    %c0_i32_0 = arith.constant 0 : i32
    %c0_i32_1 = arith.constant 0 : i32
    return %arg0, %c0_i32, %c0_i32_0 : i32, i32, i32
  }
  func.func @transform_1(%arg0: i32) -> (i32, i32) {
    %c0_i32 = arith.constant 0 : i32
    %c0_i32_0 = arith.constant 0 : i32
    %c0_i32_1 = arith.constant 0 : i32
    return %c0_i32, %c0_i32_0 : i32, i32
  }
  func.func @transform_2(%arg0: i32) -> (i32, i32) {
    %c0_i32 = arith.constant 0 : i32
    %c0_i32_0 = arith.constant 0 : i32
    %c0_i32_1 = arith.constant 0 : i32
    return %c0_i32, %c0_i32_0 : i32, i32
  }
  func.func @transform_3(%arg0: i32) -> (i32, i32, i32) {
    %c0_i32 = arith.constant 0 : i32
    %c0_i32_0 = arith.constant 0 : i32
    %c0_i32_1 = arith.constant 0 : i32
    return %arg0, %c0_i32, %c0_i32_0 : i32, i32, i32
  }
}

module attributes {stable_mosaic.version = 11 : i64} {
  func.func @_layernorm_kernel(%arg0: i32, %arg1: memref<1x1x64xf32, #tpu.memory_space<vmem>>, %arg2: memref<1x64xf32, #tpu.memory_space<vmem>>, %arg3: memref<1x64xf32, #tpu.memory_space<vmem>>, %arg4: memref<1x1x64xf32, #tpu.memory_space<vmem>>) attributes {dimension_semantics = [#tpu.dimension_semantics<parallel>], iteration_bounds = array<i64: 2>, scalar_prefetch = 0 : i64, scratch_operands = 0 : i64, tpu.core_type = #tpu.core_type<tc>, window_params = [{transform_indices = @transform_0, window_bounds = array<i64: 1, 1, 64>}, {pipeline_mode = #tpu.pipeline_mode<synchronous>, transform_indices = @transform_1, window_bounds = array<i64: 1, 64>}, {pipeline_mode = #tpu.pipeline_mode<synchronous>, transform_indices = @transform_2, window_bounds = array<i64: 1, 64>}, {transform_indices = @transform_3, window_bounds = array<i64: 1, 1, 64>}]} {
    %c0 = arith.constant 0 : index
    %c0_0 = arith.constant 0 : index
    %c0_1 = arith.constant 0 : index
    %0 = vector.load %arg1[%c0, %c0_0, %c0_1] : memref<1x1x64xf32, #tpu.memory_space<vmem>>, vector<1x1x64xf32>
    %1 = vector.shape_cast %0 : vector<1x1x64xf32> to vector<1x64xf32>
    %cst = arith.constant dense<0.000000e+00> : vector<1xf32>
    %2 = vector.multi_reduction <add>, %1, %cst [1] : vector<1x64xf32> to vector<1xf32>
    %3 = vector.shape_cast %2 : vector<1xf32> to vector<1x1xf32>
    %cst_2 = arith.constant 6.400000e+01 : f32
    %4 = vector.broadcast %cst_2 : f32 to vector<1x1xf32>
    %5 = arith.divf %3, %4 : vector<1x1xf32>
    %6 = vector.broadcast %5 : vector<1x1xf32> to vector<1x64xf32>
    %7 = arith.subf %1, %6 : vector<1x64xf32>
    %8 = arith.mulf %7, %7 : vector<1x64xf32>
    %cst_3 = arith.constant dense<0.000000e+00> : vector<1xf32>
    %9 = vector.multi_reduction <add>, %8, %cst_3 [1] : vector<1x64xf32> to vector<1xf32>
    %10 = vector.shape_cast %9 : vector<1xf32> to vector<1x1xf32>
    %cst_4 = arith.constant 6.400000e+01 : f32
    %11 = vector.broadcast %cst_4 : f32 to vector<1x1xf32>
    %12 = arith.divf %10, %11 : vector<1x1xf32>
    %cst_5 = arith.constant 9.99999974E-6 : f32
    %13 = vector.broadcast %cst_5 : f32 to vector<1x1xf32>
    %14 = arith.addf %12, %13 : vector<1x1xf32>
    %15 = math.rsqrt %14 : vector<1x1xf32>
    %16 = vector.broadcast %15 : vector<1x1xf32> to vector<1x64xf32>
    %17 = arith.mulf %7, %16 : vector<1x64xf32>
    %c0_6 = arith.constant 0 : index
    %c0_7 = arith.constant 0 : index
    %18 = vector.load %arg2[%c0_6, %c0_7] : memref<1x64xf32, #tpu.memory_space<vmem>>, vector<1x64xf32>
    %19 = arith.mulf %17, %18 : vector<1x64xf32>
    %c0_8 = arith.constant 0 : index
    %c0_9 = arith.constant 0 : index
    %20 = vector.load %arg3[%c0_8, %c0_9] : memref<1x64xf32, #tpu.memory_space<vmem>>, vector<1x64xf32>
    %21 = arith.addf %19, %20 : vector<1x64xf32>
    %c0_10 = arith.constant 0 : index
    %c0_11 = arith.constant 0 : index
    %c0_12 = arith.constant 0 : index
    %22 = vector.load %arg4[%c0_10, %c0_11, %c0_12] : memref<1x1x64xf32, #tpu.memory_space<vmem>>, vector<1x1x64xf32>
    %23 = vector.shape_cast %22 : vector<1x1x64xf32> to vector<1x64xf32>
    %24 = vector.shape_cast %21 : vector<1x64xf32> to vector<1x1x64xf32>
    tpu.vector_store %arg4[%c0_10, %c0_11, %c0_12], %24 {strides = array<i32>} : memref<1x1x64xf32, #tpu.memory_space<vmem>>, vector<1x1x64xf32>,
    return
  }
  func.func @transform_0(%arg0: i32) -> (i32, i32, i32) {
    %c0_i32 = arith.constant 0 : i32
    %c0_i32_0 = arith.constant 0 : i32
    %c0_i32_1 = arith.constant 0 : i32
    return %arg0, %c0_i32, %c0_i32_0 : i32, i32, i32
  }
  func.func @transform_1(%arg0: i32) -> (i32, i32) {
    %c0_i32 = arith.constant 0 : i32
    %c0_i32_0 = arith.constant 0 : i32
    %c0_i32_1 = arith.constant 0 : i32
    return %c0_i32, %c0_i32_0 : i32, i32
  }
  func.func @transform_2(%arg0: i32) -> (i32, i32) {
    %c0_i32 = arith.constant 0 : i32
    %c0_i32_0 = arith.constant 0 : i32
    %c0_i32_1 = arith.constant 0 : i32
    return %c0_i32, %c0_i32_0 : i32, i32
  }
  func.func @transform_3(%arg0: i32) -> (i32, i32, i32) {
    %c0_i32 = arith.constant 0 : i32
    %c0_i32_0 = arith.constant 0 : i32
    %c0_i32_1 = arith.constant 0 : i32
    return %arg0, %c0_i32, %c0_i32_0 : i32, i32, i32
  }
}

module attributes {stable_mosaic.version = 11 : i64} {
  func.func @kernel(%arg0: i32, %arg1: memref<1x17x64xf32, #tpu.memory_space<vmem>>, %arg2: memref<1x64xf32, #tpu.memory_space<vmem>>, %arg3: memref<1x64xf32, #tpu.memory_space<vmem>>, %arg4: memref<4x64x16xbf16, #tpu.memory_space<vmem>>, %arg5: memref<4x1x16xf32, #tpu.memory_space<vmem>>, %arg6: memref<4x64x16xbf16, #tpu.memory_space<vmem>>, %arg7: memref<4x1x16xf32, #tpu.memory_space<vmem>>, %arg8: memref<4x64x16xbf16, #tpu.memory_space<vmem>>, %arg9: memref<4x1x16xf32, #tpu.memory_space<vmem>>, %arg10: memref<4x16x64xbf16, #tpu.memory_space<vmem>>, %arg11: memref<1x64xf32, #tpu.memory_space<vmem>>, %arg12: memref<1x64xf32, #tpu.memory_space<vmem>>, %arg13: memref<1x64xf32, #tpu.memory_space<vmem>>, %arg14: memref<64x256xbf16, #tpu.memory_space<vmem>>, %arg15: memref<1x256xf32, #tpu.memory_space<vmem>>, %arg16: memref<256x64xbf16, #tpu.memory_space<vmem>>, %arg17: memref<1x64xf32, #tpu.memory_space<vmem>>, %arg18: memref<1x17x64xf32, #tpu.memory_space<vmem>>) attributes {dimension_semantics = [#tpu.dimension_semantics<parallel>], iteration_bounds = array<i64: 2>, scalar_prefetch = 0 : i64, scratch_operands = 0 : i64, tpu.core_type = #tpu.core_type<tc>, window_params = [{transform_indices = @transform_0, window_bounds = array<i64: 1, 17, 64>}, {pipeline_mode = #tpu.pipeline_mode<synchronous>, transform_indices = @transform_1, window_bounds = array<i64: 1, 64>}, {pipeline_mode = #tpu.pipeline_mode<synchronous>, transform_indices = @transform_2, window_bounds = array<i64: 1, 64>}, {pipeline_mode = #tpu.pipeline_mode<synchronous>, transform_indices = @transform_3, window_bounds = array<i64: 4, 64, 16>}, {pipeline_mode = #tpu.pipeline_mode<synchronous>, transform_indices = @transform_4, window_bounds = array<i64: 4, 1, 16>}, {pipeline_mode = #tpu.pipeline_mode<synchronous>, transform_indices = @transform_5, window_bounds = array<i64: 4, 64, 16>}, {pipeline_mode = #tpu.pipeline_mode<synchronous>, transform_indices = @transform_6, window_bounds = array<i64: 4, 1, 16>}, {pipeline_mode = #tpu.pipeline_mode<synchronous>, transform_indices = @transform_7, window_bounds = array<i64: 4, 64, 16>}, {pipeline_mode = #tpu.pipeline_mode<synchronous>, transform_indices = @transform_8, window_bounds = array<i64: 4, 1, 16>}, {pipeline_mode = #tpu.pipeline_mode<synchronous>, transform_indices = @transform_9, window_bounds = array<i64: 4, 16, 64>}, {pipeline_mode = #tpu.pipeline_mode<synchronous>, transform_indices = @transform_10, window_bounds = array<i64: 1, 64>}, {pipeline_mode = #tpu.pipeline_mode<synchronous>, transform_indices = @transform_11, window_bounds = array<i64: 1, 64>}, {pipeline_mode = #tpu.pipeline_mode<synchronous>, transform_indices = @transform_12, window_bounds = array<i64: 1, 64>}, {pipeline_mode = #tpu.pipeline_mode<synchronous>, transform_indices = @transform_13, window_bounds = array<i64: 64, 256>}, {pipeline_mode = #tpu.pipeline_mode<synchronous>, transform_indices = @transform_14, window_bounds = array<i64: 1, 256>}, {pipeline_mode = #tpu.pipeline_mode<synchronous>, transform_indices = @transform_15, window_bounds = array<i64: 256, 64>}, {pipeline_mode = #tpu.pipeline_mode<synchronous>, transform_indices = @transform_16, window_bounds = array<i64: 1, 64>}, {transform_indices = @transform_17, window_bounds = array<i64: 1, 17, 64>}]} {
    %c0 = arith.constant 0 : index
    %c0_0 = arith.constant 0 : index
    %c0_1 = arith.constant 0 : index
    %0 = vector.load %arg1[%c0, %c0_0, %c0_1] : memref<1x17x64xf32, #tpu.memory_space<vmem>>, vector<1x17x64xf32>
    %1 = vector.shape_cast %0 : vector<1x17x64xf32> to vector<17x64xf32>
    %c0_2 = arith.constant 0 : index
    %c0_3 = arith.constant 0 : index
    %2 = vector.load %arg2[%c0_2, %c0_3] : memref<1x64xf32, #tpu.memory_space<vmem>>, vector<1x64xf32>
    %c0_4 = arith.constant 0 : index
    %c0_5 = arith.constant 0 : index
    %3 = vector.load %arg3[%c0_4, %c0_5] : memref<1x64xf32, #tpu.memory_space<vmem>>, vector<1x64xf32>
    %cst = arith.constant dense<0.000000e+00> : vector<17xf32>
    %4 = vector.multi_reduction <add>, %1, %cst [1] : vector<17x64xf32> to vector<17xf32>
    %5 = vector.shape_cast %4 : vector<17xf32> to vector<17x1xf32>
    %cst_6 = arith.constant 6.400000e+01 : f32
    %6 = vector.broadcast %cst_6 : f32 to vector<17x1xf32>
    %7 = arith.divf %5, %6 : vector<17x1xf32>
    %8 = vector.broadcast %7 : vector<17x1xf32> to vector<17x64xf32>
    %9 = arith.subf %1, %8 : vector<17x64xf32>
    %10 = arith.mulf %9, %9 : vector<17x64xf32>
    %cst_7 = arith.constant dense<0.000000e+00> : vector<17xf32>
    %11 = vector.multi_reduction <add>, %10, %cst_7 [1] : vector<17x64xf32> to vector<17xf32>
    %12 = vector.shape_cast %11 : vector<17xf32> to vector<17x1xf32>
    %cst_8 = arith.constant 6.400000e+01 : f32
    %13 = vector.broadcast %cst_8 : f32 to vector<17x1xf32>
    %14 = arith.divf %12, %13 : vector<17x1xf32>
    %cst_9 = arith.constant 9.99999974E-6 : f32
    %15 = vector.broadcast %cst_9 : f32 to vector<17x1xf32>
    %16 = arith.addf %14, %15 : vector<17x1xf32>
    %17 = math.rsqrt %16 : vector<17x1xf32>
    %18 = vector.broadcast %17 : vector<17x1xf32> to vector<17x64xf32>
    %19 = arith.mulf %9, %18 : vector<17x64xf32>
    %20 = vector.broadcast %2 : vector<1x64xf32> to vector<17x64xf32>
    %21 = arith.mulf %19, %20 : vector<17x64xf32>
    %22 = vector.broadcast %3 : vector<1x64xf32> to vector<17x64xf32>
    %23 = arith.addf %21, %22 : vector<17x64xf32>
    %24 = arith.truncf %23 : vector<17x64xf32> to vector<17x64xbf16>
    %cst_10 = arith.constant 0.000000e+00 : f32
    %25 = vector.broadcast %cst_10 : f32 to vector<17x64xf32>
    %c0_11 = arith.constant 0 : index
    %c0_12 = arith.constant 0 : index
    %c0_13 = arith.constant 0 : index
    %26 = vector.load %arg4[%c0_11, %c0_12, %c0_13] : memref<4x64x16xbf16, #tpu.memory_space<vmem>>, vector<1x64x16xbf16>
    %27 = vector.shape_cast %26 : vector<1x64x16xbf16> to vector<64x16xbf16>
    %cst_14 = arith.constant dense<0.000000e+00> : vector<17x16xf32>
    %28 = tpu.matmul %24, %27, %cst_14 {dimension_numbers = #tpu.dot_dimension_numbers<[1], [0], [0], [1], [0, 0, 1, 1], [], []>} : vector<17x64xbf16>, vector<64x16xbf16>, vector<17x16xf32> -> vector<17x16xf32>
    %c0_15 = arith.constant 0 : index
    %c0_16 = arith.constant 0 : index
    %c0_17 = arith.constant 0 : index
    %29 = vector.load %arg5[%c0_15, %c0_16, %c0_17] : memref<4x1x16xf32, #tpu.memory_space<vmem>>, vector<1x1x16xf32>
    %30 = vector.shape_cast %29 : vector<1x1x16xf32> to vector<1x16xf32>
    %31 = vector.broadcast %30 : vector<1x16xf32> to vector<17x16xf32>
    %32 = arith.addf %28, %31 : vector<17x16xf32>
    %33 = arith.truncf %32 : vector<17x16xf32> to vector<17x16xbf16>
    %c0_18 = arith.constant 0 : index
    %c0_19 = arith.constant 0 : index
    %c0_20 = arith.constant 0 : index
    %34 = vector.load %arg6[%c0_18, %c0_19, %c0_20] : memref<4x64x16xbf16, #tpu.memory_space<vmem>>, vector<1x64x16xbf16>
    %35 = vector.shape_cast %34 : vector<1x64x16xbf16> to vector<64x16xbf16>
    %cst_21 = arith.constant dense<0.000000e+00> : vector<17x16xf32>
    %36 = tpu.matmul %24, %35, %cst_21 {dimension_numbers = #tpu.dot_dimension_numbers<[1], [0], [0], [1], [0, 0, 1, 1], [], []>} : vector<17x64xbf16>, vector<64x16xbf16>, vector<17x16xf32> -> vector<17x16xf32>
    %c0_22 = arith.constant 0 : index
    %c0_23 = arith.constant 0 : index
    %c0_24 = arith.constant 0 : index
    %37 = vector.load %arg7[%c0_22, %c0_23, %c0_24] : memref<4x1x16xf32, #tpu.memory_space<vmem>>, vector<1x1x16xf32>
    %38 = vector.shape_cast %37 : vector<1x1x16xf32> to vector<1x16xf32>
    %39 = vector.broadcast %38 : vector<1x16xf32> to vector<17x16xf32>
    %40 = arith.addf %36, %39 : vector<17x16xf32>
    %41 = arith.truncf %40 : vector<17x16xf32> to vector<17x16xbf16>
    %c0_25 = arith.constant 0 : index
    %c0_26 = arith.constant 0 : index
    %c0_27 = arith.constant 0 : index
    %42 = vector.load %arg8[%c0_25, %c0_26, %c0_27] : memref<4x64x16xbf16, #tpu.memory_space<vmem>>, vector<1x64x16xbf16>
    %43 = vector.shape_cast %42 : vector<1x64x16xbf16> to vector<64x16xbf16>
    %cst_28 = arith.constant dense<0.000000e+00> : vector<17x16xf32>
    %44 = tpu.matmul %24, %43, %cst_28 {dimension_numbers = #tpu.dot_dimension_numbers<[1], [0], [0], [1], [0, 0, 1, 1], [], []>} : vector<17x64xbf16>, vector<64x16xbf16>, vector<17x16xf32> -> vector<17x16xf32>
    %c0_29 = arith.constant 0 : index
    %c0_30 = arith.constant 0 : index
    %c0_31 = arith.constant 0 : index
    %45 = vector.load %arg9[%c0_29, %c0_30, %c0_31] : memref<4x1x16xf32, #tpu.memory_space<vmem>>, vector<1x1x16xf32>
    %46 = vector.shape_cast %45 : vector<1x1x16xf32> to vector<1x16xf32>
    %47 = vector.broadcast %46 : vector<1x16xf32> to vector<17x16xf32>
    %48 = arith.addf %44, %47 : vector<17x16xf32>
    %49 = arith.truncf %48 : vector<17x16xf32> to vector<17x16xbf16>
    %cst_32 = arith.constant dense<0.000000e+00> : vector<17x17xf32>
    %50 = tpu.matmul %33, %41, %cst_32 {dimension_numbers = #tpu.dot_dimension_numbers<[1], [1], [0], [0], [0, 0, 1, 0], [], []>} : vector<17x16xbf16>, vector<17x16xbf16>, vector<17x17xf32> -> vector<17x17xf32>
    %cst_33 = arith.constant 2.500000e-01 : f32
    %51 = vector.broadcast %cst_33 : f32 to vector<17x17xf32>
    %52 = arith.mulf %50, %51 : vector<17x17xf32>
    %cst_34 = arith.constant dense<0xFF800000> : vector<17xf32>
    %53 = vector.multi_reduction <maximumf>, %52, %cst_34 [1] : vector<17x17xf32> to vector<17xf32>
    %54 = vector.shape_cast %53 : vector<17xf32> to vector<17x1xf32>
    %55 = vector.broadcast %54 : vector<17x1xf32> to vector<17x17xf32>
    %56 = arith.subf %52, %55 : vector<17x17xf32>
    %57 = math.exp %56 : vector<17x17xf32>
    %cst_35 = arith.constant dense<0.000000e+00> : vector<17xf32>
    %58 = vector.multi_reduction <add>, %57, %cst_35 [1] : vector<17x17xf32> to vector<17xf32>
    %59 = vector.shape_cast %58 : vector<17xf32> to vector<17x1xf32>
    %60 = vector.broadcast %59 : vector<17x1xf32> to vector<17x17xf32>
    %61 = arith.divf %57, %60 : vector<17x17xf32>
    %62 = arith.truncf %61 : vector<17x17xf32> to vector<17x17xbf16>
    %cst_36 = arith.constant dense<0.000000e+00> : vector<17x16xf32>
    %63 = tpu.matmul %62, %49, %cst_36 {dimension_numbers = #tpu.dot_dimension_numbers<[1], [0], [0], [1], [0, 0, 1, 1], [], []>} : vector<17x17xbf16>, vector<17x16xbf16>, vector<17x16xf32> -> vector<17x16xf32>
    %64 = arith.truncf %63 : vector<17x16xf32> to vector<17x16xbf16>
    %c0_37 = arith.constant 0 : index
    %c0_38 = arith.constant 0 : index
    %c0_39 = arith.constant 0 : index
    %65 = vector.load %arg10[%c0_37, %c0_38, %c0_39] : memref<4x16x64xbf16, #tpu.memory_space<vmem>>, vector<1x16x64xbf16>
    %66 = vector.shape_cast %65 : vector<1x16x64xbf16> to vector<16x64xbf16>
    %cst_40 = arith.constant dense<0.000000e+00> : vector<17x64xf32>
    %67 = tpu.matmul %64, %66, %cst_40 {dimension_numbers = #tpu.dot_dimension_numbers<[1], [0], [0], [1], [0, 0, 1, 1], [], []>} : vector<17x16xbf16>, vector<16x64xbf16>, vector<17x64xf32> -> vector<17x64xf32>
    %68 = arith.addf %25, %67 : vector<17x64xf32>
    %c1 = arith.constant 1 : index
    %c0_41 = arith.constant 0 : index
    %c0_42 = arith.constant 0 : index
    %69 = vector.load %arg4[%c1, %c0_41, %c0_42] : memref<4x64x16xbf16, #tpu.memory_space<vmem>>, vector<1x64x16xbf16>
    %70 = vector.shape_cast %69 : vector<1x64x16xbf16> to vector<64x16xbf16>
    %cst_43 = arith.constant dense<0.000000e+00> : vector<17x16xf32>
    %71 = tpu.matmul %24, %70, %cst_43 {dimension_numbers = #tpu.dot_dimension_numbers<[1], [0], [0], [1], [0, 0, 1, 1], [], []>} : vector<17x64xbf16>, vector<64x16xbf16>, vector<17x16xf32> -> vector<17x16xf32>
    %c1_44 = arith.constant 1 : index
    %c0_45 = arith.constant 0 : index
    %c0_46 = arith.constant 0 : index
    %72 = vector.load %arg5[%c1_44, %c0_45, %c0_46] : memref<4x1x16xf32, #tpu.memory_space<vmem>>, vector<1x1x16xf32>
    %73 = vector.shape_cast %72 : vector<1x1x16xf32> to vector<1x16xf32>
    %74 = vector.broadcast %73 : vector<1x16xf32> to vector<17x16xf32>
    %75 = arith.addf %71, %74 : vector<17x16xf32>
    %76 = arith.truncf %75 : vector<17x16xf32> to vector<17x16xbf16>
    %c1_47 = arith.constant 1 : index
    %c0_48 = arith.constant 0 : index
    %c0_49 = arith.constant 0 : index
    %77 = vector.load %arg6[%c1_47, %c0_48, %c0_49] : memref<4x64x16xbf16, #tpu.memory_space<vmem>>, vector<1x64x16xbf16>
    %78 = vector.shape_cast %77 : vector<1x64x16xbf16> to vector<64x16xbf16>
    %cst_50 = arith.constant dense<0.000000e+00> : vector<17x16xf32>
    %79 = tpu.matmul %24, %78, %cst_50 {dimension_numbers = #tpu.dot_dimension_numbers<[1], [0], [0], [1], [0, 0, 1, 1], [], []>} : vector<17x64xbf16>, vector<64x16xbf16>, vector<17x16xf32> -> vector<17x16xf32>
    %c1_51 = arith.constant 1 : index
    %c0_52 = arith.constant 0 : index
    %c0_53 = arith.constant 0 : index
    %80 = vector.load %arg7[%c1_51, %c0_52, %c0_53] : memref<4x1x16xf32, #tpu.memory_space<vmem>>, vector<1x1x16xf32>
    %81 = vector.shape_cast %80 : vector<1x1x16xf32> to vector<1x16xf32>
    %82 = vector.broadcast %81 : vector<1x16xf32> to vector<17x16xf32>
    %83 = arith.addf %79, %82 : vector<17x16xf32>
    %84 = arith.truncf %83 : vector<17x16xf32> to vector<17x16xbf16>
    %c1_54 = arith.constant 1 : index
    %c0_55 = arith.constant 0 : index
    %c0_56 = arith.constant 0 : index
    %85 = vector.load %arg8[%c1_54, %c0_55, %c0_56] : memref<4x64x16xbf16, #tpu.memory_space<vmem>>, vector<1x64x16xbf16>
    %86 = vector.shape_cast %85 : vector<1x64x16xbf16> to vector<64x16xbf16>
    %cst_57 = arith.constant dense<0.000000e+00> : vector<17x16xf32>
    %87 = tpu.matmul %24, %86, %cst_57 {dimension_numbers = #tpu.dot_dimension_numbers<[1], [0], [0], [1], [0, 0, 1, 1], [], []>} : vector<17x64xbf16>, vector<64x16xbf16>, vector<17x16xf32> -> vector<17x16xf32>
    %c1_58 = arith.constant 1 : index
    %c0_59 = arith.constant 0 : index
    %c0_60 = arith.constant 0 : index
    %88 = vector.load %arg9[%c1_58, %c0_59, %c0_60] : memref<4x1x16xf32, #tpu.memory_space<vmem>>, vector<1x1x16xf32>
    %89 = vector.shape_cast %88 : vector<1x1x16xf32> to vector<1x16xf32>
    %90 = vector.broadcast %89 : vector<1x16xf32> to vector<17x16xf32>
    %91 = arith.addf %87, %90 : vector<17x16xf32>
    %92 = arith.truncf %91 : vector<17x16xf32> to vector<17x16xbf16>
    %cst_61 = arith.constant dense<0.000000e+00> : vector<17x17xf32>
    %93 = tpu.matmul %76, %84, %cst_61 {dimension_numbers = #tpu.dot_dimension_numbers<[1], [1], [0], [0], [0, 0, 1, 0], [], []>} : vector<17x16xbf16>, vector<17x16xbf16>, vector<17x17xf32> -> vector<17x17xf32>
    %cst_62 = arith.constant 2.500000e-01 : f32
    %94 = vector.broadcast %cst_62 : f32 to vector<17x17xf32>
    %95 = arith.mulf %93, %94 : vector<17x17xf32>
    %cst_63 = arith.constant dense<0xFF800000> : vector<17xf32>
    %96 = vector.multi_reduction <maximumf>, %95, %cst_63 [1] : vector<17x17xf32> to vector<17xf32>
    %97 = vector.shape_cast %96 : vector<17xf32> to vector<17x1xf32>
    %98 = vector.broadcast %97 : vector<17x1xf32> to vector<17x17xf32>
    %99 = arith.subf %95, %98 : vector<17x17xf32>
    %100 = math.exp %99 : vector<17x17xf32>
    %cst_64 = arith.constant dense<0.000000e+00> : vector<17xf32>
    %101 = vector.multi_reduction <add>, %100, %cst_64 [1] : vector<17x17xf32> to vector<17xf32>
    %102 = vector.shape_cast %101 : vector<17xf32> to vector<17x1xf32>
    %103 = vector.broadcast %102 : vector<17x1xf32> to vector<17x17xf32>
    %104 = arith.divf %100, %103 : vector<17x17xf32>
    %105 = arith.truncf %104 : vector<17x17xf32> to vector<17x17xbf16>
    %cst_65 = arith.constant dense<0.000000e+00> : vector<17x16xf32>
    %106 = tpu.matmul %105, %92, %cst_65 {dimension_numbers = #tpu.dot_dimension_numbers<[1], [0], [0], [1], [0, 0, 1, 1], [], []>} : vector<17x17xbf16>, vector<17x16xbf16>, vector<17x16xf32> -> vector<17x16xf32>
    %107 = arith.truncf %106 : vector<17x16xf32> to vector<17x16xbf16>
    %c1_66 = arith.constant 1 : index
    %c0_67 = arith.constant 0 : index
    %c0_68 = arith.constant 0 : index
    %108 = vector.load %arg10[%c1_66, %c0_67, %c0_68] : memref<4x16x64xbf16, #tpu.memory_space<vmem>>, vector<1x16x64xbf16>
    %109 = vector.shape_cast %108 : vector<1x16x64xbf16> to vector<16x64xbf16>
    %cst_69 = arith.constant dense<0.000000e+00> : vector<17x64xf32>
    %110 = tpu.matmul %107, %109, %cst_69 {dimension_numbers = #tpu.dot_dimension_numbers<[1], [0], [0], [1], [0, 0, 1, 1], [], []>} : vector<17x16xbf16>, vector<16x64xbf16>, vector<17x64xf32> -> vector<17x64xf32>
    %111 = arith.addf %68, %110 : vector<17x64xf32>
    %c2 = arith.constant 2 : index
    %c0_70 = arith.constant 0 : index
    %c0_71 = arith.constant 0 : index
    %112 = vector.load %arg4[%c2, %c0_70, %c0_71] : memref<4x64x16xbf16, #tpu.memory_space<vmem>>, vector<1x64x16xbf16>
    %113 = vector.shape_cast %112 : vector<1x64x16xbf16> to vector<64x16xbf16>
    %cst_72 = arith.constant dense<0.000000e+00> : vector<17x16xf32>
    %114 = tpu.matmul %24, %113, %cst_72 {dimension_numbers = #tpu.dot_dimension_numbers<[1], [0], [0], [1], [0, 0, 1, 1], [], []>} : vector<17x64xbf16>, vector<64x16xbf16>, vector<17x16xf32> -> vector<17x16xf32>
    %c2_73 = arith.constant 2 : index
    %c0_74 = arith.constant 0 : index
    %c0_75 = arith.constant 0 : index
    %115 = vector.load %arg5[%c2_73, %c0_74, %c0_75] : memref<4x1x16xf32, #tpu.memory_space<vmem>>, vector<1x1x16xf32>
    %116 = vector.shape_cast %115 : vector<1x1x16xf32> to vector<1x16xf32>
    %117 = vector.broadcast %116 : vector<1x16xf32> to vector<17x16xf32>
    %118 = arith.addf %114, %117 : vector<17x16xf32>
    %119 = arith.truncf %118 : vector<17x16xf32> to vector<17x16xbf16>
    %c2_76 = arith.constant 2 : index
    %c0_77 = arith.constant 0 : index
    %c0_78 = arith.constant 0 : index
    %120 = vector.load %arg6[%c2_76, %c0_77, %c0_78] : memref<4x64x16xbf16, #tpu.memory_space<vmem>>, vector<1x64x16xbf16>
    %121 = vector.shape_cast %120 : vector<1x64x16xbf16> to vector<64x16xbf16>
    %cst_79 = arith.constant dense<0.000000e+00> : vector<17x16xf32>
    %122 = tpu.matmul %24, %121, %cst_79 {dimension_numbers = #tpu.dot_dimension_numbers<[1], [0], [0], [1], [0, 0, 1, 1], [], []>} : vector<17x64xbf16>, vector<64x16xbf16>, vector<17x16xf32> -> vector<17x16xf32>
    %c2_80 = arith.constant 2 : index
    %c0_81 = arith.constant 0 : index
    %c0_82 = arith.constant 0 : index
    %123 = vector.load %arg7[%c2_80, %c0_81, %c0_82] : memref<4x1x16xf32, #tpu.memory_space<vmem>>, vector<1x1x16xf32>
    %124 = vector.shape_cast %123 : vector<1x1x16xf32> to vector<1x16xf32>
    %125 = vector.broadcast %124 : vector<1x16xf32> to vector<17x16xf32>
    %126 = arith.addf %122, %125 : vector<17x16xf32>
    %127 = arith.truncf %126 : vector<17x16xf32> to vector<17x16xbf16>
    %c2_83 = arith.constant 2 : index
    %c0_84 = arith.constant 0 : index
    %c0_85 = arith.constant 0 : index
    %128 = vector.load %arg8[%c2_83, %c0_84, %c0_85] : memref<4x64x16xbf16, #tpu.memory_space<vmem>>, vector<1x64x16xbf16>
    %129 = vector.shape_cast %128 : vector<1x64x16xbf16> to vector<64x16xbf16>
    %cst_86 = arith.constant dense<0.000000e+00> : vector<17x16xf32>
    %130 = tpu.matmul %24, %129, %cst_86 {dimension_numbers = #tpu.dot_dimension_numbers<[1], [0], [0], [1], [0, 0, 1, 1], [], []>} : vector<17x64xbf16>, vector<64x16xbf16>, vector<17x16xf32> -> vector<17x16xf32>
    %c2_87 = arith.constant 2 : index
    %c0_88 = arith.constant 0 : index
    %c0_89 = arith.constant 0 : index
    %131 = vector.load %arg9[%c2_87, %c0_88, %c0_89] : memref<4x1x16xf32, #tpu.memory_space<vmem>>, vector<1x1x16xf32>
    %132 = vector.shape_cast %131 : vector<1x1x16xf32> to vector<1x16xf32>
    %133 = vector.broadcast %132 : vector<1x16xf32> to vector<17x16xf32>
    %134 = arith.addf %130, %133 : vector<17x16xf32>
    %135 = arith.truncf %134 : vector<17x16xf32> to vector<17x16xbf16>
    %cst_90 = arith.constant dense<0.000000e+00> : vector<17x17xf32>
    %136 = tpu.matmul %119, %127, %cst_90 {dimension_numbers = #tpu.dot_dimension_numbers<[1], [1], [0], [0], [0, 0, 1, 0], [], []>} : vector<17x16xbf16>, vector<17x16xbf16>, vector<17x17xf32> -> vector<17x17xf32>
    %cst_91 = arith.constant 2.500000e-01 : f32
    %137 = vector.broadcast %cst_91 : f32 to vector<17x17xf32>
    %138 = arith.mulf %136, %137 : vector<17x17xf32>
    %cst_92 = arith.constant dense<0xFF800000> : vector<17xf32>
    %139 = vector.multi_reduction <maximumf>, %138, %cst_92 [1] : vector<17x17xf32> to vector<17xf32>
    %140 = vector.shape_cast %139 : vector<17xf32> to vector<17x1xf32>
    %141 = vector.broadcast %140 : vector<17x1xf32> to vector<17x17xf32>
    %142 = arith.subf %138, %141 : vector<17x17xf32>
    %143 = math.exp %142 : vector<17x17xf32>
    %cst_93 = arith.constant dense<0.000000e+00> : vector<17xf32>
    %144 = vector.multi_reduction <add>, %143, %cst_93 [1] : vector<17x17xf32> to vector<17xf32>
    %145 = vector.shape_cast %144 : vector<17xf32> to vector<17x1xf32>
    %146 = vector.broadcast %145 : vector<17x1xf32> to vector<17x17xf32>
    %147 = arith.divf %143, %146 : vector<17x17xf32>
    %148 = arith.truncf %147 : vector<17x17xf32> to vector<17x17xbf16>
    %cst_94 = arith.constant dense<0.000000e+00> : vector<17x16xf32>
    %149 = tpu.matmul %148, %135, %cst_94 {dimension_numbers = #tpu.dot_dimension_numbers<[1], [0], [0], [1], [0, 0, 1, 1], [], []>} : vector<17x17xbf16>, vector<17x16xbf16>, vector<17x16xf32> -> vector<17x16xf32>
    %150 = arith.truncf %149 : vector<17x16xf32> to vector<17x16xbf16>
    %c2_95 = arith.constant 2 : index
    %c0_96 = arith.constant 0 : index
    %c0_97 = arith.constant 0 : index
    %151 = vector.load %arg10[%c2_95, %c0_96, %c0_97] : memref<4x16x64xbf16, #tpu.memory_space<vmem>>, vector<1x16x64xbf16>
    %152 = vector.shape_cast %151 : vector<1x16x64xbf16> to vector<16x64xbf16>
    %cst_98 = arith.constant dense<0.000000e+00> : vector<17x64xf32>
    %153 = tpu.matmul %150, %152, %cst_98 {dimension_numbers = #tpu.dot_dimension_numbers<[1], [0], [0], [1], [0, 0, 1, 1], [], []>} : vector<17x16xbf16>, vector<16x64xbf16>, vector<17x64xf32> -> vector<17x64xf32>
    %154 = arith.addf %111, %153 : vector<17x64xf32>
    %c3 = arith.constant 3 : index
    %c0_99 = arith.constant 0 : index
    %c0_100 = arith.constant 0 : index
    %155 = vector.load %arg4[%c3, %c0_99, %c0_100] : memref<4x64x16xbf16, #tpu.memory_space<vmem>>, vector<1x64x16xbf16>
    %156 = vector.shape_cast %155 : vector<1x64x16xbf16> to vector<64x16xbf16>
    %cst_101 = arith.constant dense<0.000000e+00> : vector<17x16xf32>
    %157 = tpu.matmul %24, %156, %cst_101 {dimension_numbers = #tpu.dot_dimension_numbers<[1], [0], [0], [1], [0, 0, 1, 1], [], []>} : vector<17x64xbf16>, vector<64x16xbf16>, vector<17x16xf32> -> vector<17x16xf32>
    %c3_102 = arith.constant 3 : index
    %c0_103 = arith.constant 0 : index
    %c0_104 = arith.constant 0 : index
    %158 = vector.load %arg5[%c3_102, %c0_103, %c0_104] : memref<4x1x16xf32, #tpu.memory_space<vmem>>, vector<1x1x16xf32>
    %159 = vector.shape_cast %158 : vector<1x1x16xf32> to vector<1x16xf32>
    %160 = vector.broadcast %159 : vector<1x16xf32> to vector<17x16xf32>
    %161 = arith.addf %157, %160 : vector<17x16xf32>
    %162 = arith.truncf %161 : vector<17x16xf32> to vector<17x16xbf16>
    %c3_105 = arith.constant 3 : index
    %c0_106 = arith.constant 0 : index
    %c0_107 = arith.constant 0 : index
    %163 = vector.load %arg6[%c3_105, %c0_106, %c0_107] : memref<4x64x16xbf16, #tpu.memory_space<vmem>>, vector<1x64x16xbf16>
    %164 = vector.shape_cast %163 : vector<1x64x16xbf16> to vector<64x16xbf16>
    %cst_108 = arith.constant dense<0.000000e+00> : vector<17x16xf32>
    %165 = tpu.matmul %24, %164, %cst_108 {dimension_numbers = #tpu.dot_dimension_numbers<[1], [0], [0], [1], [0, 0, 1, 1], [], []>} : vector<17x64xbf16>, vector<64x16xbf16>, vector<17x16xf32> -> vector<17x16xf32>
    %c3_109 = arith.constant 3 : index
    %c0_110 = arith.constant 0 : index
    %c0_111 = arith.constant 0 : index
    %166 = vector.load %arg7[%c3_109, %c0_110, %c0_111] : memref<4x1x16xf32, #tpu.memory_space<vmem>>, vector<1x1x16xf32>
    %167 = vector.shape_cast %166 : vector<1x1x16xf32> to vector<1x16xf32>
    %168 = vector.broadcast %167 : vector<1x16xf32> to vector<17x16xf32>
    %169 = arith.addf %165, %168 : vector<17x16xf32>
    %170 = arith.truncf %169 : vector<17x16xf32> to vector<17x16xbf16>
    %c3_112 = arith.constant 3 : index
    %c0_113 = arith.constant 0 : index
    %c0_114 = arith.constant 0 : index
    %171 = vector.load %arg8[%c3_112, %c0_113, %c0_114] : memref<4x64x16xbf16, #tpu.memory_space<vmem>>, vector<1x64x16xbf16>
    %172 = vector.shape_cast %171 : vector<1x64x16xbf16> to vector<64x16xbf16>
    %cst_115 = arith.constant dense<0.000000e+00> : vector<17x16xf32>
    %173 = tpu.matmul %24, %172, %cst_115 {dimension_numbers = #tpu.dot_dimension_numbers<[1], [0], [0], [1], [0, 0, 1, 1], [], []>} : vector<17x64xbf16>, vector<64x16xbf16>, vector<17x16xf32> -> vector<17x16xf32>
    %c3_116 = arith.constant 3 : index
    %c0_117 = arith.constant 0 : index
    %c0_118 = arith.constant 0 : index
    %174 = vector.load %arg9[%c3_116, %c0_117, %c0_118] : memref<4x1x16xf32, #tpu.memory_space<vmem>>, vector<1x1x16xf32>
    %175 = vector.shape_cast %174 : vector<1x1x16xf32> to vector<1x16xf32>
    %176 = vector.broadcast %175 : vector<1x16xf32> to vector<17x16xf32>
    %177 = arith.addf %173, %176 : vector<17x16xf32>
    %178 = arith.truncf %177 : vector<17x16xf32> to vector<17x16xbf16>
    %cst_119 = arith.constant dense<0.000000e+00> : vector<17x17xf32>
    %179 = tpu.matmul %162, %170, %cst_119 {dimension_numbers = #tpu.dot_dimension_numbers<[1], [1], [0], [0], [0, 0, 1, 0], [], []>} : vector<17x16xbf16>, vector<17x16xbf16>, vector<17x17xf32> -> vector<17x17xf32>
    %cst_120 = arith.constant 2.500000e-01 : f32
    %180 = vector.broadcast %cst_120 : f32 to vector<17x17xf32>
    %181 = arith.mulf %179, %180 : vector<17x17xf32>
    %cst_121 = arith.constant dense<0xFF800000> : vector<17xf32>
    %182 = vector.multi_reduction <maximumf>, %181, %cst_121 [1] : vector<17x17xf32> to vector<17xf32>
    %183 = vector.shape_cast %182 : vector<17xf32> to vector<17x1xf32>
    %184 = vector.broadcast %183 : vector<17x1xf32> to vector<17x17xf32>
    %185 = arith.subf %181, %184 : vector<17x17xf32>
    %186 = math.exp %185 : vector<17x17xf32>
    %cst_122 = arith.constant dense<0.000000e+00> : vector<17xf32>
    %187 = vector.multi_reduction <add>, %186, %cst_122 [1] : vector<17x17xf32> to vector<17xf32>
    %188 = vector.shape_cast %187 : vector<17xf32> to vector<17x1xf32>
    %189 = vector.broadcast %188 : vector<17x1xf32> to vector<17x17xf32>
    %190 = arith.divf %186, %189 : vector<17x17xf32>
    %191 = arith.truncf %190 : vector<17x17xf32> to vector<17x17xbf16>
    %cst_123 = arith.constant dense<0.000000e+00> : vector<17x16xf32>
    %192 = tpu.matmul %191, %178, %cst_123 {dimension_numbers = #tpu.dot_dimension_numbers<[1], [0], [0], [1], [0, 0, 1, 1], [], []>} : vector<17x17xbf16>, vector<17x16xbf16>, vector<17x16xf32> -> vector<17x16xf32>
    %193 = arith.truncf %192 : vector<17x16xf32> to vector<17x16xbf16>
    %c3_124 = arith.constant 3 : index
    %c0_125 = arith.constant 0 : index
    %c0_126 = arith.constant 0 : index
    %194 = vector.load %arg10[%c3_124, %c0_125, %c0_126] : memref<4x16x64xbf16, #tpu.memory_space<vmem>>, vector<1x16x64xbf16>
    %195 = vector.shape_cast %194 : vector<1x16x64xbf16> to vector<16x64xbf16>
    %cst_127 = arith.constant dense<0.000000e+00> : vector<17x64xf32>
    %196 = tpu.matmul %193, %195, %cst_127 {dimension_numbers = #tpu.dot_dimension_numbers<[1], [0], [0], [1], [0, 0, 1, 1], [], []>} : vector<17x16xbf16>, vector<16x64xbf16>, vector<17x64xf32> -> vector<17x64xf32>
    %197 = arith.addf %154, %196 : vector<17x64xf32>
    %198 = arith.addf %1, %197 : vector<17x64xf32>
    %c0_128 = arith.constant 0 : index
    %c0_129 = arith.constant 0 : index
    %199 = vector.load %arg11[%c0_128, %c0_129] : memref<1x64xf32, #tpu.memory_space<vmem>>, vector<1x64xf32>
    %200 = vector.broadcast %199 : vector<1x64xf32> to vector<17x64xf32>
    %201 = arith.addf %198, %200 : vector<17x64xf32>
    %c0_130 = arith.constant 0 : index
    %c0_131 = arith.constant 0 : index
    %202 = vector.load %arg12[%c0_130, %c0_131] : memref<1x64xf32, #tpu.memory_space<vmem>>, vector<1x64xf32>
    %c0_132 = arith.constant 0 : index
    %c0_133 = arith.constant 0 : index
    %203 = vector.load %arg13[%c0_132, %c0_133] : memref<1x64xf32, #tpu.memory_space<vmem>>, vector<1x64xf32>
    %cst_134 = arith.constant dense<0.000000e+00> : vector<17xf32>
    %204 = vector.multi_reduction <add>, %201, %cst_134 [1] : vector<17x64xf32> to vector<17xf32>
    %205 = vector.shape_cast %204 : vector<17xf32> to vector<17x1xf32>
    %cst_135 = arith.constant 6.400000e+01 : f32
    %206 = vector.broadcast %cst_135 : f32 to vector<17x1xf32>
    %207 = arith.divf %205, %206 : vector<17x1xf32>
    %208 = vector.broadcast %207 : vector<17x1xf32> to vector<17x64xf32>
    %209 = arith.subf %201, %208 : vector<17x64xf32>
    %210 = arith.mulf %209, %209 : vector<17x64xf32>
    %cst_136 = arith.constant dense<0.000000e+00> : vector<17xf32>
    %211 = vector.multi_reduction <add>, %210, %cst_136 [1] : vector<17x64xf32> to vector<17xf32>
    %212 = vector.shape_cast %211 : vector<17xf32> to vector<17x1xf32>
    %cst_137 = arith.constant 6.400000e+01 : f32
    %213 = vector.broadcast %cst_137 : f32 to vector<17x1xf32>
    %214 = arith.divf %212, %213 : vector<17x1xf32>
    %cst_138 = arith.constant 9.99999974E-6 : f32
    %215 = vector.broadcast %cst_138 : f32 to vector<17x1xf32>
    %216 = arith.addf %214, %215 : vector<17x1xf32>
    %217 = math.rsqrt %216 : vector<17x1xf32>
    %218 = vector.broadcast %217 : vector<17x1xf32> to vector<17x64xf32>
    %219 = arith.mulf %209, %218 : vector<17x64xf32>
    %220 = vector.broadcast %202 : vector<1x64xf32> to vector<17x64xf32>
    %221 = arith.mulf %219, %220 : vector<17x64xf32>
    %222 = vector.broadcast %203 : vector<1x64xf32> to vector<17x64xf32>
    %223 = arith.addf %221, %222 : vector<17x64xf32>
    %224 = arith.truncf %223 : vector<17x64xf32> to vector<17x64xbf16>
    %c0_139 = arith.constant 0 : index
    %c0_140 = arith.constant 0 : index
    %225 = vector.load %arg14[%c0_139, %c0_140] : memref<64x256xbf16, #tpu.memory_space<vmem>>, vector<64x256xbf16>
    %cst_141 = arith.constant dense<0.000000e+00> : vector<17x256xf32>
    %226 = tpu.matmul %224, %225, %cst_141 {dimension_numbers = #tpu.dot_dimension_numbers<[1], [0], [0], [1], [0, 0, 1, 1], [], []>} : vector<17x64xbf16>, vector<64x256xbf16>, vector<17x256xf32> -> vector<17x256xf32>
    %c0_142 = arith.constant 0 : index
    %c0_143 = arith.constant 0 : index
    %227 = vector.load %arg15[%c0_142, %c0_143] : memref<1x256xf32, #tpu.memory_space<vmem>>, vector<1x256xf32>
    %228 = vector.broadcast %227 : vector<1x256xf32> to vector<17x256xf32>
    %229 = arith.addf %226, %228 : vector<17x256xf32>
    %cst_144 = arith.constant -1.702000e+00 : f32
    %230 = vector.broadcast %cst_144 : f32 to vector<17x256xf32>
    %231 = arith.mulf %230, %229 : vector<17x256xf32>
    %232 = math.exp %231 : vector<17x256xf32>
    %cst_145 = arith.constant 1.000000e+00 : f32
    %233 = vector.broadcast %cst_145 : f32 to vector<17x256xf32>
    %234 = arith.addf %233, %232 : vector<17x256xf32>
    %cst_146 = arith.constant 1.000000e+00 : f32
    %235 = vector.broadcast %cst_146 : f32 to vector<17x256xf32>
    %236 = arith.divf %235, %234 : vector<17x256xf32>
    %237 = arith.mulf %229, %236 : vector<17x256xf32>
    %238 = arith.truncf %237 : vector<17x256xf32> to vector<17x256xbf16>
    %c0_147 = arith.constant 0 : index
    %c0_148 = arith.constant 0 : index
    %239 = vector.load %arg16[%c0_147, %c0_148] : memref<256x64xbf16, #tpu.memory_space<vmem>>, vector<256x64xbf16>
    %cst_149 = arith.constant dense<0.000000e+00> : vector<17x64xf32>
    %240 = tpu.matmul %238, %239, %cst_149 {dimension_numbers = #tpu.dot_dimension_numbers<[1], [0], [0], [1], [0, 0, 1, 1], [], []>} : vector<17x256xbf16>, vector<256x64xbf16>, vector<17x64xf32> -> vector<17x64xf32>
    %c0_150 = arith.constant 0 : index
    %c0_151 = arith.constant 0 : index
    %241 = vector.load %arg17[%c0_150, %c0_151] : memref<1x64xf32, #tpu.memory_space<vmem>>, vector<1x64xf32>
    %242 = vector.broadcast %241 : vector<1x64xf32> to vector<17x64xf32>
    %243 = arith.addf %240, %242 : vector<17x64xf32>
    %244 = arith.addf %201, %243 : vector<17x64xf32>
    %c0_152 = arith.constant 0 : index
    %c0_153 = arith.constant 0 : index
    %c0_154 = arith.constant 0 : index
    %245 = vector.load %arg18[%c0_152, %c0_153, %c0_154] : memref<1x17x64xf32, #tpu.memory_space<vmem>>, vector<1x17x64xf32>
    %246 = vector.shape_cast %245 : vector<1x17x64xf32> to vector<17x64xf32>
    %247 = vector.shape_cast %244 : vector<17x64xf32> to vector<1x17x64xf32>
    tpu.vector_store %arg18[%c0_152, %c0_153, %c0_154], %247 {strides = array<i32>} : memref<1x17x64xf32, #tpu.memory_space<vmem>>, vector<1x17x64xf32>,
    return
  }
  func.func @transform_0(%arg0: i32) -> (i32, i32, i32) {
    %c0_i32 = arith.constant 0 : i32
    %c0_i32_0 = arith.constant 0 : i32
    %c0_i32_1 = arith.constant 0 : i32
    return %arg0, %c0_i32, %c0_i32_0 : i32, i32, i32
  }
  func.func @transform_1(%arg0: i32) -> (i32, i32) {
    %c0_i32 = arith.constant 0 : i32
    %c0_i32_0 = arith.constant 0 : i32
    %c0_i32_1 = arith.constant 0 : i32
    return %c0_i32, %c0_i32_0 : i32, i32
  }
  func.func @transform_2(%arg0: i32) -> (i32, i32) {
    %c0_i32 = arith.constant 0 : i32
    %c0_i32_0 = arith.constant 0 : i32
    %c0_i32_1 = arith.constant 0 : i32
    return %c0_i32, %c0_i32_0 : i32, i32
  }
  func.func @transform_3(%arg0: i32) -> (i32, i32, i32) {
    %c0_i32 = arith.constant 0 : i32
    %c0_i32_0 = arith.constant 0 : i32
    %c0_i32_1 = arith.constant 0 : i32
    %c0_i32_2 = arith.constant 0 : i32
    return %c0_i32, %c0_i32_0, %c0_i32_1 : i32, i32, i32
  }
  func.func @transform_4(%arg0: i32) -> (i32, i32, i32) {
    %c0_i32 = arith.constant 0 : i32
    %c0_i32_0 = arith.constant 0 : i32
    %c0_i32_1 = arith.constant 0 : i32
    %c0_i32_2 = arith.constant 0 : i32
    return %c0_i32, %c0_i32_0, %c0_i32_1 : i32, i32, i32
  }
  func.func @transform_5(%arg0: i32) -> (i32, i32, i32) {
    %c0_i32 = arith.constant 0 : i32
    %c0_i32_0 = arith.constant 0 : i32
    %c0_i32_1 = arith.constant 0 : i32
    %c0_i32_2 = arith.constant 0 : i32
    return %c0_i32, %c0_i32_0, %c0_i32_1 : i32, i32, i32
  }
  func.func @transform_6(%arg0: i32) -> (i32, i32, i32) {
    %c0_i32 = arith.constant 0 : i32
    %c0_i32_0 = arith.constant 0 : i32
    %c0_i32_1 = arith.constant 0 : i32
    %c0_i32_2 = arith.constant 0 : i32
    return %c0_i32, %c0_i32_0, %c0_i32_1 : i32, i32, i32
  }
  func.func @transform_7(%arg0: i32) -> (i32, i32, i32) {
    %c0_i32 = arith.constant 0 : i32
    %c0_i32_0 = arith.constant 0 : i32
    %c0_i32_1 = arith.constant 0 : i32
    %c0_i32_2 = arith.constant 0 : i32
    return %c0_i32, %c0_i32_0, %c0_i32_1 : i32, i32, i32
  }
  func.func @transform_8(%arg0: i32) -> (i32, i32, i32) {
    %c0_i32 = arith.constant 0 : i32
    %c0_i32_0 = arith.constant 0 : i32
    %c0_i32_1 = arith.constant 0 : i32
    %c0_i32_2 = arith.constant 0 : i32
    return %c0_i32, %c0_i32_0, %c0_i32_1 : i32, i32, i32
  }
  func.func @transform_9(%arg0: i32) -> (i32, i32, i32) {
    %c0_i32 = arith.constant 0 : i32
    %c0_i32_0 = arith.constant 0 : i32
    %c0_i32_1 = arith.constant 0 : i32
    %c0_i32_2 = arith.constant 0 : i32
    return %c0_i32, %c0_i32_0, %c0_i32_1 : i32, i32, i32
  }
  func.func @transform_10(%arg0: i32) -> (i32, i32) {
    %c0_i32 = arith.constant 0 : i32
    %c0_i32_0 = arith.constant 0 : i32
    %c0_i32_1 = arith.constant 0 : i32
    return %c0_i32, %c0_i32_0 : i32, i32
  }
  func.func @transform_11(%arg0: i32) -> (i32, i32) {
    %c0_i32 = arith.constant 0 : i32
    %c0_i32_0 = arith.constant 0 : i32
    %c0_i32_1 = arith.constant 0 : i32
    return %c0_i32, %c0_i32_0 : i32, i32
  }
  func.func @transform_12(%arg0: i32) -> (i32, i32) {
    %c0_i32 = arith.constant 0 : i32
    %c0_i32_0 = arith.constant 0 : i32
    %c0_i32_1 = arith.constant 0 : i32
    return %c0_i32, %c0_i32_0 : i32, i32
  }
  func.func @transform_13(%arg0: i32) -> (i32, i32) {
    %c0_i32 = arith.constant 0 : i32
    %c0_i32_0 = arith.constant 0 : i32
    %c0_i32_1 = arith.constant 0 : i32
    return %c0_i32, %c0_i32_0 : i32, i32
  }
  func.func @transform_14(%arg0: i32) -> (i32, i32) {
    %c0_i32 = arith.constant 0 : i32
    %c0_i32_0 = arith.constant 0 : i32
    %c0_i32_1 = arith.constant 0 : i32
    return %c0_i32, %c0_i32_0 : i32, i32
  }
  func.func @transform_15(%arg0: i32) -> (i32, i32) {
    %c0_i32 = arith.constant 0 : i32
    %c0_i32_0 = arith.constant 0 : i32
    %c0_i32_1 = arith.constant 0 : i32
    return %c0_i32, %c0_i32_0 : i32, i32
  }
  func.func @transform_16(%arg0: i32) -> (i32, i32) {
    %c0_i32 = arith.constant 0 : i32
    %c0_i32_0 = arith.constant 0 : i32
    %c0_i32_1 = arith.constant 0 : i32
    return %c0_i32, %c0_i32_0 : i32, i32
  }
  func.func @transform_17(%arg0: i32) -> (i32, i32, i32) {
    %c0_i32 = arith.constant 0 : i32
    %c0_i32_0 = arith.constant 0 : i32
    %c0_i32_1 = arith.constant 0 : i32
    return %arg0, %c0_i32, %c0_i32_0 : i32, i32, i32
  }
}

</mosaic_0001>

<bundles_post_ra>
// kernel: clip_vision_transformer.6
= control target key start
LH: loop header
LB: loop body
LE: loop exit
PB: predicated region body
PF: predicated region fallthrough
CT: control target
= control target key end

     0   :  { %s379_s12 = smov 0   ;;  %s418_s0 = inlined_call_operand.vmem [shape: f32[2,17,64], index: 0, kind: input, shape index: {}]   ;;  %s419_s1 = inlined_call_operand.vmem [shape: f32[1,64], index: 1, kind: input, shape index: {}]   ;;  %s420_s2 = inlined_call_operand.vmem [shape: f32[1,64], index: 2, kind: input, shape index: {}]   ;;  %s421_s3 = inlined_call_operand.vmem [shape: f32[2,17,64], index: 3, kind: output, shape index: {}]  }
   0x1 LB: > { %s321_s13 = sadd.s32 4294967295, %s356_s12   ;;  %p325_p0 = scmp.ge.s32.totalorder %s356_s12, 1  ;;  %s356_s12 = sphi %s379_s12, %s13_s12  }
   0x2   : > { %p137_p1 = scmp.lt.s32.totalorder %s356_s12, 3 }
   0x4   : > { %p138_p2 = pnand %p325_p0, %p137_p1 }
   0x5   : > { %p161_p3 = scmp.lt.s32.totalorder (!%p138_p2), %s321_s13, 1 }
   0x6   : > { %141 = sbr.rel (%p138_p2) target bundleno = 301 (0x12d), region = 32 }
   0xb   : > { %s423_s13 = smov (!%p161_p3, %s321_s13), 1  ;;  %vm174_vm0 = vcmask 523264   ;;  %vm181_vm1 = vcmask 516096   ;;  %v358_v6 = vmov 64.0   ;;  %v340_v45 = vld [vmem:[%s419_s1] ss:$0 sm:$0xff] }
   0xc   : > { %s330_s14 = smul.u32 24, %s423_s13  ;;  %342 = vrcp.f32 %v358_v6  ;;  %v341_v48 = vld [vmem:[%s420_s2] ss:$0 sm:$0xff] }
   0xe   : > { %s165_s17 = scalar_lea.vmem %s418_s0, %s330_s14  ;;  %s170_s24 = scalar_lea.vmem %s421_s3, %s330_s14 }
   0xf   : > { %v171_v0 = vld [vmem:[%s165_s17] sm:$0xff]  ;;  %v173_v1 = vld [vmem:[%s165_s17 + $0x10] sm:$0x1]  ;;  %v172_v4 = vld [vmem:[%s165_s17 + $0x8] sm:$0xff] }
  0x10   : > { %v175_v2 = vsel %vm174_vm0, %v171_v0, 0.0  ;;  %v182_v3 = vsel %vm181_vm1, %v173_v1, 0.0  ;;  %v178_v5 = vsel %vm174_vm0, %v172_v4, 0.0 }
  0x11   : > { %176 = vadd.xlane.f32.xlu0 %v175_v2  ;;  %183 = vadd.xlane.f32.xlu1 %v182_v3 }
  0x12   : > { %v343_v7 = vpop.eup %342 }
  0x13   : > { %v186_v8 = vmul.f32 64.0, %v343_v7  ;;  %vm190_vm2 = vweird.f32 %v343_v7 }
  0x15   : > { %v187_v9 = vsub.f32 1.0, %v186_v8 }
  0x17   : > { %v188_v10 = vmul.f32 %v343_v7, %v187_v9 }
  0x19   : > { %179 = vadd.xlane.f32.xlu0 %v178_v5  ;;  %v189_v11 = vadd.f32 %v343_v7, %v188_v10 }
  0x1b   : > { %v191_v12 = vsel %vm190_vm2, %v343_v7, %v189_v11 }
  0x84   : > { %v177_v13 = vpop.xlane.xlu0 %176  ;;  %v184_v17 = vpop.xlane.xlu1 %183 }
  0x85   : > { %v192_v14 = vmul.f32 %v191_v12, %v177_v13  ;;  %v194_v21 = vmul.f32 %v191_v12, %v184_v17 }
  0x87   : > { %v195_v15 = vsub.f32 %v171_v0, %v192_v14  ;;  %v197_v23 = vsub.f32 %v173_v1, %v194_v21 }
  0x89   : > { %v198_v16 = vmul.f32 %v195_v15, %v195_v15  ;;  %v200_v26 = vmul.f32 %v197_v23, %v197_v23 }
  0x8b   : > { %v201_v18 = vsel %vm174_vm0, %v198_v16, 0.0  ;;  %v207_v27 = vsel %vm181_vm1, %v200_v26, 0.0 }
  0x8c   : > { %202 = vadd.xlane.f32.xlu1 %v201_v18  ;;  %v180_v19 = vpop.xlane.xlu0 %179 }
  0x8d   : > { %v193_v20 = vmul.f32 %v191_v12, %v180_v19 }
  0x8f   : > { %v196_v22 = vsub.f32 %v172_v4, %v193_v20 }
  0x91   : > { %v199_v24 = vmul.f32 %v196_v22, %v196_v22 }
  0x93   : > { %v204_v25 = vsel %vm174_vm0, %v199_v24, 0.0 }
  0x94   : > { %205 = vadd.xlane.f32.xlu2 %v204_v25 }
  0x9c   : > { %208 = vadd.xlane.f32.xlu2 %v207_v27 }
  0xff   : > { %v203_v28 = vpop.xlane.xlu1 %202 }
 0x100   : > { %v210_v29 = vmul.f32 %v203_v28, %v191_v12 }
 0x102   : > { %v213_v30 = vadd.f32 1e-05, %v210_v29 }
 0x104   : > { %344 = vrsqrt.f32 %v213_v30  ;;  %vm222_vm4 = vweird.f32 %v213_v30 }
 0x107   : > { %v206_v31 = vpop.xlane.xlu2 %205 }
 0x108   : > { %v211_v32 = vmul.f32 %v206_v31, %v191_v12 }
 0x10a   : > { %v345_v33 = vpop.eup %344  ;;  %v214_v34 = vadd.f32 1e-05, %v211_v32 }
 0x10b   : > { %v217_v35 = vmul.f32 %v345_v33, %v213_v30  ;;  %vm223_vm3 = vweird.f32 %v345_v33 }
 0x10c   : > { %346 = vrsqrt.f32 %v214_v34  ;;  %vm224_vm5 = vmor %vm222_vm4, %vm223_vm3  ;;  %vm232_vm7 = vweird.f32 %v214_v34 }
 0x10d   : > { %v218_v36 = vmul.f32 %v345_v33, %v217_v35 }
 0x10f   : > { %v219_v37 = vmul.f32 0.5, %v218_v36  ;;  %v209_v38 = vpop.xlane.xlu2 %208 }
 0x110   : > { %v212_v39 = vmul.f32 %v209_v38, %v191_v12 }
 0x111   : > { %v220_v40 = vsub.f32 1.5, %v219_v37 }
 0x112   : > { %v347_v41 = vpop.eup %346  ;;  %v215_v42 = vadd.f32 1e-05, %v212_v39 }
 0x113   : > { %v221_v43 = vmul.f32 %v345_v33, %v220_v40  ;;  %v227_v44 = vmul.f32 %v347_v41, %v214_v34  ;;  %vm233_vm6 = vweird.f32 %v347_v41 }
 0x114   : > { %348 = vrsqrt.f32 %v215_v42  ;;  %vm234_vm8 = vmor %vm232_vm7, %vm233_vm6  ;;  %vm242_vm10 = vweird.f32 %v215_v42 }
 0x115   : > { %v225_v46 = vsel %vm224_vm5, %v345_v33, %v221_v43  ;;  %v228_v47 = vmul.f32 %v347_v41, %v227_v44 }
 0x116   : > { %v246_v49 = vmul.f32 %v225_v46, %v195_v15 }
 0x117   : > { %v229_v50 = vmul.f32 0.5, %v228_v47 }
 0x118   : > { %v253_v51 = vmul.f32 %v340_v45, %v246_v49 }
 0x119   : > { %v230_v52 = vsub.f32 1.5, %v229_v50 }
 0x11a   : > { %v349_v53 = vpop.eup %348  ;;  %v260_v54 = vadd.f32 %v341_v48, %v253_v51 }
 0x11b   : > { %v231_v55 = vmul.f32 %v347_v41, %v230_v52  ;;  %v237_v56 = vmul.f32 %v349_v53, %v215_v42  ;;  %vm243_vm9 = vweird.f32 %v349_v53 }
 0x11c   : > { %263 = vst.msk [vmem:[%s170_s24] sm:$0xff] %vm174_vm0, %v260_v54  ;;  %vm244_vm11 = vmor %vm242_vm10, %vm243_vm9 }
 0x11d   : > { %v235_v57 = vsel %vm234_vm8, %v347_v41, %v231_v55  ;;  %v238_v58 = vmul.f32 %v349_v53, %v237_v56 }
 0x11e   : > { %v247_v59 = vmul.f32 %v235_v57, %v196_v22 }
 0x11f   : > { %v239_v60 = vmul.f32 0.5, %v238_v58 }
 0x120   : > { %v254_v61 = vmul.f32 %v340_v45, %v247_v59 }
 0x121   : > { %v240_v62 = vsub.f32 1.5, %v239_v60 }
 0x122   : > { %v261_v63 = vadd.f32 %v341_v48, %v254_v61 }
 0x123   : > { %v241_v0 = vmul.f32 %v349_v53, %v240_v62 }
 0x124   : > { %264 = vst.msk [vmem:[%s170_s24 + $0x8] sm:$0xff] %vm174_vm0, %v261_v63 }
 0x125   : > { %v245_v1 = vsel %vm244_vm11, %v349_v53, %v241_v0 }
 0x126   : > { %v248_v2 = vmul.f32 %v245_v1, %v197_v23 }
 0x128   : > { %v255_v3 = vmul.f32 %v340_v45, %v248_v2 }
 0x12a   : > { %v262_v4 = vadd.f32 %v341_v48, %v255_v3 }
 0x12c   : > { %265 = vst.msk [vmem:[%s170_s24 + $0x10] sm:$0x1] %vm181_vm1, %v262_v4 }
 0x12d PF: > { %s13_s12 = sadd.s32 1, %s356_s12  }
 0x12e   : > { %p10_p4 = scmp.ge.s32.totalorder %s13_s12, 4  }
 0x130   :  { %12 = sbr.rel (!%p10_p4) target bundleno = 1 (0x1), region = 62 }

// kernel: clip_vision_transformer.5
= control target key start
LH: loop header
LB: loop body
LE: loop exit
PB: predicated region body
PF: predicated region fallthrough
CT: control target
= control target key end

     0   :  { %s681_s12 = smov 0   ;;  %s683_s13 = smov 0   ;;  %s792_s0 = inlined_call_operand.vmem [shape: bf16[2,16,256], index: 0, kind: input, shape index: {}]   ;;  %s793_s1 = inlined_call_operand.vmem [shape: bf16[256,64], index: 1, kind: input, shape index: {}]   ;;  %s794_s2 = inlined_call_operand.vmem [shape: f32[16,64], index: 2, kind: input, shape index: {}]   ;;  %s795_s3 = inlined_call_operand.vmem [shape: f32[2,16,64], index: 3, kind: output, shape index: {}]  }
   0x1   :  { %s685_s14 = smov 0   ;;  %s687_s15 = smov 0  }
   0x2   :  { %s689_s16 = smov 0  }
   0x3 LB: > { %s22_s17 = sadd.s32 1, %s651_s14  ;;  %s25_s18 = sadd.s32 1, %s655_s15  ;;  %s659_s16 = sphi %s689_s16, %s13_s16   ;;  %s655_s15 = sphi %s687_s15, %s799_s15   ;;  %s651_s14 = sphi %s685_s14, %s798_s14   ;;  %s647_s13 = sphi %s683_s13, %s797_s13   ;;  %s643_s12 = sphi %s681_s12, %s796_s12  }
   0x4   : > { %p23_p0 = scmp.ge.s32.totalorder %s22_s17, 2  ;;  %p492_p1 = scmp.ge.s32.totalorder %s659_s16, 1 }
   0x5   : > { %p166_p2 = scmp.lt.s32.totalorder %s659_s16, 5 }
   0x6   : > { %s801_s17 = smov (%p23_p0, %s22_s17), 0  ;;  %s803_s18 = smov (!%p23_p0, %s25_s18), %s655_s15 }
   0x7   : > { %p167_p3 = pnand %p492_p1, %p166_p2  ;;  %p27_p4 = scmp.ge.s32.totalorder %s803_s18, 2 }
   0x8   : > { %p201_p5 = scmp.lt.s32.totalorder (!%p167_p3), %s647_s13, 1  ;;  %p203_p6 = scmp.lt.s32.totalorder (!%p167_p3), %s643_s12, 1 }
   0x9   : > { %s805_s18 = smov (%p27_p4, %s803_s18), 0  ;;  %170 = sbr.rel (%p167_p3) target bundleno = 181 (0xb5), region = 32 }
   0xe   : > { %v572_v0 = vld [vmem:[%s793_s1 + $0x38] sm:$0xff]  ;;  %v571_v2 = vld [vmem:[%s793_s1 + $0x30] sm:$0xff]  ;;  %s807_s13 = smov (!%p201_p5, %s647_s13), 1  ;;  %v570_v4 = vld [vmem:[%s793_s1 + $0x28] sm:$0xff]  ;;  %s809_s12 = smov (!%p203_p6, %s643_s12), 1  ;;  %vm385_vm0 = vcmask 523264  }
   0xf   : > { %v580_v1 = vld [vmem:[%s793_s1 + $0x78] sm:$0xff]  ;;  %359 = vmatpush.bf16.msra.mxu0 %v572_v0  ;;  %v579_v3 = vld [vmem:[%s793_s1 + $0x70] sm:$0xff]  ;;  %v578_v5 = vld [vmem:[%s793_s1 + $0x68] sm:$0xff]  ;;  %s493_s8 = sshll.u32 %s809_s12, 1  ;;  %s494_s9 = sshll.u32 %s807_s13, 2 }
  0x10   : > { %372 = vmatpush.bf16.msra.mxu1 %v580_v1  ;;  %v569_v6 = vld [vmem:[%s793_s1 + $0x20] sm:$0xff]  ;;  %s207_s10 = sadd.s32 %s494_s9, %s493_s8  ;;  %v568_v8 = vld [vmem:[%s793_s1 + $0x18] sm:$0xff]  ;;  %v567_v10 = vld [vmem:[%s793_s1 + $0x10] sm:$0xff]  ;;  %s497_s11 = sshll.u32 %s807_s13, 1 }
  0x11   : > { %v577_v7 = vld [vmem:[%s793_s1 + $0x60] sm:$0xff]  ;;  %v576_v9 = vld [vmem:[%s793_s1 + $0x58] sm:$0xff]  ;;  %s495_s22 = sshll.u32 %s207_s10, 2  ;;  %v575_v11 = vld [vmem:[%s793_s1 + $0x50] sm:$0xff]  ;;  %s219_s19 = sadd.s32 %s497_s11, %s809_s12 }
  0x12   : > { %s209_s29 = scalar_lea.vmem %s792_s0, %s495_s22  ;;  %v566_v12 = vld [vmem:[%s793_s1 + $0x8] sm:$0xff]  ;;  %v565_v17 = vld [vmem:[%s793_s1] sm:$0xff]  ;;  %s496_s20 = sshll.u32 %s809_s12, 3 }
  0x13   : > { %360 = vmatpush.bf16.msra.mxu0 %v571_v2  ;;  %v574_v13 = vld [vmem:[%s793_s1 + $0x48] sm:$0xff]  ;;  %v222_v14 = vld [vmem:[%s209_s29] sm:$0xff]  ;;  %s213_s23 = scalar_lea.vmem %s794_s2, %s496_s20  ;;  %s498_s24 = sshll.u32 %s219_s19, 3 }
  0x14   : > { %373 = vmatpush.bf16.msra.mxu1 %v579_v3  ;;  %v257_v15 = vunpack.c.l.b16 %v222_v14  ;;  %v258_v16 = vunpack.c.h.b16 %v222_v14  ;;  %v573_v18 = vld [vmem:[%s793_s1 + $0x40] sm:$0xff]  ;;  %s221_s27 = scalar_lea.vmem %s795_s3, %s498_s24 }
  0x15   : > { %v255_v21 = vld [vmem:[%s213_s23] sm:$0xff] }
  0x16   : > { %v259_v19 = vpack.c.b16 %v257_v15, %v257_v15  ;;  %v260_v20 = vpack.c.b16 %v258_v16, %v258_v16 }
  0x17   : > { %361 = vmatpush.bf16.msra.mxu0 %v570_v4 }
  0x18   : > { %374 = vmatpush.bf16.msra.mxu1 %v578_v5 }
  0x1b   : > { %362 = vmatpush.bf16.msra.mxu0 %v569_v6 }
  0x1c   : > { %375 = vmatpush.bf16.msra.mxu1 %v577_v7 }
  0x1f   : > { %363 = vmatpush.bf16.msra.mxu0 %v568_v8 }
  0x20   : > { %376 = vmatpush.bf16.msra.mxu1 %v576_v9 }
  0x23   : > { %364 = vmatpush.bf16.msra.mxu0 %v567_v10 }
  0x24   : > { %377 = vmatpush.bf16.msra.mxu1 %v575_v11 }
  0x27   : > { %365 = vmatpush.bf16.msra.mxu0 %v566_v12 }
  0x28   : > { %378 = vmatpush.bf16.msra.mxu1 %v574_v13 }
  0x2b   : > { %366 = vmatpush.bf16.msra.mxu0 %v565_v17 }
  0x2c   : > { %379 = vmatpush.bf16.msra.mxu1 %v573_v18 }
  0x2e   : > { %367 = vmatmul.bf16.vlgmr.msra.gmra.mxu0 %v259_v19 }
  0x2f   : > { %380 = vmatmul.bf16.vlgmr.msra.gmra.mxu1 %v260_v20 }
  0xab   : > { %v368_v22 = vpop.f32.mrf.mxu0 }
  0xac   : > { %v381_v23 = vpop.f32.mrf.mxu1  ;;  %v369_v24 = vadd.f32 %v368_v22, %v255_v21 }
  0xae   : > { %v382_v25 = vadd.f32 %v381_v23, %v369_v24 }
  0xb0   : > { %386 = vst.msk [vmem:[%s221_s27] sm:$0xff] %vm385_vm0, %v382_v25 }
  0xb3   : > { %v370_v26 = vpop.f32.mrf.mxu0 }
  0xb4   : > { %v383_v27 = vpop.f32.mrf.mxu1 }
  0xb5 PF: > { %s13_s16 = sadd.s32 1, %s659_s16   ;;  %s796_s12 = smov %s651_s14 }
  0xb6   : > { %p10_p7 = scmp.ge.s32.totalorder %s13_s16, 6   ;;  %s797_s13 = smov %s655_s15 }
  0xb7   : > { %s798_s14 = smov %s801_s17  ;;  %s799_s15 = smov %s805_s18 }
  0xb8   :  { %12 = sbr.rel (!%p10_p7) target bundleno = 3 (0x3), region = 65 }

// kernel: clip_vision_transformer.9
= control target key start
LH: loop header
LB: loop body
LE: loop exit
PB: predicated region body
PF: predicated region fallthrough
CT: control target
= control target key end

     0   :  { %8 = vsyncpa [#allocation3], 0  ;;  %s492_s0 = inlined_call_operand.vmem [shape: f32[2,1,64], index: 0, kind: input, shape index: {}]   ;;  %s493_s1 = inlined_call_operand.vmem [shape: f32[1,64], index: 1, kind: input, shape index: {}]   ;;  %s494_s2 = inlined_call_operand.vmem [shape: f32[1,64], index: 2, kind: input, shape index: {}]   ;;  %s495_s3 = inlined_call_operand.hbm [shape: f32[2,1,64], index: 3, kind: output, shape index: {}]  }
   0x1   :  { %10 = vsyncpa [#allocation3 + $0x1], 0  ;;  %s398_s12 = smov 0   ;;  %s400_s13 = smov 0  }
   0x2   :  { %s402_s14 = smov 0   ;;  %s404_s15 = smov 0  }
   0x3 LB: > { %s419_s16 = sadd.s32 4294967295, %s375_s15   ;;  %s263_s17 = sadd.s32 4294967294, %s375_s15   ;;  %s375_s15 = sphi %s404_s15, %s501_s15   ;;  %s371_s14 = sphi %s402_s14, %s500_s14   ;;  %s367_s13 = sphi %s400_s13, %s499_s13   ;;  %s363_s12 = sphi %s398_s12, %s498_s12  }
   0x4   : > { %s423_s18 = sadd.s32 1, %s375_s15   ;;  %s91_s19 = sadd.s32 1, %s371_s14 }
   0x5   : > { %s88_s20 = ssub.s32 %s375_s15, %s423_s18  ;;  %p101_p0 = scmp.ne.s32.totalorder %s371_s14, %s367_s13 }
   0x6   : > { %p89_p1 = scmp.eq.s32.totalorder %s88_s20, 0  ;;  %p102_p2 = scmp.eq.s32.totalorder %s419_s16, 1 }
   0x7   : > { %p107_p3 = scmp.ne.s32.totalorder %s367_s13, %s363_s12  ;;  %p108_p4 = scmp.eq.s32.totalorder %s263_s17, 1 }
   0x8   : > { %s434_s21 = scalar_select %p89_p1, %s371_s14, %s91_s19  }
   0x9   : > { %p436_p5 = por %p102_p2, %p101_p0  ;;  %p440_p6 = por %p108_p4, %p107_p3 }
   0xa   : > { %p266_p7 = scmp.ge.s32.totalorder %s375_s15, 1  ;;  %p138_p8 = scmp.lt.s32.totalorder %s375_s15, 3 }
   0xc   : > { %p139_p9 = pnand %p266_p7, %p138_p8 }
   0xd   : > { %p159_p10 = scmp.lt.s32.totalorder (!%p139_p9), %s419_s16, 1  ;;  %s157_s28 = sand.u32 (!%p139_p9), 1, %s367_s13  }
   0xe   : > { %142 = sbr.rel (%p139_p9) target bundleno = 294 (0x126), region = 32  ;;  %s207_s4 = scalar_lea.hbm (!%p139_p9), %s495_s3, %s419_s16 }
   0xf   : > { %s158_s9 = scalar_lea.vmem (!%p139_p9), [#allocation2], %s157_s28  ;;  %s211_s11 = sshll.u32 (!%p139_p9), %s207_s4, 4  ;;  %s212_s11 = int_to_ptr.hbm [resolvable:$true] %s211_s11 }
  0x10   : > { %s209_s10 = sshll.u32 (!%p139_p9), %s158_s9, 4  ;;  %s327_s17 = sshra.s32 (!%p139_p9), %s212_s11, 4  ;;  %s210_s10 = int_to_ptr.vmem [resolvable:$true] %s209_s10  ;;  %s328_s17 = int_to_ptr.hbm [resolvable:$true] %s327_s17 }
  0x11   : > { %s329_s19 = scalar_lea.hbm (!%p139_p9), %s328_s17, 1  ;;  %s333_s25 = scalar_lea.hbm (!%p139_p9), %s495_s3, 2 }
  0x12   : > { %p330_p11 = scmp.ne.s32.totalorder (!%p139_p9), %s328_s17, %s329_s19  ;;  %p334_p0 = scmp.lt.s32.totalorder (!%p139_p9), %s328_s17, %s495_s3 }
  0x13   : > { %s160_s24 = scalar_select %p159_p10, %s419_s16, 1  ;;  %vm163_vm0 = vcmask 516096   ;;  %v377_v2 = vmov 64.0   ;;  %v193_v24 = vld [vmem:[%s493_s1] sm:$0x1] }
  0x14   : > { %309 = vrcp.f32 %v377_v2  ;;  %v195_v26 = vld [vmem:[%s494_s2] sm:$0x1]  ;;  %s199_s16 = scalar_lea.sflag [#allocation3], %s157_s28  ;;  %p331_p12 = pnand %p330_p11, %p436_p5 }
  0x15   : > { %s161_s27 = scalar_lea.vmem %s492_s0, %s160_s24  ;;  %p335_p1 = scmp.lt.s32.totalorder %s333_s25, %s329_s19 }
  0x16   : > { %v162_v0 = vld [vmem:[%s161_s27] sm:$0x1]  ;;  %p332_p13 = pneg %p331_p12 }
  0x17   : > { %v164_v1 = vsel %vm163_vm0, %v162_v0, 0.0  ;;  %p336_p2 = por %p335_p1, %p334_p0 }
  0x18   : > { %165 = vadd.xlane.f32.xlu0 %v164_v1 }
  0x19   : > { %p337_p3 = pnand %p336_p2, %p332_p13 }
  0x1a   : > { %v310_v3 = vpop.eup %309 }
  0x1b   : > { %v168_v4 = vmul.f32 64.0, %v310_v3  ;;  %vm172_vm1 = vweird.f32 %v310_v3 }
  0x1d   : > { %v169_v5 = vsub.f32 1.0, %v168_v4 }
  0x1f   : > { %v170_v6 = vmul.f32 %v310_v3, %v169_v5 }
  0x21   : > { %v171_v7 = vadd.f32 %v310_v3, %v170_v6 }
  0x23   : > { %v173_v8 = vsel %vm172_vm1, %v310_v3, %v171_v7 }
  0x8b   : > { %v166_v9 = vpop.xlane.xlu0 %165 }
  0x8c   : > { %v174_v10 = vmul.f32 %v173_v8, %v166_v9 }
  0x8e   : > { %v175_v11 = vsub.f32 %v162_v0, %v174_v10 }
  0x90   : > { %v176_v12 = vmul.f32 %v175_v11, %v175_v11 }
  0x92   : > { %v177_v13 = vsel %vm163_vm0, %v176_v12, 0.0 }
  0x93   : > { %178 = vadd.xlane.f32.xlu0 %v177_v13 }
 0x106   : > { %v179_v14 = vpop.xlane.xlu0 %178 }
 0x107   : > { %v180_v15 = vmul.f32 %v179_v14, %v173_v8 }
 0x109   : > { %v181_v16 = vadd.f32 1e-05, %v180_v15 }
 0x10b   : > { %311 = vrsqrt.f32 %v181_v16  ;;  %vm188_vm3 = vweird.f32 %v181_v16 }
 0x111   : > { %v312_v17 = vpop.eup %311 }
 0x112   : > { %v183_v18 = vmul.f32 %v312_v17, %v181_v16  ;;  %vm189_vm2 = vweird.f32 %v312_v17 }
 0x113   : > { %vm190_vm4 = vmor %vm188_vm3, %vm189_vm2 }
 0x114   : > { %v184_v19 = vmul.f32 %v312_v17, %v183_v18 }
 0x116   : > { %v185_v20 = vmul.f32 0.5, %v184_v19 }
 0x118   : > { %v186_v21 = vsub.f32 1.5, %v185_v20 }
 0x11a   : > { %v187_v22 = vmul.f32 %v312_v17, %v186_v21 }
 0x11c   : > { %v191_v23 = vsel %vm190_vm4, %v312_v17, %v187_v22 }
 0x11d   : > { %v192_v25 = vmul.f32 %v191_v23, %v175_v11 }
 0x11f   : > { %v194_v27 = vmul.f32 %v193_v24, %v192_v25 }
 0x121   : > { %v196_v28 = vadd.f32 %v195_v26, %v194_v27 }
 0x123   : > { %197 = vst.msk [vmem:[%s158_s9] sm:$0x1] %vm163_vm0, %v196_v28 }
 0x124   : > { %340 = shalt.err (!%p337_p3)
}
 0x125   : > { %269 = dma.vmem_to_hbm [thread:$0]  (%p436_p5), %s210_s10, 16, %s212_s11, %s199_s16  }
 0x126 PF: > { %p275_p4 = scmp.ge.s32.totalorder %s375_s15, 2  ;;  %s223_s28 = sand.u32 1, %s363_s12  }
 0x127   : > { %s224_s29 = scalar_lea.sflag [#allocation3], %s223_s28 }
 0x128   : > { %p272_p7 = pnand %p275_p4, %p440_p6 }
 0x12a   : > { %p273_p8 = pneg %p272_p7 }
 0x12c   : > { %358 = dma.done.wait (%p273_p8), %s224_s29, 16  }
 0x12d   : > { %360 = vsyncadd (%p273_p8), %s224_s29, 4294967280  ;;  %p13_p9 = scmp.ge.s32.totalorder %s423_s18, 4   ;;  %s498_s12 = smov %s367_s13 }
 0x12e   : > { %s499_s13 = smov %s371_s14  ;;  %s500_s14 = smov %s434_s21 }
 0x12f   : > { %s501_s15 = smov %s423_s18  ;;  %15 = sbr.rel (!%p13_p9) target bundleno = 3 (0x3), region = 67 }
 0x134   :  { %229 = vsyncpa [#allocation3], 1 }
 0x135   :  { %231 = vsyncpa [#allocation3 + $0x1], 1 }

// kernel: clip_vision_transformer.7
= control target key start
LH: loop header
LB: loop body
LE: loop exit
PB: predicated region body
PF: predicated region fallthrough
CT: control target
= control target key end

     0   :  { %s3314_s24 = smov 0   ;;  %s4005_s0 = inlined_call_operand.vmem [shape: f32[2,17,64], index: 0, kind: input, shape index: {}]   ;;  %s4006_s1 = inlined_call_operand.vmem [shape: f32[1,64], index: 1, kind: input, shape index: {}]   ;;  %s4007_s2 = inlined_call_operand.vmem [shape: f32[1,64], index: 2, kind: input, shape index: {}]   ;;  %s4008_s3 = inlined_call_operand.vmem [shape: bf16[4,64,16], index: 3, kind: input, shape index: {}]   ;;  %s4009_s4 = inlined_call_operand.vmem [shape: f32[4,1,16], index: 4, kind: input, shape index: {}]   ;;  %s4010_s5 = inlined_call_operand.vmem [shape: bf16[4,64,16], index: 5, kind: input, shape index: {}]   ;;  %s4011_s6 = inlined_call_operand.vmem [shape: f32[4,1,16], index: 6, kind: input, shape index: {}]   ;;  %s4012_s7 = inlined_call_operand.vmem [shape: bf16[4,64,16], index: 7, kind: input, shape index: {}]   ;;  %s4013_s8 = inlined_call_operand.vmem [shape: f32[4,1,16], index: 8, kind: input, shape index: {}]   ;;  %s4014_s9 = inlined_call_operand.vmem [shape: bf16[4,16,64], index: 9, kind: input, shape index: {}]   ;;  %s4015_s10 = inlined_call_operand.vmem [shape: f32[1,64], index: 10, kind: input, shape index: {}]   ;;  %s4016_s11 = inlined_call_operand.vmem [shape: f32[1,64], index: 11, kind: input, shape index: {}]   ;;  %s4017_s12 = inlined_call_operand.vmem [shape: f32[1,64], index: 12, kind: input, shape index: {}]   ;;  %s4018_s13 = inlined_call_operand.vmem [shape: bf16[64,256], index: 13, kind: input, shape index: {}]   ;;  %s4019_s14 = inlined_call_operand.vmem [shape: f32[1,256], index: 14, kind: input, shape index: {}]   ;;  %s4020_s15 = inlined_call_operand.vmem [shape: bf16[256,64], index: 15, kind: input, shape index: {}]   ;;  %s4021_s16 = inlined_call_operand.vmem [shape: f32[1,64], index: 16, kind: input, shape index: {}]   ;;  %s4022_s17 = inlined_call_operand.vmem [shape: f32[2,17,64], index: 17, kind: output, shape index: {}]  }
   0x1   :  { %4023 = sst [smem:[#allocation2_spill]] %s4005_s0 }
   0x2   :  { %4024 = sst [smem:[#allocation3_spill]] %s4006_s1 }
   0x3 LB: > { %s2568_s25 = sadd.s32 4294967295, %s3220_s24   ;;  %p2572_p0 = scmp.ge.s32.totalorder %s3220_s24, 1  ;;  %s3220_s24 = sphi %s3314_s24, %s27_s24  }
   0x4   : > { %p487_p1 = scmp.lt.s32.totalorder %s3220_s24, 3 }
   0x6   : > { %p488_p2 = pnand %p2572_p0, %p487_p1 }
   0x7   : > { %p539_p3 = scmp.lt.s32.totalorder (!%p488_p2), %s2568_s25, 1  ;;  %s4025_s29 = sld [smem:[#allocation2_spill]] (!%p488_p2) }
   0x8   : > { %491 = sbr.rel (%p488_p2) target bundleno = 3359 (0xd1f), region = 88  ;;  %s4026_s18 = sld [smem:[#allocation3_spill]] (!%p488_p2) }
   0xd   : > { %s4034_s25 = smov (!%p539_p3, %s2568_s25), 1  ;;  %vm555_vm0 = vcmask 523264   ;;  %vm562_vm1 = vcmask 516096   ;;  %v3222_v6 = vmov 64.0   ;;  %v3023_v28 = vld [vmem:[%s4008_s3 + $0x18] sm:$0xff]  ;;  %v3022_v31 = vld [vmem:[%s4008_s3 + $0x10] sm:$0xff] }
   0xe   : > { %s3096_s26 = smul.u32 24, %s4034_s25  ;;  %3125 = vrcp.f32 %v3222_v6  ;;  %v3027_v29 = vld [vmem:[%s4010_s5 + $0x18] sm:$0xff]  ;;  %690 = vmatpush.bf16.msra.mxu0 %v3023_v28  ;;  %v3026_v32 = vld [vmem:[%s4010_s5 + $0x10] sm:$0xff]  ;;  %v3021_v34 = vld [vmem:[%s4008_s3 + $0x8] sm:$0xff]  ;;  %vm818_vm12 = vcmask 130048   ;;  %vm934_vm13 = vcmask 1040384  }
   0xf   : > { %v3031_v30 = vld [vmem:[%s4012_s7 + $0x18] sm:$0xff]  ;;  %746 = vmatpush.bf16.msra.mxu1 %v3027_v29  ;;  %v3030_v33 = vld [vmem:[%s4012_s7 + $0x10] sm:$0xff]  ;;  %v3025_v35 = vld [vmem:[%s4010_s5 + $0x8] sm:$0xff]  ;;  %vm852_vm14 = vcmask 138240   ;;  %vm859_vm15 = vcmask 131072  }
  0x10   : > { %s3330_s0 = scalar_lea.vmem %s4025_s29, %s3096_s26  ;;  %802 = vmatpush.bf16.msra.mxu2 %v3031_v30  ;;  %v3029_v36 = vld [vmem:[%s4012_s7 + $0x8] sm:$0xff]  ;;  %v3020_v39 = vld [vmem:[%s4008_s3] sm:$0xff]  ;;  %v3036_v58 = vld [vmem:[%s4008_s3 + $0x38] sm:$0xff]  ;;  %s548_s20 = scalar_lea.vmem %s4022_s17, %s3096_s26 }
  0x11   : > { %v550_v0 = vld [vmem:[%s3330_s0] sm:$0xff]  ;;  %v552_v1 = vld [vmem:[%s3330_s0 + $0x10] sm:$0x1]  ;;  %v551_v4 = vld [vmem:[%s3330_s0 + $0x8] sm:$0xff] }
  0x12   : > { %v556_v2 = vsel %vm555_vm0, %v550_v0, 0.0  ;;  %v563_v3 = vsel %vm562_vm1, %v552_v1, 0.0  ;;  %v559_v5 = vsel %vm555_vm0, %v551_v4, 0.0  ;;  %691 = vmatpush.bf16.msra.mxu0 %v3022_v31  ;;  %v3024_v40 = vld [vmem:[%s4010_s5] sm:$0xff]  ;;  %v3040_v59 = vld [vmem:[%s4010_s5 + $0x38] sm:$0xff]  ;;  %v3035_v62 = vld [vmem:[%s4008_s3 + $0x30] sm:$0xff] }
  0x13   : > { %557 = vadd.xlane.f32.xlu0 %v556_v2  ;;  %564 = vadd.xlane.f32.xlu1 %v563_v3  ;;  %v3028_v41 = vld [vmem:[%s4012_s7] sm:$0xff]  ;;  %v3039_v63 = vld [vmem:[%s4010_s5 + $0x30] sm:$0xff]  ;;  %v3034_v6 = vld [vmem:[%s4008_s3 + $0x28] sm:$0xff] }
  0x14   : > { %v3126_v7 = vpop.eup %3125  ;;  %747 = vmatpush.bf16.msra.mxu1 %v3026_v32  ;;  %803 = vmatpush.bf16.msra.mxu2 %v3030_v33  ;;  %v3107_v2 = vld [vmem:[%s4026_s18] ss:$0 sm:$0xff] }
  0x15   : > { %v567_v8 = vmul.f32 64.0, %v3126_v7  ;;  %vm571_vm2 = vweird.f32 %v3126_v7  ;;  %v3110_v33 = vld [vmem:[%s4011_s6] ss:$0 sm:$0xff] }
  0x16   : > { %692 = vmatpush.bf16.msra.mxu0 %v3021_v34 }
  0x17   : > { %v568_v9 = vsub.f32 1.0, %v567_v8 }
  0x18   : > { %748 = vmatpush.bf16.msra.mxu1 %v3025_v35  ;;  %804 = vmatpush.bf16.msra.mxu2 %v3029_v36 }
  0x19   : > { %v569_v10 = vmul.f32 %v3126_v7, %v568_v9 }
  0x1a   : > { %693 = vmatpush.bf16.msra.mxu0 %v3020_v39 }
  0x1b   : > { %560 = vadd.xlane.f32.xlu0 %v559_v5  ;;  %v570_v11 = vadd.f32 %v3126_v7, %v569_v10  ;;  %v3108_v10 = vld [vmem:[%s4007_s2] ss:$0 sm:$0xff] }
  0x1c   : > { %749 = vmatpush.bf16.msra.mxu1 %v3024_v40  ;;  %805 = vmatpush.bf16.msra.mxu2 %v3028_v41  ;;  %v3111_v41 = vld [vmem:[%s4013_s8] ss:$0 sm:$0xff] }
  0x1d   : > { %v3338_v12 = vsel %vm571_vm2, %v3126_v7, %v570_v11  ;;  %v3038_v7 = vld [vmem:[%s4010_s5 + $0x28] sm:$0xff] }
  0x20   : > { %1004 = vmatpush.bf16.msrb.mxu1 %v3036_v58  ;;  %1062 = vmatpush.bf16.msrb.mxu2 %v3040_v59  ;;  %v3043_v59 = vld [vmem:[%s4012_s7 + $0x30] sm:$0xff] }
  0x24   : > { %1005 = vmatpush.bf16.msrb.mxu1 %v3035_v62  ;;  %1063 = vmatpush.bf16.msrb.mxu2 %v3039_v63 }
  0x28   : > { %1006 = vmatpush.bf16.msrb.mxu1 %v3034_v6  ;;  %1064 = vmatpush.bf16.msrb.mxu2 %v3038_v7 }
  0x86   : > { %v558_v13 = vpop.xlane.xlu0 %557  ;;  %v565_v17 = vpop.xlane.xlu1 %564 }
  0x87   : > { %v573_v14 = vmul.f32 %v3338_v12, %v558_v13  ;;  %v575_v21 = vmul.f32 %v3338_v12, %v565_v17  ;;  %v3037_v17 = vld [vmem:[%s4010_s5 + $0x20] sm:$0xff] }
  0x88   : > { %1065 = vmatpush.bf16.msrb.mxu2 %v3037_v17 }
  0x89   : > { %v3341_v15 = vsub.f32 %v550_v0, %v573_v14  ;;  %v3350_v23 = vsub.f32 %v552_v1, %v575_v21 }
  0x8b   : > { %v579_v16 = vmul.f32 %v3341_v15, %v3341_v15  ;;  %v581_v26 = vmul.f32 %v3350_v23, %v3350_v23 }
  0x8d   : > { %v582_v18 = vsel %vm555_vm0, %v579_v16, 0.0  ;;  %v588_v27 = vsel %vm562_vm1, %v581_v26, 0.0  ;;  %v3033_v16 = vld [vmem:[%s4008_s3 + $0x20] sm:$0xff] }
  0x8e   : > { %583 = vadd.xlane.f32.xlu1 %v582_v18  ;;  %v561_v19 = vpop.xlane.xlu0 %560  ;;  %1007 = vmatpush.bf16.msrb.mxu1 %v3033_v16 }
  0x8f   : > { %v574_v20 = vmul.f32 %v3338_v12, %v561_v19 }
  0x91   : > { %v3348_v22 = vsub.f32 %v551_v4, %v574_v20 }
  0x93   : > { %v580_v24 = vmul.f32 %v3348_v22, %v3348_v22 }
  0x95   : > { %v585_v25 = vsel %vm555_vm0, %v580_v24, 0.0 }
  0x96   : > { %586 = vadd.xlane.f32.xlu2 %v585_v25 }
  0x9e   : > { %589 = vadd.xlane.f32.xlu2 %v588_v27 }
 0x101   : > { %v584_v37 = vpop.xlane.xlu1 %583 }
 0x102   : > { %v591_v38 = vmul.f32 %v584_v37, %v3338_v12 }
 0x104   : > { %v594_v42 = vadd.f32 1e-05, %v591_v38 }
 0x106   : > { %3127 = vrsqrt.f32 %v594_v42  ;;  %vm603_vm4 = vweird.f32 %v594_v42 }
 0x109   : > { %v587_v43 = vpop.xlane.xlu2 %586 }
 0x10a   : > { %v592_v44 = vmul.f32 %v587_v43, %v3338_v12 }
 0x10c   : > { %v3128_v45 = vpop.eup %3127  ;;  %v595_v46 = vadd.f32 1e-05, %v592_v44 }
 0x10d   : > { %v598_v47 = vmul.f32 %v3128_v45, %v594_v42  ;;  %vm604_vm3 = vweird.f32 %v3128_v45 }
 0x10e   : > { %3129 = vrsqrt.f32 %v595_v46  ;;  %vm605_vm5 = vmor %vm603_vm4, %vm604_vm3  ;;  %vm613_vm7 = vweird.f32 %v595_v46 }
 0x10f   : > { %v599_v48 = vmul.f32 %v3128_v45, %v598_v47  ;;  %v3223_v47 = vmov 0  }
 0x111   : > { %v600_v49 = vmul.f32 0.5, %v599_v48  ;;  %v590_v50 = vpop.xlane.xlu2 %589  ;;  %v3461_v48 = vsel %vm934_vm13, 65535, %v3223_v47 }
 0x112   : > { %v593_v51 = vmul.f32 %v590_v50, %v3338_v12 }
 0x113   : > { %v601_v52 = vsub.f32 1.5, %v600_v49 }
 0x114   : > { %v3130_v53 = vpop.eup %3129  ;;  %v596_v54 = vadd.f32 1e-05, %v593_v51  ;;  %v3044_v51 = vld [vmem:[%s4012_s7 + $0x38] sm:$0xff] }
 0x115   : > { %v602_v55 = vmul.f32 %v3128_v45, %v601_v52  ;;  %v608_v56 = vmul.f32 %v3130_v53, %v595_v46  ;;  %vm614_vm6 = vweird.f32 %v3130_v53 }
 0x116   : > { %3131 = vrsqrt.f32 %v596_v54  ;;  %vm615_vm8 = vmor %vm613_vm7, %vm614_vm6  ;;  %vm623_vm9 = vweird.f32 %v596_v54 }
 0x117   : > { %v609_v57 = vmul.f32 %v3130_v53, %v608_v56  ;;  %v606_v60 = vsel %vm605_vm5, %v3128_v45, %v602_v55 }
 0x118   : > { %v627_v3 = vmul.f32 %v606_v60, %v3341_v15 }
 0x119   : > { %v610_v61 = vmul.f32 0.5, %v609_v57 }
 0x11a   : > { %v633_v11 = vmul.f32 %v3107_v2, %v627_v3  ;;  %v3041_v3 = vld [vmem:[%s4012_s7 + $0x20] sm:$0xff] }
 0x11b   : > { %v611_v0 = vsub.f32 1.5, %v610_v61 }
 0x11c   : > { %v3132_v1 = vpop.eup %3131  ;;  %v639_v19 = vadd.f32 %v3108_v10, %v633_v11 }
 0x11d   : > { %v612_v4 = vmul.f32 %v3130_v53, %v611_v0  ;;  %v618_v5 = vmul.f32 %v3132_v1, %v596_v54  ;;  %vm624_vm10 = vweird.f32 %v3132_v1  ;;  %v3109_v54 = vld [vmem:[%s4009_s4] ss:$0 sm:$0xff]  ;;  %v3042_v0 = vld [vmem:[%s4012_s7 + $0x28] sm:$0xff] }
 0x11e   : > { %vm625_vm11 = vmor %vm623_vm9, %vm624_vm10 }
 0x11f   : > { %v616_v8 = vsel %vm615_vm8, %v3130_v53, %v612_v4  ;;  %v619_v9 = vmul.f32 %v3132_v1, %v618_v5 }
 0x120   : > { %v628_v13 = vmul.f32 %v616_v8, %v3348_v22 }
 0x121   : > { %v620_v14 = vmul.f32 0.5, %v619_v9 }
 0x122   : > { %v634_v15 = vmul.f32 %v3107_v2, %v628_v13  ;;  %v3113_v13 = vld [vmem:[%s4011_s6 + $0x1] ss:$0 sm:$0xff] }
 0x123   : > { %v621_v18 = vsub.f32 1.5, %v620_v14 }
 0x124   : > { %v640_v20 = vadd.f32 %v3108_v10, %v634_v15 }
 0x125   : > { %v622_v21 = vmul.f32 %v3132_v1, %v621_v18 }
 0x126   : > { %v3429_v24 = vpack.c.bf16 %v640_v20, %v639_v19 }
 0x127   : > { %v626_v22 = vsel %vm625_vm11, %v3132_v1, %v622_v21  ;;  %v3480_v1 = vld [vmem:[%s4009_s4 + $0x1] ss:$0 sm:$0xff] }
 0x128   : > { %2591 = vmatmul.msk.bf16.vlgmr.msra.gmra.mxu0 %vm555_vm0, %v3429_v24  ;;  %2609 = vmatmul.msk.bf16.vlgmr.msra.gmra.mxu1 %vm555_vm0, %v3429_v24  ;;  %v629_v25 = vmul.f32 %v626_v22, %v3350_v23 }
 0x129   : > { %2627 = vmatmul.msk.bf16.vlgmr.msra.gmra.mxu2 %vm555_vm0, %v3429_v24 }
 0x12a   : > { %v635_v26 = vmul.f32 %v3107_v2, %v629_v25 }
 0x12c   : > { %v641_v27 = vadd.f32 %v3108_v10, %v635_v26 }
 0x12e   : > { %v3438_v28 = vpack.c.bf16 %v641_v27, %v641_v27 }
 0x138   : > { %2592 = vmatmul.msk.bf16.gmra.mxu0 %vm555_vm0, %v3438_v28  ;;  %2610 = vmatmul.msk.bf16.gmra.mxu1 %vm555_vm0, %v3438_v28 }
 0x139   : > { %2628 = vmatmul.msk.bf16.gmra.mxu2 %vm555_vm0, %v3438_v28 }
 0x148   : > { %2658 = vmatmul.msk.bf16.vlgmr.msrb.gmra.mxu1 %vm555_vm0, %v3429_v24 }
 0x149   : > { %2685 = vmatmul.msk.bf16.vlgmr.msrb.gmra.mxu2 %vm555_vm0, %v3429_v24 }
 0x158   : > { %2659 = vmatmul.msk.bf16.gmra.mxu1 %vm555_vm0, %v3438_v28 }
 0x159   : > { %2686 = vmatmul.msk.bf16.gmra.mxu2 %vm555_vm0, %v3438_v28 }
 0x1a5   : > { %v695_v23 = vpop.f32.mrf.mxu0  ;;  %v751_v29 = vpop.f32.mrf.mxu1 }
 0x1a6   : > { %v752_v42 = vadd.f32 %v3110_v33, %v751_v29  ;;  %v696_v62 = vadd.f32 %v3109_v54, %v695_v23 }
 0x1ac   : > { %v807_v30 = vpop.f32.mrf.mxu2 }
 0x1ad   : > { %v697_v31 = vpop.f32.mrf.mxu0  ;;  %v753_v32 = vpop.f32.mrf.mxu1  ;;  %v808_v56 = vadd.f32 %v3111_v41, %v807_v30 }
 0x1ae   : > { %v754_v39 = vadd.f32 %v3110_v33, %v753_v32  ;;  %v698_v57 = vadd.f32 %v3109_v54, %v697_v31 }
 0x1b0   : > { %v760_v49 = vpack.c.bf16 %v754_v39, %v752_v42  ;;  %v704_v63 = vpack.c.bf16 %v698_v57, %v696_v62 }
 0x1b2   : > { %v826_v55 = vsel %vm818_vm12, %v760_v49, 0 }
 0x1b4   : > { %v809_v34 = vpop.f32.mrf.mxu2 }
 0x1b5   : > { %v700_v35 = vpop.f32.mrf.mxu0  ;;  %v756_v36 = vpop.f32.mrf.mxu1  ;;  %v810_v52 = vadd.f32 %v3111_v41, %v809_v34 }
 0x1b6   : > { %v757_v37 = vadd.f32 %v3110_v33, %v756_v36  ;;  %v701_v8 = vadd.f32 %v3109_v54, %v700_v35 }
 0x1b7   : > { %v816_v61 = vpack.c.bf16 %v810_v52, %v808_v56 }
 0x1b8   : > { %v761_v38 = vpack.c.bf16 %v757_v37, %v757_v37  ;;  %v705_v11 = vpack.c.bf16 %v701_v8, %v701_v8 }
 0x1ba   : > { %v829_v40 = vsel %vm818_vm12, %v761_v38, 0  ;;  %v3114_v38 = vld [vmem:[%s4013_s8 + $0x1] ss:$0 sm:$0xff] }
 0x1bb   : > { %837 = vmatpush.bf16.xpose.msra.mxu3 %v829_v40 }
 0x1bc   : > { %v812_v43 = vpop.f32.mrf.mxu2 }
 0x1bd   : > { %v813_v44 = vadd.f32 %v3111_v41, %v812_v43  ;;  %v702_v45 = vpop.f32.mrf.mxu0  ;;  %v758_v46 = vpop.f32.mrf.mxu1 }
 0x1bf   : > { %v817_v50 = vpack.c.bf16 %v813_v44, %v813_v44 }
 0x1c1   : > { %v938_v53 = vand.u32 %v3461_v48, %v817_v50 }
 0x1c3   : > { %946 = vmatpush.bf16.msrb.mxu0 %v938_v53  ;;  %838 = vmatpush.bf16.xpose.msra.mxu3 %v826_v55 }
 0x1c4   : > { %v814_v58 = vpop.f32.mrf.mxu2 }
 0x1c5   : > { %v1009_v60 = vpop.f32.mrf.mxu1 }
 0x1c6   : > { %v3487_v5 = vadd.f32 %v3480_v1, %v1009_v60 }
 0x1c7   : > { %947 = vmatpush.bf16.msrb.mxu0 %v816_v61 }
 0x1ca   : > { %2629 = vmatmul.msk.bf16.vlgmr.msra.gmra.mxu3 %vm818_vm12, %v704_v63 }
 0x1cb   : > { %1120 = vmatpush.bf16.msrb.mxu3 %v3044_v51 }
 0x1cc   : > { %v1067_v2 = vpop.f32.mrf.mxu2 }
 0x1cd   : > { %v1011_v4 = vpop.f32.mrf.mxu1  ;;  %v1068_v20 = vadd.f32 %v3113_v13, %v1067_v2 }
 0x1ce   : > { %v3490_v6 = vadd.f32 %v3480_v1, %v1011_v4 }
 0x1cf   : > { %1121 = vmatpush.bf16.msrb.mxu3 %v3043_v59 }
 0x1d0   : > { %v1018_v7 = vpack.c.bf16 %v3490_v6, %v3487_v5 }
 0x1d3   : > { %1122 = vmatpush.bf16.msrb.mxu3 %v3042_v0 }
 0x1d4   : > { %v1069_v9 = vpop.f32.mrf.mxu2 }
 0x1d5   : > { %v3494_v10 = vpop.f32.mrf.mxu1  ;;  %v1070_v18 = vadd.f32 %v3113_v13, %v1069_v9 }
 0x1d7   : > { %1123 = vmatpush.bf16.msrb.mxu3 %v3041_v3  ;;  %v1076_v22 = vpack.c.bf16 %v1070_v18, %v1068_v20 }
 0x1d9   : > { %v1143_v25 = vsel %vm818_vm12, %v1076_v22, 0 }
 0x1da   : > { %2630 = vmatmul.msk.bf16.gmra.mxu3 %vm818_vm12, %v705_v11 }
 0x1dc   : > { %v1072_v14 = vpop.f32.mrf.mxu2 }
 0x1dd   : > { %v1073_v15 = vadd.f32 %v3113_v13, %v1072_v14  ;;  %v1016_v16 = vpop.f32.mrf.mxu1 }
 0x1df   : > { %v1077_v17 = vpack.c.bf16 %v1073_v15, %v1073_v15 }
 0x1e1   : > { %v1146_v19 = vsel %vm818_vm12, %v1077_v17, 0 }
 0x1e2   : > { %1154 = vmatpush.bf16.xpose.msra.mxu0 %v1146_v19 }
 0x1e4   : > { %v1074_v21 = vpop.f32.mrf.mxu2 }
 0x1ea   : > { %1155 = vmatpush.bf16.xpose.msra.mxu0 %v1143_v25  ;;  %2712 = vmatmul.msk.bf16.vlgmr.msrb.gmra.mxu3 %vm555_vm0, %v3429_v24 }
 0x1fa   : > { %2713 = vmatmul.msk.bf16.gmra.mxu3 %vm555_vm0, %v3438_v28 }
 0x24d   : > { %v840_v26 = vpop.f32.mrf.mxu3 }
 0x24e   : > { %v849_v27 = vmul.f32 0.25, %v840_v26 }
 0x250   : > { %v853_v23 = vsel %vm852_vm14, %v849_v27, -inf }
 0x251   : > { %854 = vmax.xlane.f32.xlu0 %v853_v23 }
 0x255   : > { %v842_v29 = vpop.f32.mrf.mxu3 }
 0x256   : > { %v850_v30 = vmul.f32 0.25, %v842_v29 }
 0x258   : > { %v856_v31 = vsel %vm852_vm14, %v850_v30, -inf }
 0x259   : > { %857 = vmax.xlane.f32.xlu1 %v856_v31 }
 0x25d   : > { %v845_v32 = vpop.f32.mrf.mxu3 }
 0x25e   : > { %v851_v33 = vmul.f32 0.25, %v845_v32 }
 0x260   : > { %v860_v34 = vsel %vm859_vm15, %v851_v33, -inf }
 0x261   : > { %861 = vmax.xlane.f32.xlu2 %v860_v34 }
 0x265   : > { %v847_v35 = vpop.f32.mrf.mxu3 }
 0x26d   : > { %v1125_v36 = vpop.f32.mrf.mxu3 }
 0x26e   : > { %v1126_v44 = vadd.f32 %v3114_v38, %v1125_v36 }
 0x275   : > { %v1127_v37 = vpop.f32.mrf.mxu3 }
 0x276   : > { %v1128_v42 = vadd.f32 %v3114_v38, %v1127_v37 }
 0x278   : > { %v1134_v46 = vpack.c.bf16 %v1128_v42, %v1126_v44 }
 0x27d   : > { %v1130_v39 = vpop.f32.mrf.mxu3 }
 0x27e   : > { %v1131_v40 = vadd.f32 %v3114_v38, %v1130_v39 }
 0x280   : > { %v1135_v41 = vpack.c.bf16 %v1131_v40, %v1131_v40 }
 0x282   : > { %v1250_v43 = vand.u32 %v1135_v41, %v3461_v48 }
 0x284   : > { %1258 = vmatpush.bf16.msra.mxu1 %v1250_v43 }
 0x285   : > { %v1132_v45 = vpop.f32.mrf.mxu3 }
 0x286   : > { %v3049_v45 = vld [vmem:[%s4008_s3 + $0x58] sm:$0xff] }
 0x288   : > { %1259 = vmatpush.bf16.msra.mxu1 %v1134_v46  ;;  %v3048_v46 = vld [vmem:[%s4008_s3 + $0x50] sm:$0xff] }
 0x2c4   : > { %v855_v47 = vpop.xlane.xlu0 %854 }
 0x2c5   : > { %v863_v49 = vsub.f32 %v849_v27, %v855_v47  ;;  %v3047_v47 = vld [vmem:[%s4008_s3 + $0x48] sm:$0xff] }
 0x2c7   : > { %v866_v50 = vmul.f32 1.442695, %v863_v49  ;;  %v3046_v49 = vld [vmem:[%s4008_s3 + $0x40] sm:$0xff] }
 0x2c9   : > { %3133 = vpow2.f32 %v866_v50  ;;  %v1015_v50 = vadd.f32 %v3480_v1, %v3494_v10 }
 0x2cc   : > { %v858_v51 = vpop.xlane.xlu1 %857 }
 0x2cd   : > { %v864_v52 = vsub.f32 %v850_v30, %v858_v51  ;;  %v1019_v51 = vpack.c.bf16 %v1015_v50, %v1015_v50 }
 0x2cf   : > { %v3134_v53 = vpop.eup %3133  ;;  %v868_v54 = vmul.f32 1.442695, %v864_v52  ;;  %v3032_v52 = vld [vmem:[%s4014_s9] sm:$0xff] }
 0x2d0   : > { %v872_v55 = vsel %vm852_vm14, %v3134_v53, 0.0  ;;  %1324 = vmatpush.bf16.msra.mxu3 %v3032_v52 }
 0x2d1   : > { %3135 = vpow2.f32 %v868_v54  ;;  %873 = vadd.xlane.f32.xlu0 %v872_v55 }
 0x2d4   : > { %v862_v56 = vpop.xlane.xlu2 %861 }
 0x2d5   : > { %v865_v57 = vsub.f32 %v851_v33, %v862_v56 }
 0x2d7   : > { %v3136_v58 = vpop.eup %3135  ;;  %v870_v59 = vmul.f32 1.442695, %v865_v57 }
 0x2d8   : > { %v875_v60 = vsel %vm852_vm14, %v3136_v58, 0.0 }
 0x2d9   : > { %3137 = vpow2.f32 %v870_v59  ;;  %876 = vadd.xlane.f32.xlu1 %v875_v60 }
 0x2df   : > { %v3138_v61 = vpop.eup %3137 }
 0x2e0   : > { %v878_v62 = vsel %vm859_vm15, %v3138_v61, 0.0 }
 0x2e1   : > { %879 = vadd.xlane.f32.xlu2 %v878_v62 }
 0x344   : > { %v874_v63 = vpop.xlane.xlu0 %873 }
 0x345   : > { %3139 = vrcp.f32 %v874_v63  ;;  %v892_v15 = vand.u32 2147483648, %v874_v63  ;;  %vm886_vm3 = vweird.f32 %v874_v63  ;;  %v890_v16 = vand.u32 2147483647, %v874_v63 }
 0x347   : > { %v893_v22 = vor.u32 1.1754944e-38, %v892_v15  ;;  %vm891_vm6 = vcmp.eq.f32.partialorder %v890_v16, 8.507059e+37 }
 0x34b   : > { %v3140_v0 = vpop.eup %3139 }
 0x34c   : > { %v882_v2 = vmul.f32 %v3140_v0, %v874_v63  ;;  %v877_v3 = vpop.xlane.xlu1 %876  ;;  %vm887_vm2 = vweird.f32 %v3140_v0 }
 0x34d   : > { %3141 = vrcp.f32 %v877_v3  ;;  %vm888_vm4 = vmor %vm886_vm3, %vm887_vm2  ;;  %v907_v18 = vand.u32 2147483648, %v877_v3  ;;  %v905_v21 = vand.u32 2147483647, %v877_v3  ;;  %vm901_vm7 = vweird.f32 %v877_v3 }
 0x34e   : > { %v883_v4 = vsub.f32 1.0, %v882_v2  ;;  %v3552_v2 = vld [vmem:[%s4009_s4 + $0x2] ss:$0 sm:$0xff] }
 0x34f   : > { %v908_v27 = vor.u32 1.1754944e-38, %v907_v18  ;;  %vm906_vm9 = vcmp.eq.f32.partialorder %v905_v21, 8.507059e+37 }
 0x350   : > { %v884_v8 = vmul.f32 %v3140_v0, %v883_v4 }
 0x352   : > { %v885_v11 = vadd.f32 %v3140_v0, %v884_v8 }
 0x353   : > { %v3142_v9 = vpop.eup %3141 }
 0x354   : > { %v897_v13 = vmul.f32 %v3142_v9, %v877_v3  ;;  %v880_v14 = vpop.xlane.xlu2 %879  ;;  %v889_v19 = vsel %vm888_vm4, %v3140_v0, %v885_v11  ;;  %vm902_vm5 = vweird.f32 %v3142_v9 }
 0x355   : > { %3143 = vrcp.f32 %v880_v14  ;;  %vm903_vm8 = vmor %vm901_vm7, %vm902_vm5  ;;  %v894_v23 = vsel %vm891_vm6, %v893_v22, %v889_v19  ;;  %v922_v38 = vand.u32 2147483648, %v880_v14  ;;  %vm916_vm11 = vweird.f32 %v880_v14 }
 0x356   : > { %v898_v17 = vsub.f32 1.0, %v897_v13  ;;  %v895_v33 = vmul.f32 %v3134_v53, %v894_v23  ;;  %v920_v39 = vand.u32 2147483647, %v880_v14 }
 0x357   : > { %v923_v41 = vor.u32 1.1754944e-38, %v922_v38 }
 0x358   : > { %v899_v20 = vmul.f32 %v3142_v9, %v898_v17  ;;  %vm921_vm2 = vcmp.eq.f32.partialorder %v920_v39, 8.507059e+37 }
 0x35a   : > { %v900_v25 = vadd.f32 %v3142_v9, %v899_v20 }
 0x35b   : > { %v3144_v26 = vpop.eup %3143 }
 0x35c   : > { %v904_v29 = vsel %vm903_vm8, %v3142_v9, %v900_v25  ;;  %v912_v30 = vmul.f32 %v3144_v26, %v880_v14  ;;  %vm917_vm10 = vweird.f32 %v3144_v26 }
 0x35d   : > { %v909_v31 = vsel %vm906_vm9, %v908_v27, %v904_v29  ;;  %vm918_vm13 = vmor %vm916_vm11, %vm917_vm10 }
 0x35e   : > { %v913_v32 = vsub.f32 1.0, %v912_v30  ;;  %v910_v34 = vmul.f32 %v3136_v58, %v909_v31 }
 0x360   : > { %v914_v35 = vmul.f32 %v3144_v26, %v913_v32  ;;  %v926_v36 = vpack.c.bf16 %v910_v34, %v895_v33 }
 0x362   : > { %2631 = vmatmul.msk.bf16.vlgmr.msrb.gmra.mxu0 %vm852_vm14, %v926_v36  ;;  %v915_v37 = vadd.f32 %v3144_v26, %v914_v35 }
 0x363   : > { %1377 = vmatpush.bf16.msrb.mxu0 %v3049_v45 }
 0x364   : > { %v919_v40 = vsel %vm918_vm13, %v3144_v26, %v915_v37 }
 0x365   : > { %v924_v42 = vsel %vm921_vm2, %v923_v41, %v919_v40  ;;  %v3053_v41 = vld [vmem:[%s4010_s5 + $0x58] sm:$0xff] }
 0x366   : > { %v925_v43 = vmul.f32 %v3138_v61, %v924_v42  ;;  %1435 = vmatpush.bf16.msrb.mxu1 %v3053_v41 }
 0x367   : > { %1378 = vmatpush.bf16.msrb.mxu0 %v3048_v46  ;;  %v3052_v46 = vld [vmem:[%s4010_s5 + $0x50] sm:$0xff] }
 0x368   : > { %v927_v44 = vpack.c.bf16 %v925_v43, %v925_v43 }
 0x36a   : > { %1436 = vmatpush.bf16.msrb.mxu1 %v3052_v46 }
 0x36b   : > { %1379 = vmatpush.bf16.msrb.mxu0 %v3047_v47 }
 0x36f   : > { %1380 = vmatpush.bf16.msrb.mxu0 %v3046_v49 }
 0x372   : > { %2632 = vmatmul.msk.bf16.gmra.mxu0 %vm852_vm14, %v927_v44 }
 0x382   : > { %2714 = vmatmul.msk.bf16.vlgmr.msra.gmra.mxu0 %vm818_vm12, %v1018_v7 }
 0x392   : > { %2715 = vmatmul.msk.bf16.gmra.mxu0 %vm818_vm12, %v1019_v51 }
 0x3a2   : > { %2757 = vmatmul.msk.bf16.vlgmr.msrb.gmra.mxu0 %vm555_vm0, %v3429_v24 }
 0x3b2   : > { %2758 = vmatmul.msk.bf16.gmra.mxu0 %vm555_vm0, %v3438_v28 }
 0x3df   : > { %v949_v5 = vpop.f32.mrf.mxu0 }
 0x3e7   : > { %v951_v6 = vpop.f32.mrf.mxu0 }
 0x3e8   : > { %v958_v7 = vpack.c.bf16 %v951_v6, %v949_v5 }
 0x3ea   : > { %2730 = vmatmul.msk.bf16.vlgmr.msra.gmra.mxu3 %vm818_vm12, %v958_v7  ;;  %v3051_v7 = vld [vmem:[%s4010_s5 + $0x48] sm:$0xff] }
 0x3eb   : > { %1437 = vmatpush.bf16.msrb.mxu1 %v3051_v7  ;;  %v3064_v7 = vld [vmem:[%s4010_s5 + $0x68] sm:$0xff] }
 0x3ef   : > { %v954_v1 = vpop.f32.mrf.mxu0 }
 0x3f0   : > { %v959_v53 = vpack.c.bf16 %v954_v1, %v954_v1 }
 0x3f7   : > { %v956_v10 = vpop.f32.mrf.mxu0 }
 0x3fa   : > { %2731 = vmatmul.msk.bf16.gmra.mxu3 %vm818_vm12, %v959_v53 }
 0x3ff   : > { %v1157_v54 = vpop.f32.mrf.mxu0 }
 0x400   : > { %v1166_v55 = vmul.f32 0.25, %v1157_v54 }
 0x402   : > { %v1169_v56 = vsel %vm852_vm14, %v1166_v55, -inf }
 0x403   : > { %1170 = vmax.xlane.f32.xlu0 %v1169_v56 }
 0x407   : > { %v1159_v57 = vpop.f32.mrf.mxu0 }
 0x408   : > { %v1167_v58 = vmul.f32 0.25, %v1159_v57 }
 0x40a   : > { %v1172_v59 = vsel %vm852_vm14, %v1167_v58, -inf }
 0x40b   : > { %1173 = vmax.xlane.f32.xlu1 %v1172_v59 }
 0x40f   : > { %v1162_v60 = vpop.f32.mrf.mxu0 }
 0x410   : > { %v1168_v61 = vmul.f32 0.25, %v1162_v60 }
 0x412   : > { %v1175_v62 = vsel %vm859_vm15, %v1168_v61, -inf }
 0x413   : > { %1176 = vmax.xlane.f32.xlu2 %v1175_v62 }
 0x417   : > { %v1164_v63 = vpop.f32.mrf.mxu0 }
 0x41f   : > { %v1382_v0 = vpop.f32.mrf.mxu0 }
 0x420   : > { %v3555_v4 = vadd.f32 %v3552_v2, %v1382_v0 }
 0x427   : > { %v1384_v3 = vpop.f32.mrf.mxu0 }
 0x428   : > { %v3558_v8 = vadd.f32 %v3552_v2, %v1384_v3 }
 0x42a   : > { %v1391_v9 = vpack.c.bf16 %v3558_v8, %v3555_v4 }
 0x42f   : > { %v3562_v11 = vpop.f32.mrf.mxu0 }
 0x437   : > { %v1389_v13 = vpop.f32.mrf.mxu0 }
 0x46d   : > { %v3564_v14 = vpop.f32.mrf.mxu3 }
 0x475   : > { %v3566_v15 = vpop.f32.mrf.mxu3 }
 0x476   : > { %v1171_v16 = vpop.xlane.xlu0 %1170 }
 0x477   : > { %v1178_v17 = vsub.f32 %v1166_v55, %v1171_v16 }
 0x479   : > { %v1181_v18 = vmul.f32 1.442695, %v1178_v17 }
 0x47b   : > { %3145 = vpow2.f32 %v1181_v18 }
 0x47d   : > { %v3568_v19 = vpop.f32.mrf.mxu3 }
 0x47e   : > { %v1174_v20 = vpop.xlane.xlu1 %1173 }
 0x47f   : > { %v1179_v21 = vsub.f32 %v1167_v58, %v1174_v20  ;;  %v3050_v58 = vld [vmem:[%s4010_s5 + $0x40] sm:$0xff] }
 0x480   : > { %1438 = vmatpush.bf16.msrb.mxu1 %v3050_v58 }
 0x481   : > { %v3146_v22 = vpop.eup %3145  ;;  %v1183_v25 = vmul.f32 1.442695, %v1179_v21 }
 0x482   : > { %v1187_v26 = vsel %vm852_vm14, %v3146_v22, 0.0 }
 0x483   : > { %3147 = vpow2.f32 %v1183_v25  ;;  %1188 = vadd.xlane.f32.xlu0 %v1187_v26  ;;  %v3045_v25 = vld [vmem:[%s4014_s9 + $0x8] sm:$0xff]  ;;  %v3057_v26 = vld [vmem:[%s4012_s7 + $0x58] sm:$0xff] }
 0x484   : > { %1294 = vmatpush.bf16.msra.mxu2 %v3045_v25 }
 0x485   : > { %v1333_v27 = vpop.f32.mrf.mxu3 }
 0x486   : > { %v1177_v23 = vpop.xlane.xlu2 %1176  ;;  %v3056_v27 = vld [vmem:[%s4012_s7 + $0x50] sm:$0xff] }
 0x487   : > { %v1180_v29 = vsub.f32 %v1168_v61, %v1177_v23 }
 0x488   : > { %1493 = vmatpush.bf16.msrb.mxu2 %v3057_v26 }
 0x489   : > { %v3148_v30 = vpop.eup %3147  ;;  %v1185_v31 = vmul.f32 1.442695, %v1180_v29  ;;  %v3055_v29 = vld [vmem:[%s4012_s7 + $0x48] sm:$0xff] }
 0x48a   : > { %v1190_v32 = vsel %vm852_vm14, %v3148_v30, 0.0 }
 0x48b   : > { %3149 = vpow2.f32 %v1185_v31  ;;  %1191 = vadd.xlane.f32.xlu1 %v1190_v32 }
 0x48c   : > { %1494 = vmatpush.bf16.msrb.mxu2 %v3056_v27 }
 0x490   : > { %1495 = vmatpush.bf16.msrb.mxu2 %v3055_v29 }
 0x491   : > { %v3572_v33 = vpop.eup %3149 }
 0x492   : > { %v1193_v34 = vsel %vm859_vm15, %v3572_v33, 0.0 }
 0x493   : > { %1194 = vadd.xlane.f32.xlu2 %v1193_v34 }
 0x4f6   : > { %v1189_v35 = vpop.xlane.xlu0 %1188 }
 0x4f7   : > { %3151 = vrcp.f32 %v1189_v35  ;;  %v1207_v47 = vand.u32 2147483648, %v1189_v35  ;;  %vm1201_vm4 = vweird.f32 %v1189_v35  ;;  %v1205_v49 = vand.u32 2147483647, %v1189_v35 }
 0x4f9   : > { %v1208_v1 = vor.u32 1.1754944e-38, %v1207_v47  ;;  %vm1206_vm7 = vcmp.eq.f32.partialorder %v1205_v49, 8.507059e+37 }
 0x4fd   : > { %v3152_v36 = vpop.eup %3151 }
 0x4fe   : > { %v1197_v37 = vmul.f32 %v3152_v36, %v1189_v35  ;;  %v1192_v38 = vpop.xlane.xlu1 %1191  ;;  %vm1202_vm3 = vweird.f32 %v3152_v36 }
 0x4ff   : > { %3153 = vrcp.f32 %v1192_v38  ;;  %vm1203_vm5 = vmor %vm1201_vm4, %vm1202_vm3  ;;  %v1222_v51 = vand.u32 2147483648, %v1192_v38  ;;  %v1220_v6 = vand.u32 2147483647, %v1192_v38  ;;  %vm1216_vm8 = vweird.f32 %v1192_v38 }
 0x500   : > { %v1198_v39 = vsub.f32 1.0, %v1197_v37  ;;  %v3061_v37 = vld [vmem:[%s4008_s3 + $0x70] sm:$0xff] }
 0x501   : > { %v1223_v55 = vor.u32 1.1754944e-38, %v1222_v51  ;;  %vm1221_vm10 = vcmp.eq.f32.partialorder %v1220_v6, 8.507059e+37  ;;  %v3065_v6 = vld [vmem:[%s4010_s5 + $0x70] sm:$0xff] }
 0x502   : > { %v1199_v40 = vmul.f32 %v3152_v36, %v1198_v39  ;;  %v3060_v39 = vld [vmem:[%s4008_s3 + $0x68] sm:$0xff] }
 0x504   : > { %v1200_v43 = vadd.f32 %v3152_v36, %v1199_v40  ;;  %v3059_v40 = vld [vmem:[%s4008_s3 + $0x60] sm:$0xff] }
 0x505   : > { %v3154_v42 = vpop.eup %3153 }
 0x506   : > { %v1212_v44 = vmul.f32 %v3154_v42, %v1192_v38  ;;  %v1195_v45 = vpop.xlane.xlu2 %1194  ;;  %v1204_v52 = vsel %vm1203_vm5, %v3152_v36, %v1200_v43  ;;  %vm1217_vm6 = vweird.f32 %v3154_v42  ;;  %v3062_v36 = vld [vmem:[%s4008_s3 + $0x78] sm:$0xff] }
 0x507   : > { %3155 = vrcp.f32 %v1195_v45  ;;  %v1209_v54 = vsel %vm1206_vm7, %v1208_v1, %v1204_v52  ;;  %vm1218_vm9 = vmor %vm1216_vm8, %vm1217_vm6  ;;  %v1237_v13 = vand.u32 2147483648, %v1195_v45  ;;  %vm1231_vm13 = vweird.f32 %v1195_v45  ;;  %v3066_v52 = vld [vmem:[%s4010_s5 + $0x78] sm:$0xff]  ;;  %v3063_v1 = vld [vmem:[%s4010_s5 + $0x60] sm:$0xff] }
 0x508   : > { %v1213_v50 = vsub.f32 1.0, %v1212_v44  ;;  %v1210_v60 = vmul.f32 %v3146_v22, %v1209_v54  ;;  %v1235_v16 = vand.u32 2147483647, %v1195_v45 }
 0x509   : > { %v1238_v18 = vor.u32 1.1754944e-38, %v1237_v13 }
 0x50a   : > { %v1214_v5 = vmul.f32 %v3154_v42, %v1213_v50  ;;  %vm1236_vm3 = vcmp.eq.f32.partialorder %v1235_v16, 8.507059e+37 }
 0x50c   : > { %v1215_v10 = vadd.f32 %v3154_v42, %v1214_v5 }
 0x50d   : > { %v3156_v53 = vpop.eup %3155 }
 0x50e   : > { %v1219_v56 = vsel %vm1218_vm9, %v3154_v42, %v1215_v10  ;;  %v1227_v57 = vmul.f32 %v3156_v53, %v1195_v45  ;;  %vm1232_vm11 = vweird.f32 %v3156_v53  ;;  %v3116_v42 = vld [vmem:[%s4011_s6 + $0x2] ss:$0 sm:$0xff]  ;;  %v1388_v10 = vadd.f32 %v3552_v2, %v3562_v11 }
 0x50f   : > { %v1224_v59 = vsel %vm1221_vm10, %v1223_v55, %v1219_v56  ;;  %vm1233_vm2 = vmor %vm1231_vm13, %vm1232_vm11  ;;  %v3117_v55 = vld [vmem:[%s4013_s8 + $0x2] ss:$0 sm:$0xff] }
 0x510   : > { %v1225_v61 = vmul.f32 %v3148_v30, %v1224_v59  ;;  %v1228_v62 = vsub.f32 1.0, %v1227_v57  ;;  %v3054_v30 = vld [vmem:[%s4012_s7 + $0x40] sm:$0xff] }
 0x511   : > { %1496 = vmatpush.bf16.msrb.mxu2 %v3054_v30 }
 0x512   : > { %v1229_v63 = vmul.f32 %v3156_v53, %v1228_v62  ;;  %v1241_v0 = vpack.c.bf16 %v1225_v61, %v1210_v60 }
 0x514   : > { %2716 = vmatmul.msk.bf16.vlgmr.msra.gmra.mxu1 %vm852_vm14, %v1241_v0  ;;  %v1230_v3 = vadd.f32 %v3156_v53, %v1229_v63 }
 0x516   : > { %v1234_v17 = vsel %vm1233_vm2, %v3156_v53, %v1230_v3  ;;  %v1392_v53 = vpack.c.bf16 %v1388_v10, %v1388_v10 }
 0x517   : > { %v1239_v20 = vsel %vm1236_vm3, %v1238_v18, %v1234_v17 }
 0x518   : > { %v1240_v21 = vmul.f32 %v3572_v33, %v1239_v20  ;;  %v3674_v20 = vld [vmem:[%s4009_s4 + $0x3] ss:$0 sm:$0xff] }
 0x51a   : > { %v1242_v22 = vpack.c.bf16 %v1240_v21, %v1240_v21 }
 0x524   : > { %2717 = vmatmul.msk.bf16.gmra.mxu1 %vm852_vm14, %v1242_v22 }
 0x534   : > { %2784 = vmatmul.msk.bf16.vlgmr.msrb.gmra.mxu1 %vm555_vm0, %v3429_v24 }
 0x544   : > { %2785 = vmatmul.msk.bf16.gmra.mxu1 %vm555_vm0, %v3438_v28 }
 0x591   : > { %v1261_v23 = vpop.f32.mrf.mxu1 }
 0x599   : > { %v1263_v31 = vpop.f32.mrf.mxu1 }
 0x59a   : > { %v1270_v32 = vpack.c.bf16 %v1263_v31, %v1261_v23  ;;  %v3058_v31 = vld [vmem:[%s4014_s9 + $0x10] sm:$0xff] }
 0x59b   : > { %1667 = vmatpush.bf16.msra.mxu1 %v3058_v31  ;;  %v3068_v31 = vld [vmem:[%s4012_s7 + $0x68] sm:$0xff] }
 0x59c   : > { %2724 = vmatmul.msk.bf16.vlgmr.msra.gmra.mxu2 %vm818_vm12, %v1270_v32 }
 0x59d   : > { %1723 = vmatpush.bf16.msra.mxu2 %v3062_v36 }
 0x5a1   : > { %v1266_v33 = vpop.f32.mrf.mxu1  ;;  %1724 = vmatpush.bf16.msra.mxu2 %v3061_v37  ;;  %v3119_v37 = vld [vmem:[%s4011_s6 + $0x3] ss:$0 sm:$0xff] }
 0x5a2   : > { %v1271_v35 = vpack.c.bf16 %v1266_v33, %v1266_v33 }
 0x5a5   : > { %1725 = vmatpush.bf16.msra.mxu2 %v3060_v39 }
 0x5a9   : > { %v1268_v34 = vpop.f32.mrf.mxu1  ;;  %1726 = vmatpush.bf16.msra.mxu2 %v3059_v40 }
 0x5ac   : > { %2725 = vmatmul.msk.bf16.gmra.mxu2 %vm818_vm12, %v1271_v35 }
 0x5b1   : > { %v1440_v38 = vpop.f32.mrf.mxu1 }
 0x5b2   : > { %v1441_v49 = vadd.f32 %v3116_v42, %v1440_v38 }
 0x5b9   : > { %v1442_v41 = vpop.f32.mrf.mxu1 }
 0x5ba   : > { %v1443_v46 = vadd.f32 %v3116_v42, %v1442_v41 }
 0x5bc   : > { %2811 = vmatmul.msk.bf16.vlgmr.msrb.gmra.mxu2 %vm555_vm0, %v3429_v24  ;;  %v1449_v51 = vpack.c.bf16 %v1443_v46, %v1441_v49 }
 0x5be   : > { %v1516_v5 = vsel %vm818_vm12, %v1449_v51, 0 }
 0x5c1   : > { %v1445_v43 = vpop.f32.mrf.mxu1 }
 0x5c2   : > { %v1446_v44 = vadd.f32 %v3116_v42, %v1445_v43 }
 0x5c4   : > { %v1450_v45 = vpack.c.bf16 %v1446_v44, %v1446_v44 }
 0x5c6   : > { %v1519_v47 = vsel %vm818_vm12, %v1450_v45, 0 }
 0x5c7   : > { %1527 = vmatpush.bf16.xpose.msrb.mxu3 %v1519_v47 }
 0x5c9   : > { %v1447_v50 = vpop.f32.mrf.mxu1 }
 0x5cc   : > { %2812 = vmatmul.msk.bf16.gmra.mxu2 %vm555_vm0, %v3438_v28 }
 0x5cf   : > { %1528 = vmatpush.bf16.xpose.msrb.mxu3 %v1516_v5 }
 0x5d6   : > { %2813 = vmatmul.msk.bf16.vlgmr.msrb.gmra.mxu3 %vm818_vm12, %v1391_v9 }
 0x5d7   : > { %1781 = vmatpush.bf16.msra.mxu3 %v3066_v52 }
 0x5db   : > { %1782 = vmatpush.bf16.msra.mxu3 %v3065_v6 }
 0x5dc   : > { %2850 = vmatmul.msk.bf16.vlgmr.msra.gmra.mxu2 %vm555_vm0, %v3429_v24 }
 0x5df   : > { %1783 = vmatpush.bf16.msra.mxu3 %v3064_v7 }
 0x5e3   : > { %1784 = vmatpush.bf16.msra.mxu3 %v3063_v1 }
 0x5e6   : > { %2814 = vmatmul.msk.bf16.gmra.mxu3 %vm818_vm12, %v1392_v53 }
 0x5ec   : > { %2851 = vmatmul.msk.bf16.gmra.mxu2 %vm555_vm0, %v3438_v28 }
 0x5f6   : > { %2877 = vmatmul.msk.bf16.vlgmr.msra.gmra.mxu3 %vm555_vm0, %v3429_v24 }
 0x606   : > { %2878 = vmatmul.msk.bf16.gmra.mxu3 %vm555_vm0, %v3438_v28 }
 0x61f   : > { %v3660_v4 = vpop.f32.mrf.mxu2 }
 0x627   : > { %v3662_v8 = vpop.f32.mrf.mxu2 }
 0x62f   : > { %v3664_v9 = vpop.f32.mrf.mxu2 }
 0x637   : > { %v1303_v54 = vpop.f32.mrf.mxu2 }
 0x63f   : > { %v1498_v2 = vpop.f32.mrf.mxu2 }
 0x640   : > { %v1499_v61 = vadd.f32 %v3117_v55, %v1498_v2 }
 0x647   : > { %v1500_v11 = vpop.f32.mrf.mxu2 }
 0x648   : > { %v1501_v59 = vadd.f32 %v3117_v55, %v1500_v11 }
 0x64a   : > { %v1507_v63 = vpack.c.bf16 %v1501_v59, %v1499_v61 }
 0x64f   : > { %v1503_v56 = vpop.f32.mrf.mxu2 }
 0x650   : > { %v1504_v57 = vadd.f32 %v3117_v55, %v1503_v56 }
 0x652   : > { %v1508_v58 = vpack.c.bf16 %v1504_v57, %v1504_v57 }
 0x654   : > { %v1623_v60 = vand.u32 %v1508_v58, %v3461_v48 }
 0x656   : > { %1631 = vmatpush.bf16.msra.mxu0 %v1623_v60 }
 0x657   : > { %v1505_v62 = vpop.f32.mrf.mxu2 }
 0x658   : > { %v3070_v62 = vld [vmem:[%s4012_s7 + $0x78] sm:$0xff] }
 0x659   : > { %v1530_v0 = vpop.f32.mrf.mxu3 }
 0x65a   : > { %v1539_v3 = vmul.f32 0.25, %v1530_v0  ;;  %1632 = vmatpush.bf16.msra.mxu0 %v1507_v63 }
 0x65c   : > { %v1542_v13 = vsel %vm852_vm14, %v1539_v3, -inf }
 0x65d   : > { %1543 = vmax.xlane.f32.xlu0 %v1542_v13 }
 0x65e   : > { %1839 = vmatpush.bf16.msrb.mxu0 %v3070_v62 }
 0x65f   : > { %v1728_v16 = vpop.f32.mrf.mxu2 }
 0x660   : > { %v3678_v25 = vadd.f32 %v3674_v20, %v1728_v16  ;;  %v3069_v16 = vld [vmem:[%s4012_s7 + $0x70] sm:$0xff] }
 0x661   : > { %v1532_v17 = vpop.f32.mrf.mxu3 }
 0x662   : > { %v1540_v18 = vmul.f32 0.25, %v1532_v17  ;;  %1840 = vmatpush.bf16.msrb.mxu0 %v3069_v16 }
 0x664   : > { %v1545_v21 = vsel %vm852_vm14, %v1540_v18, -inf }
 0x665   : > { %1546 = vmax.xlane.f32.xlu1 %v1545_v21 }
 0x666   : > { %1841 = vmatpush.bf16.msrb.mxu0 %v3068_v31 }
 0x667   : > { %v1730_v22 = vpop.f32.mrf.mxu2 }
 0x668   : > { %v3681_v26 = vadd.f32 %v3674_v20, %v1730_v22 }
 0x669   : > { %v1535_v27 = vpop.f32.mrf.mxu3 }
 0x66a   : > { %v1737_v23 = vpack.c.bf16 %v3681_v26, %v3678_v25  ;;  %v1541_v29 = vmul.f32 0.25, %v1535_v27  ;;  %v1327_v26 = vadd.f32 %v3564_v14, %v3660_v4 }
 0x66c   : > { %v1548_v30 = vsel %vm859_vm15, %v1541_v29, -inf }
 0x66d   : > { %1549 = vmax.xlane.f32.xlu2 %v1548_v30 }
 0x66f   : > { %v3689_v32 = vpop.f32.mrf.mxu2 }
 0x671   : > { %v1537_v33 = vpop.f32.mrf.mxu3 }
 0x677   : > { %v1735_v34 = vpop.f32.mrf.mxu2 }
 0x679   : > { %v1786_v35 = vpop.f32.mrf.mxu3 }
 0x67a   : > { %v1787_v43 = vadd.f32 %v3119_v37, %v1786_v35 }
 0x681   : > { %v1788_v36 = vpop.f32.mrf.mxu3 }
 0x682   : > { %v1789_v41 = vadd.f32 %v3119_v37, %v1788_v36 }
 0x684   : > { %v1795_v45 = vpack.c.bf16 %v1789_v41, %v1787_v43 }
 0x686   : > { %v1862_v46 = vsel %vm818_vm12, %v1795_v45, 0 }
 0x689   : > { %v1791_v38 = vpop.f32.mrf.mxu3 }
 0x68a   : > { %v1792_v39 = vadd.f32 %v3119_v37, %v1791_v38 }
 0x68c   : > { %v1796_v40 = vpack.c.bf16 %v1792_v39, %v1792_v39 }
 0x68e   : > { %v1865_v42 = vsel %vm818_vm12, %v1796_v40, 0  ;;  %v3067_v40 = vld [vmem:[%s4012_s7 + $0x60] sm:$0xff] }
 0x68f   : > { %1873 = vmatpush.bf16.xpose.msrb.mxu1 %v1865_v42  ;;  %1842 = vmatpush.bf16.msrb.mxu0 %v3067_v40 }
 0x691   : > { %v1793_v44 = vpop.f32.mrf.mxu3 }
 0x697   : > { %1874 = vmatpush.bf16.xpose.msrb.mxu1 %v1862_v46 }
 0x6d0   : > { %v1544_v47 = vpop.xlane.xlu0 %1543 }
 0x6d1   : > { %v1551_v49 = vsub.f32 %v1539_v3, %v1544_v47 }
 0x6d3   : > { %v1554_v50 = vmul.f32 1.442695, %v1551_v49 }
 0x6d5   : > { %3157 = vpow2.f32 %v1554_v50 }
 0x6d8   : > { %v1547_v51 = vpop.xlane.xlu1 %1546 }
 0x6d9   : > { %v1552_v52 = vsub.f32 %v1540_v18, %v1547_v51 }
 0x6db   : > { %v3158_v5 = vpop.eup %3157  ;;  %v1556_v6 = vmul.f32 1.442695, %v1552_v52 }
 0x6dc   : > { %v1560_v7 = vsel %vm852_vm14, %v3158_v5, 0.0 }
 0x6dd   : > { %3159 = vpow2.f32 %v1556_v6  ;;  %1561 = vadd.xlane.f32.xlu0 %v1560_v7 }
 0x6e0   : > { %v1550_v1 = vpop.xlane.xlu2 %1549 }
 0x6e1   : > { %v1553_v10 = vsub.f32 %v1541_v29, %v1550_v1 }
 0x6e3   : > { %v3160_v53 = vpop.eup %3159  ;;  %v1558_v54 = vmul.f32 1.442695, %v1553_v10 }
 0x6e4   : > { %v1563_v2 = vsel %vm852_vm14, %v3160_v53, 0.0 }
 0x6e5   : > { %3161 = vpow2.f32 %v1558_v54  ;;  %1564 = vadd.xlane.f32.xlu1 %v1563_v2 }
 0x6eb   : > { %v3698_v11 = vpop.eup %3161 }
 0x6ec   : > { %v1566_v55 = vsel %vm859_vm15, %v3698_v11, 0.0 }
 0x6ed   : > { %1567 = vadd.xlane.f32.xlu2 %v1566_v55 }
 0x750   : > { %v1562_v56 = vpop.xlane.xlu0 %1561 }
 0x751   : > { %3163 = vrcp.f32 %v1562_v56  ;;  %v1580_v17 = vand.u32 2147483648, %v1562_v56  ;;  %vm1574_vm5 = vweird.f32 %v1562_v56  ;;  %v1578_v18 = vand.u32 2147483647, %v1562_v56 }
 0x753   : > { %v1581_v33 = vor.u32 1.1754944e-38, %v1580_v17  ;;  %vm1579_vm8 = vcmp.eq.f32.partialorder %v1578_v18, 8.507059e+37 }
 0x757   : > { %v3164_v57 = vpop.eup %3163 }
 0x758   : > { %v1570_v58 = vmul.f32 %v3164_v57, %v1562_v56  ;;  %v1565_v59 = vpop.xlane.xlu1 %1564  ;;  %vm1575_vm4 = vweird.f32 %v3164_v57 }
 0x759   : > { %3165 = vrcp.f32 %v1565_v59  ;;  %vm1576_vm6 = vmor %vm1574_vm5, %vm1575_vm4  ;;  %v1595_v22 = vand.u32 2147483648, %v1565_v59  ;;  %v1593_v30 = vand.u32 2147483647, %v1565_v59  ;;  %vm1589_vm9 = vweird.f32 %v1565_v59 }
 0x75a   : > { %v1571_v60 = vsub.f32 1.0, %v1570_v58 }
 0x75b   : > { %v1596_v37 = vor.u32 1.1754944e-38, %v1595_v22  ;;  %vm1594_vm11 = vcmp.eq.f32.partialorder %v1593_v30, 8.507059e+37 }
 0x75c   : > { %v1572_v61 = vmul.f32 %v3164_v57, %v1571_v60 }
 0x75e   : > { %v1573_v0 = vadd.f32 %v3164_v57, %v1572_v61 }
 0x75f   : > { %v3166_v63 = vpop.eup %3165 }
 0x760   : > { %v1585_v3 = vmul.f32 %v3166_v63, %v1565_v59  ;;  %v1568_v13 = vpop.xlane.xlu2 %1567  ;;  %v1577_v27 = vsel %vm1576_vm6, %v3164_v57, %v1573_v0  ;;  %vm1590_vm7 = vweird.f32 %v3166_v63  ;;  %v1734_v59 = vadd.f32 %v3674_v20, %v3689_v32 }
 0x761   : > { %3167 = vrcp.f32 %v1568_v13  ;;  %v1582_v36 = vsel %vm1579_vm8, %v1581_v33, %v1577_v27  ;;  %vm1591_vm10 = vmor %vm1589_vm9, %vm1590_vm7  ;;  %v1610_v49 = vand.u32 2147483648, %v1568_v13  ;;  %vm1604_vm2 = vweird.f32 %v1568_v13 }
 0x762   : > { %v1586_v21 = vsub.f32 1.0, %v1585_v3  ;;  %v1583_v42 = vmul.f32 %v3158_v5, %v1582_v36  ;;  %v1608_v50 = vand.u32 2147483647, %v1568_v13  ;;  %v1738_v0 = vpack.c.bf16 %v1734_v59, %v1734_v59 }
 0x763   : > { %v1611_v52 = vor.u32 1.1754944e-38, %v1610_v49  ;;  %v1329_v20 = vadd.f32 %v3566_v15, %v3662_v8 }
 0x764   : > { %v1587_v29 = vmul.f32 %v3166_v63, %v1586_v21  ;;  %vm1609_vm4 = vcmp.eq.f32.partialorder %v1608_v50, 8.507059e+37 }
 0x766   : > { %v1588_v34 = vadd.f32 %v3166_v63, %v1587_v29 }
 0x767   : > { %v3168_v35 = vpop.eup %3167 }
 0x768   : > { %v1592_v38 = vsel %vm1591_vm10, %v3166_v63, %v1588_v34  ;;  %v1600_v39 = vmul.f32 %v3168_v35, %v1568_v13  ;;  %vm1605_vm13 = vweird.f32 %v3168_v35 }
 0x769   : > { %v1597_v41 = vsel %vm1594_vm11, %v1596_v37, %v1592_v38  ;;  %vm1606_vm3 = vmor %vm1604_vm2, %vm1605_vm13 }
 0x76a   : > { %v1598_v43 = vmul.f32 %v3160_v53, %v1597_v41  ;;  %v1601_v44 = vsub.f32 1.0, %v1600_v39 }
 0x76c   : > { %v1602_v45 = vmul.f32 %v3168_v35, %v1601_v44  ;;  %v1614_v46 = vpack.c.bf16 %v1598_v43, %v1583_v42 }
 0x76e   : > { %2815 = vmatmul.msk.bf16.vlgmr.msra.gmra.mxu0 %vm852_vm14, %v1614_v46  ;;  %v1603_v47 = vadd.f32 %v3168_v35, %v1602_v45 }
 0x770   : > { %v1607_v51 = vsel %vm1606_vm3, %v3168_v35, %v1603_v47 }
 0x771   : > { %v1612_v6 = vsel %vm1609_vm4, %v1611_v52, %v1607_v51 }
 0x772   : > { %v1613_v7 = vmul.f32 %v3698_v11, %v1612_v6  ;;  %v3071_v6 = vld [vmem:[%s4014_s9 + $0x18] sm:$0xff] }
 0x773   : > { %2013 = vmatpush.bf16.msrb.mxu3 %v3071_v6 }
 0x774   : > { %v1615_v5 = vpack.c.bf16 %v1613_v7, %v1613_v7 }
 0x77e   : > { %2816 = vmatmul.msk.bf16.gmra.mxu0 %vm852_vm14, %v1615_v5 }
 0x78e   : > { %2904 = vmatmul.msk.bf16.vlgmr.msrb.gmra.mxu0 %vm555_vm0, %v3429_v24  ;;  %v3120_v24 = vld [vmem:[%s4013_s8 + $0x3] ss:$0 sm:$0xff] }
 0x79e   : > { %2905 = vmatmul.msk.bf16.gmra.mxu0 %vm555_vm0, %v3438_v28 }
 0x7eb   : > { %v1634_v1 = vpop.f32.mrf.mxu0 }
 0x7f3   : > { %v1636_v10 = vpop.f32.mrf.mxu0 }
 0x7f4   : > { %v1643_v53 = vpack.c.bf16 %v1636_v10, %v1634_v1 }
 0x7f6   : > { %2823 = vmatmul.msk.bf16.vlgmr.msra.gmra.mxu1 %vm818_vm12, %v1643_v53 }
 0x7fb   : > { %v1639_v54 = vpop.f32.mrf.mxu0 }
 0x7fc   : > { %v1644_v55 = vpack.c.bf16 %v1639_v54, %v1639_v54 }
 0x803   : > { %v1641_v2 = vpop.f32.mrf.mxu0 }
 0x806   : > { %2824 = vmatmul.msk.bf16.gmra.mxu1 %vm818_vm12, %v1644_v55 }
 0x80b   : > { %v1844_v11 = vpop.f32.mrf.mxu0 }
 0x80c   : > { %v1845_v62 = vadd.f32 %v3120_v24, %v1844_v11 }
 0x813   : > { %v1846_v56 = vpop.f32.mrf.mxu0 }
 0x814   : > { %v1847_v60 = vadd.f32 %v3120_v24, %v1846_v56 }
 0x816   : > { %2906 = vmatmul.msk.bf16.vlgmr.msrb.gmra.mxu1 %vm818_vm12, %v1737_v23  ;;  %v1853_v25 = vpack.c.bf16 %v1847_v60, %v1845_v62 }
 0x81b   : > { %v1849_v28 = vpop.f32.mrf.mxu0 }
 0x81c   : > { %v1850_v57 = vadd.f32 %v3120_v24, %v1849_v28 }
 0x81e   : > { %v1854_v58 = vpack.c.bf16 %v1850_v57, %v1850_v57 }
 0x820   : > { %v1969_v61 = vand.u32 %v1854_v58, %v3461_v48  ;;  %v1332_v48 = vadd.f32 %v3568_v19, %v3664_v9 }
 0x822   : > { %1977 = vmatpush.bf16.msrb.mxu2 %v1969_v61 }
 0x823   : > { %v1851_v63 = vpop.f32.mrf.mxu0 }
 0x826   : > { %2907 = vmatmul.msk.bf16.gmra.mxu1 %vm818_vm12, %v1738_v0  ;;  %1978 = vmatpush.bf16.msrb.mxu2 %v1853_v25 }
 0x873   : > { %v1669_v23 = vpop.f32.mrf.mxu1 }
 0x874   : > { %v3736_v3 = vadd.f32 %v1669_v23, %v1327_v26 }
 0x87b   : > { %v1671_v32 = vpop.f32.mrf.mxu1 }
 0x87c   : > { %v3740_v13 = vadd.f32 %v1671_v32, %v1329_v20 }
 0x883   : > { %v1674_v16 = vpop.f32.mrf.mxu1 }
 0x884   : > { %v3744_v17 = vadd.f32 %v1674_v16, %v1332_v48 }
 0x88b   : > { %v1676_v18 = vpop.f32.mrf.mxu1 }
 0x893   : > { %v1876_v21 = vpop.f32.mrf.mxu1 }
 0x894   : > { %v1885_v22 = vmul.f32 0.25, %v1876_v21 }
 0x896   : > { %v1888_v14 = vsel %vm852_vm14, %v1885_v22, -inf }
 0x897   : > { %1889 = vmax.xlane.f32.xlu0 %v1888_v14 }
 0x89b   : > { %v1878_v4 = vpop.f32.mrf.mxu1 }
 0x89c   : > { %v1886_v27 = vmul.f32 0.25, %v1878_v4 }
 0x89e   : > { %v1891_v29 = vsel %vm852_vm14, %v1886_v27, -inf }
 0x89f   : > { %1892 = vmax.xlane.f32.xlu1 %v1891_v29 }
 0x8a3   : > { %v1881_v15 = vpop.f32.mrf.mxu1 }
 0x8a4   : > { %v1887_v8 = vmul.f32 0.25, %v1881_v15 }
 0x8a6   : > { %v1894_v30 = vsel %vm859_vm15, %v1887_v8, -inf }
 0x8a7   : > { %1895 = vmax.xlane.f32.xlu2 %v1894_v30 }
 0x8ab   : > { %v1883_v19 = vpop.f32.mrf.mxu1 }
 0x90a   : > { %v1890_v9 = vpop.xlane.xlu0 %1889 }
 0x90b   : > { %v1897_v31 = vsub.f32 %v1885_v22, %v1890_v9 }
 0x90d   : > { %v1900_v33 = vmul.f32 1.442695, %v1897_v31 }
 0x90f   : > { %3169 = vpow2.f32 %v1900_v33  ;;  %v3121_v33 = vld [vmem:[%s4015_s10] ss:$0 sm:$0xff] }
 0x912   : > { %v1893_v34 = vpop.xlane.xlu1 %1892 }
 0x913   : > { %v1898_v35 = vsub.f32 %v1886_v27, %v1893_v34  ;;  %v3211_v34 = vld [vmem:[%s3330_s0] sm:$0xff] }
 0x915   : > { %v3170_v36 = vpop.eup %3169  ;;  %v1902_v37 = vmul.f32 1.442695, %v1898_v35 }
 0x916   : > { %v1906_v38 = vsel %vm852_vm14, %v3170_v36, 0.0 }
 0x917   : > { %3171 = vpow2.f32 %v1902_v37  ;;  %1907 = vadd.xlane.f32.xlu0 %v1906_v38 }
 0x91a   : > { %v1896_v39 = vpop.xlane.xlu2 %1895 }
 0x91b   : > { %v1899_v40 = vsub.f32 %v1887_v8, %v1896_v39 }
 0x91d   : > { %v3172_v41 = vpop.eup %3171  ;;  %v1904_v42 = vmul.f32 1.442695, %v1899_v40  ;;  %v3212_v40 = vld [vmem:[%s3330_s0 + $0x8] sm:$0xff] }
 0x91e   : > { %v1909_v43 = vsel %vm852_vm14, %v3172_v41, 0.0 }
 0x91f   : > { %3173 = vpow2.f32 %v1904_v42  ;;  %1910 = vadd.xlane.f32.xlu1 %v1909_v43 }
 0x925   : > { %v3174_v44 = vpop.eup %3173 }
 0x926   : > { %v1912_v45 = vsel %vm859_vm15, %v3174_v44, 0.0 }
 0x927   : > { %1913 = vadd.xlane.f32.xlu2 %v1912_v45  ;;  %v3213_v45 = vld [vmem:[%s3330_s0 + $0x10] sm:$0x1] }
 0x98a   : > { %v1908_v46 = vpop.xlane.xlu0 %1907 }
 0x98b   : > { %3175 = vrcp.f32 %v1908_v46  ;;  %v1926_v53 = vand.u32 2147483648, %v1908_v46  ;;  %vm1920_vm15 = vweird.f32 %v1908_v46  ;;  %v1924_v54 = vand.u32 2147483647, %v1908_v46 }
 0x98d   : > { %v1927_v28 = vor.u32 1.1754944e-38, %v1926_v53  ;;  %vm1925_vm8 = vcmp.eq.f32.partialorder %v1924_v54, 8.507059e+37 }
 0x991   : > { %v3176_v47 = vpop.eup %3175 }
 0x992   : > { %v1916_v49 = vmul.f32 %v3176_v47, %v1908_v46  ;;  %v1911_v50 = vpop.xlane.xlu1 %1910  ;;  %vm1921_vm5 = vweird.f32 %v3176_v47 }
 0x993   : > { %3177 = vrcp.f32 %v1911_v50  ;;  %vm1922_vm6 = vmor %vm1920_vm15, %vm1921_vm5  ;;  %v1941_v55 = vand.u32 2147483648, %v1911_v50  ;;  %v1939_v24 = vand.u32 2147483647, %v1911_v50  ;;  %vm1935_vm9 = vweird.f32 %v1911_v50 }
 0x994   : > { %v1917_v51 = vsub.f32 1.0, %v1916_v49 }
 0x995   : > { %v1942_v60 = vor.u32 1.1754944e-38, %v1941_v55  ;;  %vm1940_vm11 = vcmp.eq.f32.partialorder %v1939_v24, 8.507059e+37  ;;  %v2944_v24 = vld [vmem:[%s4018_s13 + $0x30] sm:$0xf] }
 0x996   : > { %v1918_v52 = vmul.f32 %v3176_v47, %v1917_v51 }
 0x998   : > { %v1919_v5 = vadd.f32 %v3176_v47, %v1918_v52 }
 0x999   : > { %v3178_v7 = vpop.eup %3177 }
 0x99a   : > { %v1931_v1 = vmul.f32 %v3178_v7, %v1911_v50  ;;  %v1914_v10 = vpop.xlane.xlu2 %1913  ;;  %v1923_v11 = vsel %vm1922_vm6, %v3176_v47, %v1919_v5  ;;  %vm1936_vm7 = vweird.f32 %v3178_v7 }
 0x99b   : > { %3179 = vrcp.f32 %v1914_v10  ;;  %v1928_v59 = vsel %vm1925_vm8, %v1927_v28, %v1923_v11  ;;  %vm1937_vm10 = vmor %vm1935_vm9, %vm1936_vm7  ;;  %v1956_v48 = vand.u32 2147483648, %v1914_v10  ;;  %vm1950_vm2 = vweird.f32 %v1914_v10  ;;  %v3079_v28 = vld [vmem:[%s4018_s13 + $0x34] sm:$0xf0] }
 0x99c   : > { %v1932_v2 = vsub.f32 1.0, %v1931_v1  ;;  %v1929_v0 = vmul.f32 %v3170_v36, %v1928_v59  ;;  %v1954_v16 = vand.u32 2147483647, %v1914_v10  ;;  %v2946_v59 = vld [vmem:[%s4018_s13 + $0x38] sm:$0xf0] }
 0x99d   : > { %v1957_v21 = vor.u32 1.1754944e-38, %v1956_v48 }
 0x99e   : > { %v1933_v56 = vmul.f32 %v3178_v7, %v1932_v2  ;;  %vm1955_vm4 = vcmp.eq.f32.partialorder %v1954_v16, 8.507059e+37  ;;  %v2930_v16 = vld [vmem:[%s4018_s13 + $0x18] sm:$0xf0] }
 0x9a0   : > { %v1934_v57 = vadd.f32 %v3178_v7, %v1933_v56 }
 0x9a1   : > { %v3180_v58 = vpop.eup %3179 }
 0x9a2   : > { %v1938_v61 = vsel %vm1937_vm10, %v3178_v7, %v1934_v57  ;;  %v1946_v62 = vmul.f32 %v3180_v58, %v1914_v10  ;;  %vm1951_vm13 = vweird.f32 %v3180_v58  ;;  %v3078_v57 = vld [vmem:[%s4018_s13 + $0x34] sm:$0xf] }
 0x9a3   : > { %v1943_v63 = vsel %vm1940_vm11, %v1942_v60, %v1938_v61  ;;  %vm1952_vm3 = vmor %vm1950_vm2, %vm1951_vm13  ;;  %v2949_v60 = vor.u32 %v3078_v57, %v2946_v59  ;;  %v2936_v61 = vld [vmem:[%s4018_s13 + $0x20] sm:$0xf] }
 0x9a4   : > { %v1944_v25 = vmul.f32 %v3172_v41, %v1943_v63  ;;  %v1947_v26 = vsub.f32 1.0, %v1946_v62  ;;  %v3077_v62 = vld [vmem:[%s4018_s13 + $0x24] sm:$0xf0]  ;;  %v3076_v63 = vld [vmem:[%s4018_s13 + $0x24] sm:$0xf] }
 0x9a5   : > { %2201 = vmatpush.bf16.msra.mxu1 %v2949_v60 }
 0x9a6   : > { %v1948_v23 = vmul.f32 %v3180_v58, %v1947_v26  ;;  %v1960_v20 = vpack.c.bf16 %v1944_v25, %v1929_v0  ;;  %v2937_v0 = vor.u32 %v3077_v62, %v2936_v61  ;;  %v2938_v25 = vld [vmem:[%s4018_s13 + $0x28] sm:$0xf0]  ;;  %v3087_v62 = vld [vmem:[%s4020_s15 + $0x38] sm:$0xff] }
 0x9a7   : > { %v2941_v26 = vor.u32 %v3076_v63, %v2938_v25  ;;  %v3095_v63 = vld [vmem:[%s4020_s15 + $0x78] sm:$0xff]  ;;  %2471 = vmatpush.bf16.msra.mxu2 %v3087_v62  ;;  %v2127_v25 = vld [vmem:[%s4019_s14] sm:$0x3] }
 0x9a8   : > { %2908 = vmatmul.msk.bf16.vlgmr.msrb.gmra.mxu2 %vm852_vm14, %v1960_v20  ;;  %v1949_v32 = vadd.f32 %v3180_v58, %v1948_v23  ;;  %v2928_v23 = vld [vmem:[%s4018_s13 + $0x10] sm:$0xf]  ;;  %v3075_v20 = vld [vmem:[%s4018_s13 + $0x14] sm:$0xf0]  ;;  %2489 = vmatpush.bf16.msra.mxu3 %v3095_v63 }
 0x9a9   : > { %2202 = vmatpush.bf16.msra.mxu1 %v2941_v26  ;;  %v2929_v48 = vor.u32 %v3075_v20, %v2928_v23  ;;  %v3085_v26 = vld [vmem:[%s4020_s15 + $0x28] sm:$0xff]  ;;  %v2129_v20 = vperm.slane %v2127_v25, 0 }
 0x9aa   : > { %v1953_v18 = vsel %vm1952_vm3, %v3180_v58, %v1949_v32  ;;  %v2945_v58 = vor.u32 %v3079_v28, %v2944_v24  ;;  %v3074_v32 = vld [vmem:[%s4018_s13 + $0x14] sm:$0xf]  ;;  %v3093_v23 = vld [vmem:[%s4020_s15 + $0x68] sm:$0xff] }
 0x9ab   : > { %v1958_v22 = vsel %vm1955_vm4, %v1957_v21, %v1953_v18  ;;  %v2933_v21 = vor.u32 %v3074_v32, %v2930_v16  ;;  %v2130_v32 = vperm.slane %v2127_v25, 1  ;;  %v3092_v16 = vld [vmem:[%s4020_s15 + $0x60] sm:$0xff] }
 0x9ac   : > { %v1959_v14 = vmul.f32 %v3174_v44, %v1958_v22  ;;  %2183 = vmatpush.bf16.msra.mxu0 %v2945_v58 }
 0x9ad   : > { %2203 = vmatpush.bf16.msra.mxu1 %v2933_v21 }
 0x9ae   : > { %v1961_v4 = vpack.c.bf16 %v1959_v14, %v1959_v14  ;;  %v2920_v14 = vld [vmem:[%s4018_s13] sm:$0xf] }
 0x9b0   : > { %2184 = vmatpush.bf16.msra.mxu0 %v2937_v0  ;;  %v3094_v0 = vld [vmem:[%s4020_s15 + $0x70] sm:$0xff] }
 0x9b1   : > { %2490 = vmatpush.bf16.msra.mxu3 %v3094_v0 }
 0x9b4   : > { %2185 = vmatpush.bf16.msra.mxu0 %v2929_v48  ;;  %v3084_v48 = vld [vmem:[%s4020_s15 + $0x20] sm:$0xff] }
 0x9b5   : > { %2491 = vmatpush.bf16.msra.mxu3 %v3093_v23 }
 0x9b8   : > { %2909 = vmatmul.msk.bf16.gmra.mxu2 %vm852_vm14, %v1961_v4  ;;  %v3073_v4 = vld [vmem:[%s4018_s13 + $0x4] sm:$0xf0] }
 0x9b9   : > { %2492 = vmatpush.bf16.msra.mxu3 %v3092_v16  ;;  %v3124_v16 = vld [vmem:[%s4021_s16] ss:$0 sm:$0xff] }
 0xa2b   : > { %v1980_v27 = vpop.f32.mrf.mxu2 }
 0xa33   : > { %v1982_v29 = vpop.f32.mrf.mxu2 }
 0xa34   : > { %v1989_v15 = vpack.c.bf16 %v1982_v29, %v1980_v27  ;;  %v3072_v27 = vld [vmem:[%s4018_s13 + $0x4] sm:$0xf] }
 0xa36   : > { %2916 = vmatmul.msk.bf16.vlgmr.msrb.gmra.mxu3 %vm818_vm12, %v1989_v15  ;;  %v2921_v15 = vor.u32 %v3073_v4, %v2920_v14 }
 0xa38   : > { %2186 = vmatpush.bf16.msra.mxu0 %v2921_v15  ;;  %v3091_v15 = vld [vmem:[%s4020_s15 + $0x58] sm:$0xff] }
 0xa39   : > { %2493 = vmatpush.bf16.msra.mxu3 %v3091_v15 }
 0xa3b   : > { %v1985_v8 = vpop.f32.mrf.mxu2 }
 0xa3c   : > { %v1990_v19 = vpack.c.bf16 %v1985_v8, %v1985_v8  ;;  %v2922_v8 = vld [vmem:[%s4018_s13 + $0x8] sm:$0xf0] }
 0xa43   : > { %v1987_v30 = vpop.f32.mrf.mxu2 }
 0xa44   : > { %v2925_v30 = vor.u32 %v3072_v27, %v2922_v8 }
 0xa46   : > { %2917 = vmatmul.msk.bf16.gmra.mxu3 %vm818_vm12, %v1990_v19  ;;  %2204 = vmatpush.bf16.msra.mxu1 %v2925_v30 }
 0xab9   : > { %v2015_v9 = vpop.f32.mrf.mxu3 }
 0xaba   : > { %v2024_v31 = vadd.f32 %v2015_v9, %v3736_v3 }
 0xabc   : > { %v2027_v35 = vadd.f32 %v3211_v34, %v2024_v31 }
 0xabe   : > { %v3764_v36 = vadd.f32 %v3121_v33, %v2027_v35 }
 0xac0   : > { %v2039_v37 = vsel %vm555_vm0, %v3764_v36, 0.0 }
 0xac1   : > { %2040 = vadd.xlane.f32.xlu0 %v2039_v37  ;;  %v2017_v38 = vpop.f32.mrf.mxu3 }
 0xac2   : > { %v2025_v39 = vadd.f32 %v2017_v38, %v3740_v13 }
 0xac4   : > { %v2028_v41 = vadd.f32 %v3212_v40, %v2025_v39 }
 0xac6   : > { %v3770_v42 = vadd.f32 %v3121_v33, %v2028_v41 }
 0xac8   : > { %v2042_v3 = vsel %vm555_vm0, %v3770_v42, 0.0 }
 0xac9   : > { %2043 = vadd.xlane.f32.xlu1 %v2042_v3  ;;  %v2020_v43 = vpop.f32.mrf.mxu3 }
 0xaca   : > { %v2026_v44 = vadd.f32 %v2020_v43, %v3744_v17 }
 0xacc   : > { %v2029_v46 = vadd.f32 %v3213_v45, %v2026_v44 }
 0xace   : > { %v3776_v47 = vadd.f32 %v3121_v33, %v2029_v46 }
 0xad0   : > { %v2045_v49 = vsel %vm562_vm1, %v3776_v47, 0.0 }
 0xad1   : > { %2046 = vadd.xlane.f32.xlu2 %v2045_v49  ;;  %v2022_v13 = vpop.f32.mrf.mxu3 }
 0xb34   : > { %v2041_v50 = vpop.xlane.xlu0 %2040 }
 0xb35   : > { %v2048_v51 = vmul.f32 %v2041_v50, %v3338_v12 }
 0xb37   : > { %v3782_v52 = vsub.f32 %v3764_v36, %v2048_v51  ;;  %v3122_v51 = vld [vmem:[%s4016_s11] ss:$0 sm:$0xff] }
 0xb39   : > { %v2054_v6 = vmul.f32 %v3782_v52, %v3782_v52 }
 0xb3b   : > { %v2057_v17 = vsel %vm555_vm0, %v2054_v6, 0.0 }
 0xb3c   : > { %2058 = vadd.xlane.f32.xlu0 %v2057_v17  ;;  %v2044_v7 = vpop.xlane.xlu1 %2043 }
 0xb3d   : > { %v2049_v5 = vmul.f32 %v2044_v7, %v3338_v12 }
 0xb3f   : > { %v3789_v1 = vsub.f32 %v3770_v42, %v2049_v5 }
 0xb41   : > { %v2055_v10 = vmul.f32 %v3789_v1, %v3789_v1 }
 0xb43   : > { %v2060_v53 = vsel %vm555_vm0, %v2055_v10, 0.0  ;;  %v3123_v10 = vld [vmem:[%s4017_s12] ss:$0 sm:$0xff] }
 0xb44   : > { %2061 = vadd.xlane.f32.xlu1 %v2060_v53  ;;  %v2047_v54 = vpop.xlane.xlu2 %2046 }
 0xb45   : > { %v2050_v2 = vmul.f32 %v2047_v54, %v3338_v12 }
 0xb47   : > { %v3796_v55 = vsub.f32 %v3776_v47, %v2050_v2 }
 0xb49   : > { %v2056_v11 = vmul.f32 %v3796_v55, %v3796_v55 }
 0xb4b   : > { %v2063_v56 = vsel %vm562_vm1, %v2056_v11, 0.0 }
 0xb4c   : > { %2064 = vadd.xlane.f32.xlu2 %v2063_v56 }
 0xbaf   : > { %v2059_v18 = vpop.xlane.xlu0 %2058 }
 0xbb0   : > { %v2066_v22 = vmul.f32 %v2059_v18, %v3338_v12 }
 0xbb2   : > { %v2069_v29 = vadd.f32 1e-05, %v2066_v22 }
 0xbb4   : > { %3181 = vrsqrt.f32 %v2069_v29  ;;  %vm2078_vm14 = vweird.f32 %v2069_v29 }
 0xbb7   : > { %v2062_v19 = vpop.xlane.xlu1 %2061 }
 0xbb8   : > { %v2067_v9 = vmul.f32 %v2062_v19, %v3338_v12  ;;  %v3082_v19 = vld [vmem:[%s4020_s15 + $0x10] sm:$0xff] }
 0xbba   : > { %v3182_v31 = vpop.eup %3181  ;;  %v2070_v33 = vadd.f32 1e-05, %v2067_v9  ;;  %v3090_v9 = vld [vmem:[%s4020_s15 + $0x50] sm:$0xff] }
 0xbbb   : > { %v2073_v34 = vmul.f32 %v3182_v31, %v2069_v29  ;;  %vm2079_vm12 = vweird.f32 %v3182_v31  ;;  %v3083_v29 = vld [vmem:[%s4020_s15 + $0x18] sm:$0xff]  ;;  %2494 = vmatpush.bf16.msra.mxu3 %v3090_v9 }
 0xbbc   : > { %3183 = vrsqrt.f32 %v2070_v33  ;;  %vm2080_vm5 = vmor %vm2078_vm14, %vm2079_vm12  ;;  %vm2088_vm6 = vweird.f32 %v2070_v33 }
 0xbbd   : > { %v2074_v35 = vmul.f32 %v3182_v31, %v2073_v34 }
 0xbbf   : > { %v2075_v37 = vmul.f32 0.5, %v2074_v35  ;;  %v2065_v38 = vpop.xlane.xlu2 %2064 }
 0xbc0   : > { %v2068_v39 = vmul.f32 %v2065_v38, %v3338_v12 }
 0xbc1   : > { %v2076_v40 = vsub.f32 1.5, %v2075_v37 }
 0xbc2   : > { %v3184_v41 = vpop.eup %3183  ;;  %v2071_v3 = vadd.f32 1e-05, %v2068_v39  ;;  %v3081_v39 = vld [vmem:[%s4020_s15 + $0x8] sm:$0xff] }
 0xbc3   : > { %v2077_v43 = vmul.f32 %v3182_v31, %v2076_v40  ;;  %v2083_v44 = vmul.f32 %v3184_v41, %v2070_v33  ;;  %vm2089_vm15 = vweird.f32 %v3184_v41  ;;  %v3089_v40 = vld [vmem:[%s4020_s15 + $0x48] sm:$0xff] }
 0xbc4   : > { %3185 = vrsqrt.f32 %v2071_v3  ;;  %vm2090_vm7 = vmor %vm2088_vm6, %vm2089_vm15  ;;  %vm2098_vm9 = vweird.f32 %v2071_v3  ;;  %2495 = vmatpush.bf16.msra.mxu3 %v3089_v40 }
 0xbc5   : > { %v2084_v45 = vmul.f32 %v3184_v41, %v2083_v44  ;;  %v2081_v46 = vsel %vm2080_vm5, %v3182_v31, %v2077_v43 }
 0xbc6   : > { %v2102_v12 = vmul.f32 %v2081_v46, %v3782_v52 }
 0xbc7   : > { %v2085_v49 = vmul.f32 0.5, %v2084_v45 }
 0xbc8   : > { %v2108_v53 = vmul.f32 %v3122_v51, %v2102_v12 }
 0xbc9   : > { %v2086_v13 = vsub.f32 1.5, %v2085_v49  ;;  %v3080_v49 = vld [vmem:[%s4020_s15] sm:$0xff] }
 0xbca   : > { %v3186_v50 = vpop.eup %3185  ;;  %v2114_v24 = vadd.f32 %v3123_v10, %v2108_v53 }
 0xbcb   : > { %v2087_v6 = vmul.f32 %v3184_v41, %v2086_v13  ;;  %v2093_v17 = vmul.f32 %v3186_v50, %v2071_v3  ;;  %vm2099_vm8 = vweird.f32 %v3186_v50  ;;  %v3088_v13 = vld [vmem:[%s4020_s15 + $0x40] sm:$0xff] }
 0xbcc   : > { %vm2100_vm10 = vmor %vm2098_vm9, %vm2099_vm8  ;;  %2496 = vmatpush.bf16.msra.mxu3 %v3088_v13 }
 0xbcd   : > { %v2091_v7 = vsel %vm2090_vm7, %v3184_v41, %v2087_v6  ;;  %v2094_v5 = vmul.f32 %v3186_v50, %v2093_v17 }
 0xbce   : > { %v2103_v54 = vmul.f32 %v2091_v7, %v3789_v1 }
 0xbcf   : > { %v2095_v2 = vmul.f32 0.5, %v2094_v5 }
 0xbd0   : > { %v2109_v11 = vmul.f32 %v3122_v51, %v2103_v54 }
 0xbd1   : > { %v2096_v56 = vsub.f32 1.5, %v2095_v2 }
 0xbd2   : > { %v2115_v28 = vadd.f32 %v3123_v10, %v2109_v11 }
 0xbd3   : > { %v2097_v52 = vmul.f32 %v3186_v50, %v2096_v56 }
 0xbd4   : > { %v2117_v57 = vpack.c.bf16 %v2115_v28, %v2114_v24 }
 0xbd5   : > { %v2101_v58 = vsel %vm2100_vm10, %v3186_v50, %v2097_v52 }
 0xbd6   : > { %2950 = vmatmul.msk.bf16.vlgmr.msra.gmra.mxu0 %vm555_vm0, %v2117_v57  ;;  %2952 = vmatmul.msk.bf16.vlgmr.msra.gmra.mxu1 %vm555_vm0, %v2117_v57  ;;  %v2104_v59 = vmul.f32 %v2101_v58, %v3796_v55  ;;  %v3086_v55 = vld [vmem:[%s4020_s15 + $0x30] sm:$0xff] }
 0xbd7   : > { %2472 = vmatpush.bf16.msra.mxu2 %v3086_v55 }
 0xbd8   : > { %v2110_v60 = vmul.f32 %v3122_v51, %v2104_v59 }
 0xbda   : > { %v2116_v61 = vadd.f32 %v3123_v10, %v2110_v60 }
 0xbdb   : > { %2473 = vmatpush.bf16.msra.mxu2 %v3085_v26 }
 0xbdc   : > { %v2118_v1 = vpack.c.bf16 %v2116_v61, %v2116_v61 }
 0xbdf   : > { %2474 = vmatpush.bf16.msra.mxu2 %v3084_v48 }
 0xbe3   : > { %2475 = vmatpush.bf16.msra.mxu2 %v3083_v29 }
 0xbe6   : > { %2951 = vmatmul.msk.bf16.gmra.mxu0 %vm555_vm0, %v2118_v1  ;;  %2953 = vmatmul.msk.bf16.gmra.mxu1 %vm555_vm0, %v2118_v1 }
 0xbe7   : > { %2476 = vmatpush.bf16.msra.mxu2 %v3082_v19 }
 0xbeb   : > { %2477 = vmatpush.bf16.msra.mxu2 %v3081_v39 }
 0xbef   : > { %2478 = vmatpush.bf16.msra.mxu2 %v3080_v49 }
 0xc53   : > { %v2188_v18 = vpop.f32.mrf.mxu0  ;;  %v2206_v21 = vpop.f32.mrf.mxu1 }
 0xc54   : > { %v3892_v22 = vadd.f32 %v2188_v18, %v2129_v20  ;;  %v3894_v14 = vadd.f32 %v2206_v21, %v2130_v32 }
 0xc56   : > { %v2215_v4 = vmul.f32 -1.702, %v3892_v22  ;;  %v2216_v27 = vmul.f32 -1.702, %v3894_v14 }
 0xc58   : > { %v2221_v8 = vmul.f32 1.442695, %v2215_v4  ;;  %v2223_v30 = vmul.f32 1.442695, %v2216_v27 }
 0xc5a   : > { %3187 = vpow2.f32 %v2221_v8 }
 0xc5b   : > { %3189 = vpow2.f32 %v2223_v30  ;;  %v2190_v31 = vpop.f32.mrf.mxu0  ;;  %v2208_v33 = vpop.f32.mrf.mxu1 }
 0xc5c   : > { %v3910_v34 = vadd.f32 %v2190_v31, %v2129_v20  ;;  %v3912_v35 = vadd.f32 %v2208_v33, %v2130_v32 }
 0xc5e   : > { %v2217_v37 = vmul.f32 -1.702, %v3910_v34  ;;  %v2218_v38 = vmul.f32 -1.702, %v3912_v35 }
 0xc60   : > { %v3188_v41 = vpop.eup %3187  ;;  %v2225_v3 = vmul.f32 1.442695, %v2217_v37  ;;  %v2227_v45 = vmul.f32 1.442695, %v2218_v38 }
 0xc61   : > { %v3190_v43 = vpop.eup %3189  ;;  %v2233_v44 = vadd.f32 1.0, %v3188_v41 }
 0xc62   : > { %v3922_v46 = vadd.f32 1.0, %v3190_v43  ;;  %3191 = vpow2.f32 %v2225_v3 }
 0xc63   : > { %3193 = vrcp.f32 %v2233_v44  ;;  %v2193_v50 = vpop.f32.mrf.mxu0  ;;  %v2211_v51 = vpop.f32.mrf.mxu1  ;;  %v2248_v1 = vand.u32 2147483647, %v2233_v44  ;;  %v2250_v62 = vand.u32 2147483648, %v2233_v44  ;;  %vm2244_vm13 = vweird.f32 %v2233_v44 }
 0xc64   : > { %3195 = vrcp.f32 %v3922_v46  ;;  %v3931_v12 = vadd.f32 %v2193_v50, %v2129_v20  ;;  %v3933_v6 = vadd.f32 %v2211_v51, %v2130_v32  ;;  %vm2259_vm2 = vweird.f32 %v3922_v46 }
 0xc65   : > { %3197 = vpow2.f32 %v2227_v45  ;;  %v2263_v23 = vand.u32 2147483647, %v3922_v46  ;;  %v2265_v20 = vand.u32 2147483648, %v3922_v46  ;;  %vm3952_vm4 = vcmp.eq.f32.partialorder %v2248_v1, 8.507059e+37 }
 0xc66   : > { %v2219_v17 = vmul.f32 -1.702, %v3931_v12  ;;  %v2220_v5 = vmul.f32 -1.702, %v3933_v6  ;;  %v2251_v21 = vor.u32 1.1754944e-38, %v2250_v62 }
 0xc67   : > { %v2266_v45 = vor.u32 1.1754944e-38, %v2265_v20  ;;  %vm2264_vm9 = vcmp.eq.f32.partialorder %v2263_v23, 8.507059e+37 }
 0xc68   : > { %v3192_v7 = vpop.eup %3191  ;;  %v2229_v54 = vmul.f32 1.442695, %v2219_v17  ;;  %v2231_v59 = vmul.f32 1.442695, %v2220_v5 }
 0xc69   : > { %v3194_v10 = vpop.eup %3193  ;;  %v2235_v53 = vadd.f32 1.0, %v3192_v7 }
 0xc6a   : > { %v3937_v2 = vpop.eup %3195  ;;  %v2240_v11 = vmul.f32 %v3194_v10, %v2233_v44  ;;  %vm2245_vm11 = vweird.f32 %v3194_v10 }
 0xc6b   : > { %v3198_v56 = vpop.eup %3197  ;;  %v2255_v24 = vmul.f32 %v3937_v2, %v3922_v46  ;;  %3199 = vrcp.f32 %v2235_v53  ;;  %v2195_v28 = vpop.f32.mrf.mxu0  ;;  %v2280_v32 = vand.u32 2147483648, %v2235_v53  ;;  %vm3948_vm3 = vmor %vm2244_vm13, %vm2245_vm11  ;;  %vm2260_vm12 = vweird.f32 %v3937_v2 }
 0xc6c   : > { %v2213_v52 = vpop.f32.mrf.mxu1  ;;  %v2241_v57 = vsub.f32 1.0, %v2240_v11  ;;  %v3941_v58 = vadd.f32 1.0, %v3198_v56  ;;  %3201 = vpow2.f32 %v2229_v54  ;;  %v2278_v9 = vand.u32 2147483647, %v2235_v53  ;;  %vm3968_vm15 = vmor %vm2259_vm2, %vm2260_vm12 }
 0xc6d   : > { %v2256_v60 = vsub.f32 1.0, %v2255_v24  ;;  %vm2274_vm5 = vweird.f32 %v2235_v53  ;;  %v2281_v31 = vor.u32 1.1754944e-38, %v2280_v32 }
 0xc6e   : > { %v2242_v61 = vmul.f32 %v3194_v10, %v2241_v57  ;;  %3203 = vrcp.f32 %v3941_v58  ;;  %v2293_v41 = vand.u32 2147483647, %v3941_v58  ;;  %v2295_v3 = vand.u32 2147483648, %v3941_v58 }
 0xc6f   : > { %3205 = vpow2.f32 %v2231_v59  ;;  %v2257_v0 = vmul.f32 %v3937_v2, %v2256_v60  ;;  %vm2279_vm8 = vcmp.eq.f32.partialorder %v2278_v9, 8.507059e+37  ;;  %vm2289_vm10 = vweird.f32 %v3941_v58 }
 0xc70   : > { %v2243_v55 = vadd.f32 %v3194_v10, %v2242_v61  ;;  %v2296_v5 = vor.u32 1.1754944e-38, %v2295_v3  ;;  %vm2294_vm13 = vcmp.eq.f32.partialorder %v2293_v41, 8.507059e+37 }
 0xc71   : > { %v3200_v63 = vpop.eup %3199  ;;  %v2258_v15 = vadd.f32 %v3937_v2, %v2257_v0 }
 0xc72   : > { %v2270_v25 = vmul.f32 %v3200_v63, %v2235_v53  ;;  %v3202_v26 = vpop.eup %3201  ;;  %v2247_v29 = vsel %vm3948_vm3, %v3194_v10, %v2243_v55  ;;  %vm2275_vm14 = vweird.f32 %v3200_v63 }
 0xc73   : > { %v3956_v27 = vadd.f32 1.0, %v3202_v26  ;;  %v2252_v38 = vsel %vm3952_vm4, %v2251_v21, %v2247_v29  ;;  %v2262_v43 = vsel %vm3968_vm15, %v3937_v2, %v2258_v15  ;;  %vm2276_vm6 = vmor %vm2274_vm5, %vm2275_vm14 }
 0xc74   : > { %v3204_v48 = vpop.eup %3203  ;;  %v2271_v4 = vsub.f32 1.0, %v2270_v25  ;;  %v2329_v51 = vmul.f32 %v2252_v38, %v3892_v22  ;;  %v2267_v17 = vsel %vm2264_vm9, %v2266_v45, %v2262_v43 }
 0xc75   : > { %v2285_v8 = vmul.f32 %v3204_v48, %v3941_v58  ;;  %v3206_v30 = vpop.eup %3205  ;;  %3207 = vrcp.f32 %v3956_v27  ;;  %vm2290_vm7 = vweird.f32 %v3204_v48  ;;  %v2330_v56 = vmul.f32 %v2267_v17, %v3894_v14 }
 0xc76   : > { %v2272_v19 = vmul.f32 %v3200_v63, %v2271_v4  ;;  %v2238_v37 = vadd.f32 1.0, %v3206_v30  ;;  %vm2291_vm11 = vmor %vm2289_vm10, %vm2290_vm7  ;;  %v2308_v58 = vand.u32 2147483647, %v3956_v27  ;;  %vm2304_vm3 = vweird.f32 %v3956_v27 }
 0xc77   : > { %v2286_v33 = vsub.f32 1.0, %v2285_v8 }
 0xc78   : > { %v2273_v40 = vadd.f32 %v3200_v63, %v2272_v19  ;;  %3209 = vrcp.f32 %v2238_v37  ;;  %v2325_v14 = vand.u32 2147483648, %v2238_v37  ;;  %v2323_v62 = vand.u32 2147483647, %v2238_v37 }
 0xc79   : > { %v2287_v44 = vmul.f32 %v3204_v48, %v2286_v33  ;;  %vm2309_vm14 = vcmp.eq.f32.partialorder %v2308_v58, 8.507059e+37  ;;  %vm2319_vm5 = vweird.f32 %v2238_v37 }
 0xc7a   : > { %v2277_v49 = vsel %vm2276_vm6, %v3200_v63, %v2273_v40  ;;  %v2326_v25 = vor.u32 1.1754944e-38, %v2325_v14  ;;  %vm2324_vm6 = vcmp.eq.f32.partialorder %v2323_v62, 8.507059e+37 }
 0xc7b   : > { %v2282_v46 = vsel %vm2279_vm8, %v2281_v31, %v2277_v49  ;;  %v2288_v13 = vadd.f32 %v3204_v48, %v2287_v44  ;;  %v3208_v50 = vpop.eup %3207 }
 0xc7c   : > { %v2331_v7 = vmul.f32 %v2282_v46, %v3910_v34  ;;  %v2300_v53 = vmul.f32 %v3208_v50, %v3956_v27  ;;  %vm2305_vm2 = vweird.f32 %v3208_v50  ;;  %v2310_v34 = vand.u32 2147483648, %v3956_v27 }
 0xc7d   : > { %v2292_v10 = vsel %vm2291_vm11, %v3204_v48, %v2288_v13  ;;  %vm2306_vm4 = vmor %vm2304_vm3, %vm2305_vm2 }
 0xc7e   : > { %v2335_v54 = vpack.c.bf16 %v2331_v7, %v2329_v51  ;;  %v2297_v2 = vsel %vm2294_vm13, %v2296_v5, %v2292_v10  ;;  %v3210_v11 = vpop.eup %3209  ;;  %v2301_v28 = vsub.f32 1.0, %v2300_v53  ;;  %v2311_v1 = vor.u32 1.1754944e-38, %v2310_v34 }
 0xc7f   : > { %v2332_v24 = vmul.f32 %v2297_v2, %v3912_v35  ;;  %v2315_v52 = vmul.f32 %v3210_v11, %v2238_v37  ;;  %vm2320_vm12 = vweird.f32 %v3210_v11 }
 0xc80   : > { %2479 = vmatmul.bf16.vlgmr.msra.gmra.mxu2 %v2335_v54  ;;  %v2302_v57 = vmul.f32 %v3208_v50, %v2301_v28  ;;  %vm2321_vm15 = vmor %vm2319_vm5, %vm2320_vm12 }
 0xc81   : > { %v2336_v22 = vpack.c.bf16 %v2332_v24, %v2330_v56  ;;  %v2316_v59 = vsub.f32 1.0, %v2315_v52 }
 0xc82   : > { %v2303_v60 = vadd.f32 %v3208_v50, %v2302_v57 }
 0xc83   : > { %2497 = vmatmul.bf16.vlgmr.msra.gmra.mxu3 %v2336_v22  ;;  %v2317_v61 = vmul.f32 %v3210_v11, %v2316_v59 }
 0xc84   : > { %v2307_v35 = vsel %vm2306_vm4, %v3208_v50, %v2303_v60 }
 0xc85   : > { %v2318_v63 = vadd.f32 %v3210_v11, %v2317_v61  ;;  %v2312_v55 = vsel %vm2309_vm14, %v2311_v1, %v2307_v35 }
 0xc86   : > { %v2333_v26 = vmul.f32 %v2312_v55, %v3931_v12 }
 0xc87   : > { %v2322_v0 = vsel %vm2321_vm15, %v3210_v11, %v2318_v63 }
 0xc88   : > { %v2327_v23 = vsel %vm2324_vm6, %v2326_v25, %v2322_v0  ;;  %v2337_v32 = vpack.c.bf16 %v2333_v26, %v2333_v26 }
 0xc89   : > { %v2334_v20 = vmul.f32 %v2327_v23, %v3933_v6 }
 0xc8b   : > { %v2338_v48 = vpack.c.bf16 %v2334_v20, %v2334_v20 }
 0xc90   : > { %2484 = vmatmul.bf16.gmra.mxu2 %v2337_v32 }
 0xc93   : > { %2502 = vmatmul.bf16.gmra.mxu3 %v2338_v48 }
 0xd03   : > { %v2480_v18 = vpop.f32.mrf.mxu2 }
 0xd04   : > { %v2481_v21 = vadd.f32 %v3124_v16, %v2480_v18 }
 0xd06   : > { %v2498_v4 = vpop.f32.mrf.mxu3 }
 0xd07   : > { %v2499_v27 = vadd.f32 %v2498_v4, %v2481_v21 }
 0xd09   : > { %v2507_v12 = vadd.f32 %v2499_v27, %v3764_v36 }
 0xd0b   : > { %2510 = vst.msk [vmem:[%s548_s20] sm:$0xff] %vm555_vm0, %v2507_v12  ;;  %v2482_v6 = vpop.f32.mrf.mxu2 }
 0xd0c   : > { %v2483_v29 = vadd.f32 %v3124_v16, %v2482_v6 }
 0xd0e   : > { %v2500_v15 = vpop.f32.mrf.mxu3 }
 0xd0f   : > { %v2501_v8 = vadd.f32 %v2500_v15, %v2483_v29 }
 0xd11   : > { %v2508_v30 = vadd.f32 %v2501_v8, %v3770_v42 }
 0xd13   : > { %2511 = vst.msk [vmem:[%s548_s20 + $0x8] sm:$0xff] %vm555_vm0, %v2508_v30  ;;  %v2485_v19 = vpop.f32.mrf.mxu2 }
 0xd14   : > { %v2486_v9 = vadd.f32 %v3124_v16, %v2485_v19 }
 0xd16   : > { %v2503_v31 = vpop.f32.mrf.mxu3 }
 0xd17   : > { %v2504_v33 = vadd.f32 %v2503_v31, %v2486_v9 }
 0xd19   : > { %v2509_v37 = vadd.f32 %v2504_v33, %v3776_v47 }
 0xd1b   : > { %2512 = vst.msk [vmem:[%s548_s20 + $0x10] sm:$0x1] %vm562_vm1, %v2509_v37  ;;  %v2487_v38 = vpop.f32.mrf.mxu2 }
 0xd1e   : > { %v2505_v36 = vpop.f32.mrf.mxu3 }
 0xd1f PF: > { %s27_s24 = sadd.s32 1, %s3220_s24  }
 0xd20   : > { %p24_p4 = scmp.ge.s32.totalorder %s27_s24, 4  }
 0xd22   :  { %26 = sbr.rel (!%p24_p4) target bundleno = 3 (0x3), region = 139 }

</bundles_post_ra>
